<compile_context>
chip_gen: v5e
topology: v5e:2x2
jax: 0.10.0
libtpu: 0.0.40
codegen_flags: <defaults>
</compile_context>

<pallas_src>
import jax
import jax.numpy as jnp
import numpy as np
from jax.experimental import pallas as pl
from jax.experimental.pallas import tpu as pltpu

EPS = 1e-5
MXU_DTYPE = jnp.bfloat16              # MXU operand dtype (f32 accumulation)
_VMEM_LIMIT = 32 * 1024 * 1024        # fits scoped VMEM on v5e / v6e / v7x


def _grid_batches(B):
    """v7x has 2 TensorCores/chip -> keep a parallel batch grid axis; v5e/v6e
    are single-TC -> collapse the grid to one step (bigger dots, no per-step
    ~0.35us overhead)."""
    try:
        kind = jax.devices()[0].device_kind.lower()
    except Exception:
        kind = ""
    if B > 1 and ("v7" in kind or "7x" in kind):
        return B
    return 1


# --------------------------- the fused Pallas kernel -------------------------

def _make_kernel(b_blk, C, Z, H, W):
    WC = W * C
    f32 = jnp.float32

    def kernel(xt0_ref, xt1_ref, xt2_ref,
               w0_ref, b0_ref, w1_ref, b1_ref, w2_ref, b2_ref,
               pw1_ref, pb1_ref, pw2_ref, pb2_ref, wa_ref, ba_ref,
               wf0_ref, wf1_ref, wf2_ref, bfc_ref,
               o_ref, g2_scr):
        for bb in range(b_blk):                      # static, b_blk in {1, 2}
            # -- tri-plane Linear projections: block-diagonal (eye(W)-folded)
            #    bf16 weights -> lane-dense (.., W*C) f32 tiles off the MXU.
            p0 = jnp.dot(xt0_ref[bb], w0_ref[...],
                         preferred_element_type=f32) + b0_ref[...]      # (H,  WC)
            p1 = jnp.dot(xt1_ref[bb], w1_ref[...],
                         preferred_element_type=f32) + b1_ref[...]      # (Z,  WC)
            p2 = jnp.dot(xt2_ref[bb], w2_ref[...],
                         preferred_element_type=f32) + b2_ref[...]      # (ZH, WC)

            # -- pooling MLP + BN1d(eval) + ReLU + attention Linears + sigmoid,
            #    computed in-kernel.  The spatial mean over x is folded into
            #    pw1, fed by a row-sum of the already-resident xt2 view.
            xsum = jnp.sum(xt2_ref[bb].astype(f32), axis=0, keepdims=True)  # (1, WC)
            hid = jnp.dot(xsum, pw1_ref[...],
                          preferred_element_type=f32) + pb1_ref[...]
            hid = jnp.maximum(hid, 0.0)
            pf = jnp.dot(hid, pw2_ref[...],
                         preferred_element_type=f32) + pb2_ref[...]         # (1, C)
            g = jax.nn.sigmoid(
                jnp.dot(pf.astype(MXU_DTYPE), wa_ref[...],
                        preferred_element_type=f32) + ba_ref[...])          # (1, (Z+H+1)*WC)

            # h-gates vary along output rows: move the H lane blocks into rows
            # via a tiny VMEM scratch (plain sublane stores, no risky reshape).
            for h in range(H):
                g2_scr[pl.ds(h, 1), :] = g[:, (Z + h) * WC:(Z + h + 1) * WC]
            g2m = g2_scr[...]                                                # (H, WC)

            # -- gated tri-plane features, already in the output layout
            #    rows = (z, h), lanes = (w, c); all concats are H(=8)-row aligned.
            f0 = jnp.concatenate(
                [p0 * g[:, z * WC:(z + 1) * WC] for z in range(Z)], axis=0)  # (ZH, WC)
            f1 = jnp.concatenate(
                [p1[z:z + 1, :] * g2m for z in range(Z)], axis=0)            # (ZH, WC)
            f2 = p2 * g[:, (Z + H) * WC:]                                    # (ZH, WC)

            # -- Conv3d(1x1, 3C->C) + BN3d(eval) + ReLU: three accumulated bf16
            #    MXU dots against per-plane block-diagonal folded weights.
            acc = jnp.dot(f0.astype(MXU_DTYPE), wf0_ref[...],
                          preferred_element_type=f32)
            acc = acc + jnp.dot(f1.astype(MXU_DTYPE), wf1_ref[...],
                                preferred_element_type=f32)
            acc = acc + jnp.dot(f2.astype(MXU_DTYPE), wf2_ref[...],
                                preferred_element_type=f32)
            o_ref[bb] = jnp.maximum(acc + bfc_ref[...], 0.0).astype(o_ref.dtype)

    return kernel


# --------------------------- parameter folding -------------------------------

def fold_params(params, C, Z, H, W):
    """One-time inference-side folding / re-layout of the module weights."""
    inv_std = 1.0 / np.sqrt(1.0 + EPS)          # BN eval: running mean=0, var=1
    WC = W * C
    eye_w = jnp.eye(W, dtype=jnp.float32)

    def tile_lanes(vec):                        # (C,) -> (1, W*C), tiled over w
        return jnp.broadcast_to(vec.reshape(1, C), (W, C)).reshape(1, WC)

    # tri-plane Linears: fold eye(W) (block-diagonal) so the in-kernel dots
    # emit lane-dense (.., W*C) outputs directly.
    w0 = jnp.einsum("ko,wv->wkvo", params["lin_w0"], eye_w).reshape(W * Z * C, WC)
    w1 = jnp.einsum("ko,wv->wkvo", params["lin_w1"], eye_w).reshape(W * H * C, WC)
    w2 = jnp.tile(params["lin_w2"], (1, W))                    # broadcast over out-w

    # pooling MLP: fold BN1d(eval) and the 1/(Z*H*W) spatial mean into Linear 1.
    s1 = params["pool_bn_g"] * inv_std
    w1f = params["pool_w1"] * s1[None, :]
    b1f = params["pool_b1"] * s1 + params["pool_bn_b"]
    pool_w1 = jnp.tile(w1f, (W, 1)) / float(Z * H * W)         # consumes xsum lanes (w, c)

    # attention Linears: permute columns to (k-major, c), tile over w so the
    # gate vector's lanes are (w, c) per k-slice.
    def perm(w, b, n):
        wp = jnp.transpose(w.reshape(C, C, n), (0, 2, 1)).reshape(C, n * C)
        bp = jnp.transpose(b.reshape(C, n), (1, 0)).reshape(n * C)
        return wp, bp

    def tile_cols(wp, bp, n):
        wt = jnp.broadcast_to(wp.reshape(C, n, 1, C), (C, n, W, C)).reshape(C, n * W * C)
        bt = jnp.broadcast_to(bp.reshape(n, 1, C), (n, W, C)).reshape(n * W * C)
        return wt, bt

    a1w, a1b = perm(params["attn_w1"], params["attn_b1"], Z)
    a1w, a1b = tile_cols(a1w, a1b, Z)
    a2w, a2b = perm(params["attn_w2"], params["attn_b2"], H)
    a2w, a2b = tile_cols(a2w, a2b, H)
    a3w, a3b = perm(params["attn_w3"], params["attn_b3"], W)   # already (w, c) order
    attn_w = jnp.concatenate([a1w, a2w, a3w], axis=1)          # (C, (Z+H+1)*W*C)
    attn_b = jnp.concatenate([a1b, a2b, a3b], axis=0)

    # Conv3d(1x1, 3C->C) + BN3d(eval): fold BN, split per plane, block-diag over w.
    s_out = params["out_bn_g"] * inv_std
    w_eff = params["conv_w"] * s_out[None, :]                  # (3C, C)
    b_eff = params["conv_b"] * s_out + params["out_bn_b"]
    wf = [jnp.einsum("io,wv->wivo", w_eff[p * C:(p + 1) * C, :], eye_w).reshape(WC, WC)
          for p in range(3)]

    # NOTE(v7x VMEM audit): folded weights scale as O((W*C)^2); stored in bf16
    # they total < 0.5 MiB here, far under the 32 MiB scoped-VMEM budget.
    return {
        "w0": w0.astype(MXU_DTYPE), "b0": tile_lanes(params["lin_b0"]),
        "w1": w1.astype(MXU_DTYPE), "b1": tile_lanes(params["lin_b1"]),
        "w2": w2.astype(MXU_DTYPE), "b2": tile_lanes(params["lin_b2"]),
        "pool_w1": pool_w1, "pool_b1": b1f.reshape(1, 2 * C),
        "pool_w2": params["pool_w2"], "pool_b2": params["pool_b2"].reshape(1, C),
        "attn_w": attn_w.astype(MXU_DTYPE), "attn_b": attn_b.reshape(1, -1),
        "wf0": wf[0].astype(MXU_DTYPE), "wf1": wf[1].astype(MXU_DTYPE),
        "wf2": wf[2].astype(MXU_DTYPE), "bf": tile_lanes(b_eff),
    }


# ------------------------------ forward --------------------------------------

def custom_tri_res_forward(x, fp):
    """x: (B, C, Z, H, W) float32 -> (B, C, Z, H, W) float32 (attn=True, residual=False)."""
    B, C, Z, H, W = x.shape
    WC, ZH = W * C, Z * H

    # lane-dense, MXU-ready views of x (bf16 cast fused into the transposes)
    xt0 = jnp.transpose(x, (0, 3, 4, 2, 1)).reshape(B, H, W * Z * C).astype(MXU_DTYPE)
    xt1 = jnp.transpose(x, (0, 2, 4, 3, 1)).reshape(B, Z, W * H * C).astype(MXU_DTYPE)
    xt2 = jnp.transpose(x, (0, 2, 3, 4, 1)).reshape(B, ZH, WC).astype(MXU_DTYPE)

    grid_b = _grid_batches(B)
    b_blk = B // grid_b
    kernel = _make_kernel(b_blk, C, Z, H, W)

    def batched(shape):
        return pl.BlockSpec((b_blk,) + tuple(shape[1:]), lambda b: (b, 0, 0))

    def whole(arr):
        return pl.BlockSpec(arr.shape, lambda b: (0, 0))

    weights = (fp["w0"], fp["b0"], fp["w1"], fp["b1"], fp["w2"], fp["b2"],
               fp["pool_w1"], fp["pool_b1"], fp["pool_w2"], fp["pool_b2"],
               fp["attn_w"], fp["attn_b"],
               fp["wf0"], fp["wf1"], fp["wf2"], fp["bf"])

    out_cl = pl.pallas_call(
        kernel,
        out_shape=jax.ShapeDtypeStruct((B, ZH, WC), jnp.float32),
        grid=(grid_b,),
        in_specs=[batched(xt0.shape), batched(xt1.shape), batched(xt2.shape)]
                 + [whole(w) for w in weights],
        out_specs=pl.BlockSpec((b_blk, ZH, WC), lambda b: (b, 0, 0)),
        scratch_shapes=[pltpu.VMEM((H, WC), jnp.float32)],
        compiler_params=pltpu.CompilerParams(
            dimension_semantics=("parallel",),
            vmem_limit_bytes=_VMEM_LIMIT),
    )(xt0, xt1, xt2, *weights)

    # TODO(synk): if the downstream consumer accepts channels-last, this final
    # NDHWC -> NCDHW transpose (one extra HBM pass) can be dropped.
    return jnp.transpose(out_cl.reshape(B, Z, H, W, C), (0, 4, 1, 2, 3))


# --------------------- pure-JAX reference (PyTorch mirror) -------------------

def reference_forward(x, params):
    B, C, Z, H, W = x.shape
    pool_in = jnp.mean(x.reshape(B, C, -1), axis=-1)
    h = pool_in @ params["pool_w1"] + params["pool_b1"]
    h = (h / jnp.sqrt(1.0 + EPS)) * params["pool_bn_g"] + params["pool_bn_b"]
    h = jnp.maximum(h, 0.0)
    pool_feats = h @ params["pool_w2"] + params["pool_b2"]

    xt0 = jnp.transpose(x, (0, 3, 4, 2, 1)).reshape(B, H, W, Z * C)
    xt1 = jnp.transpose(x, (0, 4, 2, 3, 1)).reshape(B, W, Z, H * C)
    xt2 = jnp.transpose(x, (0, 2, 3, 4, 1)).reshape(B, Z, H, W * C)
    f0 = jnp.transpose(xt0 @ params["lin_w0"] + params["lin_b0"], (0, 3, 1, 2))
    f1 = jnp.transpose(xt1 @ params["lin_w1"] + params["lin_b1"], (0, 3, 1, 2))
    f2 = jnp.transpose(xt2 @ params["lin_w2"] + params["lin_b2"], (0, 3, 1, 2))

    a1 = jax.nn.sigmoid((pool_feats @ params["attn_w1"] + params["attn_b1"]
                         ).reshape(B, C, Z, 1, 1))
    a2 = jax.nn.sigmoid((pool_feats @ params["attn_w2"] + params["attn_b2"]
                         ).reshape(B, C, 1, H, 1))
    a3 = jax.nn.sigmoid((pool_feats @ params["attn_w3"] + params["attn_b3"]
                         ).reshape(B, C, 1, 1, W))

    f0 = f0[:, :, None, :, :] * a1
    f1 = jnp.transpose(f1[:, :, :, None, :], (0, 1, 4, 3, 2)) * a2
    f2 = f2[:, :, :, :, None] * a3
    fused = jnp.concatenate([f0, f1, f2], axis=1)

    y = jnp.einsum("bizhw,io->bozhw", fused, params["conv_w"]) \
        + params["conv_b"][None, :, None, None, None]
    y = (y / jnp.sqrt(1.0 + EPS)) * params["out_bn_g"][None, :, None, None, None] \
        + params["out_bn_b"][None, :, None, None, None]
    return jnp.maximum(y, 0.0)


# ------------------------------ params ---------------------------------------

def init_params(key, C, Z, H, W):
    ks = jax.random.split(key, 22)

    def w(k, shape, scale=0.05):
        return jax.random.normal(k, shape, jnp.float32) * scale

    return {
        "lin_w0": w(ks[0], (C * Z, C)), "lin_b0": w(ks[1], (C,)),
        "lin_w1": w(ks[2], (C * H, C)), "lin_b1": w(ks[3], (C,)),
        "lin_w2": w(ks[4], (C * W, C)), "lin_b2": w(ks[5], (C,)),
        "pool_w1": w(ks[6], (C, 2 * C)), "pool_b1": w(ks[7], (2 * C,)),
        "pool_bn_g": 1.0 + 0.1 * jax.random.normal(ks[8], (2 * C,), jnp.float32),
        "pool_bn_b": w(ks[9], (2 * C,)),
        "pool_w2": w(ks[10], (2 * C, C)), "pool_b2": w(ks[11], (C,)),
        "attn_w1": w(ks[12], (C, C * Z)), "attn_b1": w(ks[13], (C * Z,)),
        "attn_w2": w(ks[14], (C, C * H)), "attn_b2": w(ks[15], (C * H,)),
        "attn_w3": w(ks[16], (C, C * W)), "attn_b3": w(ks[17], (C * W,)),
        "conv_w": w(ks[18], (3 * C, C)), "conv_b": w(ks[19], (C,)),
        "out_bn_g": 1.0 + 0.1 * jax.random.normal(ks[20], (C,), jnp.float32),
        "out_bn_b": w(ks[21], (C,)),
    }


if __name__ == "__main__":
    # grid_config implied: grid_size = (Gx, Gy, Gz) = (W, H, Z) = (8, 8, 4)
    B, C, Z, H, W = 2, 16, 4, 8, 8           # W*C = 128 -> one full lane width
    key = jax.random.PRNGKey(0)
    kx, kp = jax.random.split(key)
    x = jax.random.normal(kx, (B, C, Z, H, W), jnp.float32)
    params = init_params(kp, C, Z, H, W)
    fp = fold_params(params, C, Z, H, W)

    fwd = jax.jit(custom_tri_res_forward)
    out = jax.block_until_ready(fwd(x, fp))
    ref = jax.block_until_ready(reference_forward(x, params))
    # tolerance accounts for bf16 MXU operands (projections, gates, conv fold)
    np.testing.assert_allclose(np.asarray(out), np.asarray(ref),
                               rtol=2e-2, atol=1e-2)
    assert out.shape == (B, C, Z, H, W)
    print("KERNEL_OK")
</pallas_src>

<mosaic_0001>
module attributes {stable_mosaic.version = 11 : i64} {
  func.func @kernel(%arg0: i32, %arg1: memref<2x8x512xbf16, #tpu.memory_space<vmem>>, %arg2: memref<2x4x1024xbf16, #tpu.memory_space<vmem>>, %arg3: memref<2x32x128xbf16, #tpu.memory_space<vmem>>, %arg4: memref<512x128xbf16, #tpu.memory_space<vmem>>, %arg5: memref<1x128xf32, #tpu.memory_space<vmem>>, %arg6: memref<1024x128xbf16, #tpu.memory_space<vmem>>, %arg7: memref<1x128xf32, #tpu.memory_space<vmem>>, %arg8: memref<128x128xbf16, #tpu.memory_space<vmem>>, %arg9: memref<1x128xf32, #tpu.memory_space<vmem>>, %arg10: memref<128x32xf32, #tpu.memory_space<vmem>>, %arg11: memref<1x32xf32, #tpu.memory_space<vmem>>, %arg12: memref<32x16xf32, #tpu.memory_space<vmem>>, %arg13: memref<1x16xf32, #tpu.memory_space<vmem>>, %arg14: memref<16x1664xbf16, #tpu.memory_space<vmem>>, %arg15: memref<1x1664xf32, #tpu.memory_space<vmem>>, %arg16: memref<128x128xbf16, #tpu.memory_space<vmem>>, %arg17: memref<128x128xbf16, #tpu.memory_space<vmem>>, %arg18: memref<128x128xbf16, #tpu.memory_space<vmem>>, %arg19: memref<1x128xf32, #tpu.memory_space<vmem>>, %arg20: memref<2x32x128xf32, #tpu.memory_space<vmem>>, %arg21: memref<8x128xf32, #tpu.memory_space<vmem>>) attributes {dimension_semantics = [#tpu.dimension_semantics<parallel>], iteration_bounds = array<i64: 1>, scalar_prefetch = 0 : i64, scratch_operands = 1 : i64, tpu.core_type = #tpu.core_type<tc>, window_params = [{transform_indices = @transform_0, window_bounds = array<i64: 2, 8, 512>}, {transform_indices = @transform_1, window_bounds = array<i64: 2, 4, 1024>}, {transform_indices = @transform_2, window_bounds = array<i64: 2, 32, 128>}, {pipeline_mode = #tpu.pipeline_mode<synchronous>, transform_indices = @transform_3, window_bounds = array<i64: 512, 128>}, {pipeline_mode = #tpu.pipeline_mode<synchronous>, transform_indices = @transform_4, window_bounds = array<i64: 1, 128>}, {pipeline_mode = #tpu.pipeline_mode<synchronous>, transform_indices = @transform_5, window_bounds = array<i64: 1024, 128>}, {pipeline_mode = #tpu.pipeline_mode<synchronous>, transform_indices = @transform_6, window_bounds = array<i64: 1, 128>}, {pipeline_mode = #tpu.pipeline_mode<synchronous>, transform_indices = @transform_7, window_bounds = array<i64: 128, 128>}, {pipeline_mode = #tpu.pipeline_mode<synchronous>, transform_indices = @transform_8, window_bounds = array<i64: 1, 128>}, {pipeline_mode = #tpu.pipeline_mode<synchronous>, transform_indices = @transform_9, window_bounds = array<i64: 128, 32>}, {pipeline_mode = #tpu.pipeline_mode<synchronous>, transform_indices = @transform_10, window_bounds = array<i64: 1, 32>}, {pipeline_mode = #tpu.pipeline_mode<synchronous>, transform_indices = @transform_11, window_bounds = array<i64: 32, 16>}, {pipeline_mode = #tpu.pipeline_mode<synchronous>, transform_indices = @transform_12, window_bounds = array<i64: 1, 16>}, {pipeline_mode = #tpu.pipeline_mode<synchronous>, transform_indices = @transform_13, window_bounds = array<i64: 16, 1664>}, {pipeline_mode = #tpu.pipeline_mode<synchronous>, transform_indices = @transform_14, window_bounds = array<i64: 1, 1664>}, {pipeline_mode = #tpu.pipeline_mode<synchronous>, transform_indices = @transform_15, window_bounds = array<i64: 128, 128>}, {pipeline_mode = #tpu.pipeline_mode<synchronous>, transform_indices = @transform_16, window_bounds = array<i64: 128, 128>}, {pipeline_mode = #tpu.pipeline_mode<synchronous>, transform_indices = @transform_17, window_bounds = array<i64: 128, 128>}, {pipeline_mode = #tpu.pipeline_mode<synchronous>, transform_indices = @transform_18, window_bounds = array<i64: 1, 128>}, {transform_indices = @transform_19, window_bounds = array<i64: 2, 32, 128>}]} {
    %c0 = arith.constant 0 : index
    %c0_0 = arith.constant 0 : index
    %c0_1 = arith.constant 0 : index
    %0 = vector.load %arg1[%c0, %c0_0, %c0_1] : memref<2x8x512xbf16, #tpu.memory_space<vmem>>, vector<1x8x512xbf16>
    %1 = vector.shape_cast %0 : vector<1x8x512xbf16> to vector<8x512xbf16>
    %c0_2 = arith.constant 0 : index
    %c0_3 = arith.constant 0 : index
    %2 = vector.load %arg4[%c0_2, %c0_3] : memref<512x128xbf16, #tpu.memory_space<vmem>>, vector<512x128xbf16>
    %cst = arith.constant dense<0.000000e+00> : vector<8x128xf32>
    %3 = tpu.matmul %1, %2, %cst {dimension_numbers = #tpu.dot_dimension_numbers<[1], [0], [0], [1], [0, 0, 1, 1], [], []>} : vector<8x512xbf16>, vector<512x128xbf16>, vector<8x128xf32> -> vector<8x128xf32>
    %c0_4 = arith.constant 0 : index
    %c0_5 = arith.constant 0 : index
    %4 = vector.load %arg5[%c0_4, %c0_5] : memref<1x128xf32, #tpu.memory_space<vmem>>, vector<1x128xf32>
    %5 = vector.broadcast %4 : vector<1x128xf32> to vector<8x128xf32>
    %6 = arith.addf %3, %5 : vector<8x128xf32>
    %c0_6 = arith.constant 0 : index
    %c0_7 = arith.constant 0 : index
    %c0_8 = arith.constant 0 : index
    %7 = vector.load %arg2[%c0_6, %c0_7, %c0_8] : memref<2x4x1024xbf16, #tpu.memory_space<vmem>>, vector<1x4x1024xbf16>
    %8 = vector.shape_cast %7 : vector<1x4x1024xbf16> to vector<4x1024xbf16>
    %c0_9 = arith.constant 0 : index
    %c0_10 = arith.constant 0 : index
    %9 = vector.load %arg6[%c0_9, %c0_10] : memref<1024x128xbf16, #tpu.memory_space<vmem>>, vector<1024x128xbf16>
    %cst_11 = arith.constant dense<0.000000e+00> : vector<4x128xf32>
    %10 = tpu.matmul %8, %9, %cst_11 {dimension_numbers = #tpu.dot_dimension_numbers<[1], [0], [0], [1], [0, 0, 1, 1], [], []>} : vector<4x1024xbf16>, vector<1024x128xbf16>, vector<4x128xf32> -> vector<4x128xf32>
    %c0_12 = arith.constant 0 : index
    %c0_13 = arith.constant 0 : index
    %11 = vector.load %arg7[%c0_12, %c0_13] : memref<1x128xf32, #tpu.memory_space<vmem>>, vector<1x128xf32>
    %12 = vector.broadcast %11 : vector<1x128xf32> to vector<4x128xf32>
    %13 = arith.addf %10, %12 : vector<4x128xf32>
    %c0_14 = arith.constant 0 : index
    %c0_15 = arith.constant 0 : index
    %c0_16 = arith.constant 0 : index
    %14 = vector.load %arg3[%c0_14, %c0_15, %c0_16] : memref<2x32x128xbf16, #tpu.memory_space<vmem>>, vector<1x32x128xbf16>
    %15 = vector.shape_cast %14 : vector<1x32x128xbf16> to vector<32x128xbf16>
    %c0_17 = arith.constant 0 : index
    %c0_18 = arith.constant 0 : index
    %16 = vector.load %arg8[%c0_17, %c0_18] : memref<128x128xbf16, #tpu.memory_space<vmem>>, vector<128x128xbf16>
    %cst_19 = arith.constant dense<0.000000e+00> : vector<32x128xf32>
    %17 = tpu.matmul %15, %16, %cst_19 {dimension_numbers = #tpu.dot_dimension_numbers<[1], [0], [0], [1], [0, 0, 1, 1], [], []>} : vector<32x128xbf16>, vector<128x128xbf16>, vector<32x128xf32> -> vector<32x128xf32>
    %c0_20 = arith.constant 0 : index
    %c0_21 = arith.constant 0 : index
    %18 = vector.load %arg9[%c0_20, %c0_21] : memref<1x128xf32, #tpu.memory_space<vmem>>, vector<1x128xf32>
    %19 = vector.broadcast %18 : vector<1x128xf32> to vector<32x128xf32>
    %20 = arith.addf %17, %19 : vector<32x128xf32>
    %c0_22 = arith.constant 0 : index
    %c0_23 = arith.constant 0 : index
    %c0_24 = arith.constant 0 : index
    %21 = vector.load %arg3[%c0_22, %c0_23, %c0_24] : memref<2x32x128xbf16, #tpu.memory_space<vmem>>, vector<1x32x128xbf16>
    %22 = vector.shape_cast %21 : vector<1x32x128xbf16> to vector<32x128xbf16>
    %23 = arith.extf %22 : vector<32x128xbf16> to vector<32x128xf32>
    %cst_25 = arith.constant dense<0.000000e+00> : vector<128xf32>
    %24 = vector.multi_reduction <add>, %23, %cst_25 [0] : vector<32x128xf32> to vector<128xf32>
    %25 = vector.shape_cast %24 : vector<128xf32> to vector<1x128xf32>
    %c0_26 = arith.constant 0 : index
    %c0_27 = arith.constant 0 : index
    %26 = vector.load %arg10[%c0_26, %c0_27] : memref<128x32xf32, #tpu.memory_space<vmem>>, vector<128x32xf32>
    %cst_28 = arith.constant dense<0.000000e+00> : vector<1x32xf32>
    %27 = tpu.matmul %25, %26, %cst_28 {dimension_numbers = #tpu.dot_dimension_numbers<[1], [0], [0], [1], [0, 0, 1, 1], [], []>} : vector<1x128xf32>, vector<128x32xf32>, vector<1x32xf32> -> vector<1x32xf32>
    %c0_29 = arith.constant 0 : index
    %c0_30 = arith.constant 0 : index
    %28 = vector.load %arg11[%c0_29, %c0_30] : memref<1x32xf32, #tpu.memory_space<vmem>>, vector<1x32xf32>
    %29 = arith.addf %27, %28 : vector<1x32xf32>
    %cst_31 = arith.constant 0.000000e+00 : f32
    %30 = vector.broadcast %cst_31 : f32 to vector<1x32xf32>
    %31 = arith.maximumf %29, %30 : vector<1x32xf32>
    %c0_32 = arith.constant 0 : index
    %c0_33 = arith.constant 0 : index
    %32 = vector.load %arg12[%c0_32, %c0_33] : memref<32x16xf32, #tpu.memory_space<vmem>>, vector<32x16xf32>
    %cst_34 = arith.constant dense<0.000000e+00> : vector<1x16xf32>
    %33 = tpu.matmul %31, %32, %cst_34 {dimension_numbers = #tpu.dot_dimension_numbers<[1], [0], [0], [1], [0, 0, 1, 1], [], []>} : vector<1x32xf32>, vector<32x16xf32>, vector<1x16xf32> -> vector<1x16xf32>
    %c0_35 = arith.constant 0 : index
    %c0_36 = arith.constant 0 : index
    %34 = vector.load %arg13[%c0_35, %c0_36] : memref<1x16xf32, #tpu.memory_space<vmem>>, vector<1x16xf32>
    %35 = arith.addf %33, %34 : vector<1x16xf32>
    %36 = arith.truncf %35 : vector<1x16xf32> to vector<1x16xbf16>
    %c0_37 = arith.constant 0 : index
    %c0_38 = arith.constant 0 : index
    %37 = vector.load %arg14[%c0_37, %c0_38] : memref<16x1664xbf16, #tpu.memory_space<vmem>>, vector<16x1664xbf16>
    %cst_39 = arith.constant dense<0.000000e+00> : vector<1x1664xf32>
    %38 = tpu.matmul %36, %37, %cst_39 {dimension_numbers = #tpu.dot_dimension_numbers<[1], [0], [0], [1], [0, 0, 1, 1], [], []>} : vector<1x16xbf16>, vector<16x1664xbf16>, vector<1x1664xf32> -> vector<1x1664xf32>
    %c0_40 = arith.constant 0 : index
    %c0_41 = arith.constant 0 : index
    %39 = vector.load %arg15[%c0_40, %c0_41] : memref<1x1664xf32, #tpu.memory_space<vmem>>, vector<1x1664xf32>
    %40 = arith.addf %38, %39 : vector<1x1664xf32>
    %41 = arith.negf %40 : vector<1x1664xf32>
    %42 = math.exp %41 : vector<1x1664xf32>
    %cst_42 = arith.constant 1.000000e+00 : f32
    %43 = vector.broadcast %cst_42 : f32 to vector<1x1664xf32>
    %44 = arith.addf %43, %42 : vector<1x1664xf32>
    %45 = arith.divf %43, %44 : vector<1x1664xf32>
    %46 = vector.extract_strided_slice %45 {offsets = [0, 512], sizes = [1, 128], strides = [1, 1]} : vector<1x1664xf32> to vector<1x128xf32>
    %c0_43 = arith.constant 0 : index
    %c0_44 = arith.constant 0 : index
    %47 = vector.load %arg21[%c0_43, %c0_44] : memref<8x128xf32, #tpu.memory_space<vmem>>, vector<1x128xf32>
    tpu.vector_store %arg21[%c0_43, %c0_44], %46 {strides = array<i32>} : memref<8x128xf32, #tpu.memory_space<vmem>>, vector<1x128xf32>,
    %48 = vector.extract_strided_slice %45 {offsets = [0, 640], sizes = [1, 128], strides = [1, 1]} : vector<1x1664xf32> to vector<1x128xf32>
    %c1 = arith.constant 1 : index
    %c0_45 = arith.constant 0 : index
    %49 = vector.load %arg21[%c1, %c0_45] : memref<8x128xf32, #tpu.memory_space<vmem>>, vector<1x128xf32>
    tpu.vector_store %arg21[%c1, %c0_45], %48 {strides = array<i32>} : memref<8x128xf32, #tpu.memory_space<vmem>>, vector<1x128xf32>,
    %50 = vector.extract_strided_slice %45 {offsets = [0, 768], sizes = [1, 128], strides = [1, 1]} : vector<1x1664xf32> to vector<1x128xf32>
    %c2 = arith.constant 2 : index
    %c0_46 = arith.constant 0 : index
    %51 = vector.load %arg21[%c2, %c0_46] : memref<8x128xf32, #tpu.memory_space<vmem>>, vector<1x128xf32>
    tpu.vector_store %arg21[%c2, %c0_46], %50 {strides = array<i32>} : memref<8x128xf32, #tpu.memory_space<vmem>>, vector<1x128xf32>,
    %52 = vector.extract_strided_slice %45 {offsets = [0, 896], sizes = [1, 128], strides = [1, 1]} : vector<1x1664xf32> to vector<1x128xf32>
    %c3 = arith.constant 3 : index
    %c0_47 = arith.constant 0 : index
    %53 = vector.load %arg21[%c3, %c0_47] : memref<8x128xf32, #tpu.memory_space<vmem>>, vector<1x128xf32>
    tpu.vector_store %arg21[%c3, %c0_47], %52 {strides = array<i32>} : memref<8x128xf32, #tpu.memory_space<vmem>>, vector<1x128xf32>,
    %54 = vector.extract_strided_slice %45 {offsets = [0, 1024], sizes = [1, 128], strides = [1, 1]} : vector<1x1664xf32> to vector<1x128xf32>
    %c4 = arith.constant 4 : index
    %c0_48 = arith.constant 0 : index
    %55 = vector.load %arg21[%c4, %c0_48] : memref<8x128xf32, #tpu.memory_space<vmem>>, vector<1x128xf32>
    tpu.vector_store %arg21[%c4, %c0_48], %54 {strides = array<i32>} : memref<8x128xf32, #tpu.memory_space<vmem>>, vector<1x128xf32>,
    %56 = vector.extract_strided_slice %45 {offsets = [0, 1152], sizes = [1, 128], strides = [1, 1]} : vector<1x1664xf32> to vector<1x128xf32>
    %c5 = arith.constant 5 : index
    %c0_49 = arith.constant 0 : index
    %57 = vector.load %arg21[%c5, %c0_49] : memref<8x128xf32, #tpu.memory_space<vmem>>, vector<1x128xf32>
    tpu.vector_store %arg21[%c5, %c0_49], %56 {strides = array<i32>} : memref<8x128xf32, #tpu.memory_space<vmem>>, vector<1x128xf32>,
    %58 = vector.extract_strided_slice %45 {offsets = [0, 1280], sizes = [1, 128], strides = [1, 1]} : vector<1x1664xf32> to vector<1x128xf32>
    %c6 = arith.constant 6 : index
    %c0_50 = arith.constant 0 : index
    %59 = vector.load %arg21[%c6, %c0_50] : memref<8x128xf32, #tpu.memory_space<vmem>>, vector<1x128xf32>
    tpu.vector_store %arg21[%c6, %c0_50], %58 {strides = array<i32>} : memref<8x128xf32, #tpu.memory_space<vmem>>, vector<1x128xf32>,
    %60 = vector.extract_strided_slice %45 {offsets = [0, 1408], sizes = [1, 128], strides = [1, 1]} : vector<1x1664xf32> to vector<1x128xf32>
    %c7 = arith.constant 7 : index
    %c0_51 = arith.constant 0 : index
    %61 = vector.load %arg21[%c7, %c0_51] : memref<8x128xf32, #tpu.memory_space<vmem>>, vector<1x128xf32>
    tpu.vector_store %arg21[%c7, %c0_51], %60 {strides = array<i32>} : memref<8x128xf32, #tpu.memory_space<vmem>>, vector<1x128xf32>,
    %c0_52 = arith.constant 0 : index
    %c0_53 = arith.constant 0 : index
    %62 = vector.load %arg21[%c0_52, %c0_53] : memref<8x128xf32, #tpu.memory_space<vmem>>, vector<8x128xf32>
    %63 = vector.extract_strided_slice %45 {offsets = [0, 0], sizes = [1, 128], strides = [1, 1]} : vector<1x1664xf32> to vector<1x128xf32>
    %64 = vector.broadcast %63 : vector<1x128xf32> to vector<8x128xf32>
    %65 = arith.mulf %6, %64 : vector<8x128xf32>
    %66 = vector.extract_strided_slice %45 {offsets = [0, 128], sizes = [1, 128], strides = [1, 1]} : vector<1x1664xf32> to vector<1x128xf32>
    %67 = vector.broadcast %66 : vector<1x128xf32> to vector<8x128xf32>
    %68 = arith.mulf %6, %67 : vector<8x128xf32>
    %69 = vector.extract_strided_slice %45 {offsets = [0, 256], sizes = [1, 128], strides = [1, 1]} : vector<1x1664xf32> to vector<1x128xf32>
    %70 = vector.broadcast %69 : vector<1x128xf32> to vector<8x128xf32>
    %71 = arith.mulf %6, %70 : vector<8x128xf32>
    %72 = vector.extract_strided_slice %45 {offsets = [0, 384], sizes = [1, 128], strides = [1, 1]} : vector<1x1664xf32> to vector<1x128xf32>
    %73 = vector.broadcast %72 : vector<1x128xf32> to vector<8x128xf32>
    %74 = arith.mulf %6, %73 : vector<8x128xf32>
    %75 = tpu.concatenate %65, %68, %71, %74 in 0 : vector<8x128xf32>, vector<8x128xf32>, vector<8x128xf32>, vector<8x128xf32> -> vector<32x128xf32>
    %76 = vector.extract_strided_slice %13 {offsets = [0, 0], sizes = [1, 128], strides = [1, 1]} : vector<4x128xf32> to vector<1x128xf32>
    %77 = vector.broadcast %76 : vector<1x128xf32> to vector<8x128xf32>
    %78 = arith.mulf %77, %62 : vector<8x128xf32>
    %79 = vector.extract_strided_slice %13 {offsets = [1, 0], sizes = [1, 128], strides = [1, 1]} : vector<4x128xf32> to vector<1x128xf32>
    %80 = vector.broadcast %79 : vector<1x128xf32> to vector<8x128xf32>
    %81 = arith.mulf %80, %62 : vector<8x128xf32>
    %82 = vector.extract_strided_slice %13 {offsets = [2, 0], sizes = [1, 128], strides = [1, 1]} : vector<4x128xf32> to vector<1x128xf32>
    %83 = vector.broadcast %82 : vector<1x128xf32> to vector<8x128xf32>
    %84 = arith.mulf %83, %62 : vector<8x128xf32>
    %85 = vector.extract_strided_slice %13 {offsets = [3, 0], sizes = [1, 128], strides = [1, 1]} : vector<4x128xf32> to vector<1x128xf32>
    %86 = vector.broadcast %85 : vector<1x128xf32> to vector<8x128xf32>
    %87 = arith.mulf %86, %62 : vector<8x128xf32>
    %88 = tpu.concatenate %78, %81, %84, %87 in 0 : vector<8x128xf32>, vector<8x128xf32>, vector<8x128xf32>, vector<8x128xf32> -> vector<32x128xf32>
    %89 = vector.extract_strided_slice %45 {offsets = [0, 1536], sizes = [1, 128], strides = [1, 1]} : vector<1x1664xf32> to vector<1x128xf32>
    %90 = vector.broadcast %89 : vector<1x128xf32> to vector<32x128xf32>
    %91 = arith.mulf %20, %90 : vector<32x128xf32>
    %92 = arith.truncf %75 : vector<32x128xf32> to vector<32x128xbf16>
    %c0_54 = arith.constant 0 : index
    %c0_55 = arith.constant 0 : index
    %93 = vector.load %arg16[%c0_54, %c0_55] : memref<128x128xbf16, #tpu.memory_space<vmem>>, vector<128x128xbf16>
    %cst_56 = arith.constant dense<0.000000e+00> : vector<32x128xf32>
    %94 = tpu.matmul %92, %93, %cst_56 {dimension_numbers = #tpu.dot_dimension_numbers<[1], [0], [0], [1], [0, 0, 1, 1], [], []>} : vector<32x128xbf16>, vector<128x128xbf16>, vector<32x128xf32> -> vector<32x128xf32>
    %95 = arith.truncf %88 : vector<32x128xf32> to vector<32x128xbf16>
    %c0_57 = arith.constant 0 : index
    %c0_58 = arith.constant 0 : index
    %96 = vector.load %arg17[%c0_57, %c0_58] : memref<128x128xbf16, #tpu.memory_space<vmem>>, vector<128x128xbf16>
    %cst_59 = arith.constant dense<0.000000e+00> : vector<32x128xf32>
    %97 = tpu.matmul %95, %96, %cst_59 {dimension_numbers = #tpu.dot_dimension_numbers<[1], [0], [0], [1], [0, 0, 1, 1], [], []>} : vector<32x128xbf16>, vector<128x128xbf16>, vector<32x128xf32> -> vector<32x128xf32>
    %98 = arith.addf %94, %97 : vector<32x128xf32>
    %99 = arith.truncf %91 : vector<32x128xf32> to vector<32x128xbf16>
    %c0_60 = arith.constant 0 : index
    %c0_61 = arith.constant 0 : index
    %100 = vector.load %arg18[%c0_60, %c0_61] : memref<128x128xbf16, #tpu.memory_space<vmem>>, vector<128x128xbf16>
    %cst_62 = arith.constant dense<0.000000e+00> : vector<32x128xf32>
    %101 = tpu.matmul %99, %100, %cst_62 {dimension_numbers = #tpu.dot_dimension_numbers<[1], [0], [0], [1], [0, 0, 1, 1], [], []>} : vector<32x128xbf16>, vector<128x128xbf16>, vector<32x128xf32> -> vector<32x128xf32>
    %102 = arith.addf %98, %101 : vector<32x128xf32>
    %c0_63 = arith.constant 0 : index
    %c0_64 = arith.constant 0 : index
    %103 = vector.load %arg19[%c0_63, %c0_64] : memref<1x128xf32, #tpu.memory_space<vmem>>, vector<1x128xf32>
    %104 = vector.broadcast %103 : vector<1x128xf32> to vector<32x128xf32>
    %105 = arith.addf %102, %104 : vector<32x128xf32>
    %cst_65 = arith.constant 0.000000e+00 : f32
    %106 = vector.broadcast %cst_65 : f32 to vector<32x128xf32>
    %107 = arith.maximumf %105, %106 : vector<32x128xf32>
    %c0_66 = arith.constant 0 : index
    %c0_67 = arith.constant 0 : index
    %c0_68 = arith.constant 0 : index
    %108 = vector.load %arg20[%c0_66, %c0_67, %c0_68] : memref<2x32x128xf32, #tpu.memory_space<vmem>>, vector<1x32x128xf32>
    %109 = vector.shape_cast %108 : vector<1x32x128xf32> to vector<32x128xf32>
    %110 = vector.shape_cast %107 : vector<32x128xf32> to vector<1x32x128xf32>
    tpu.vector_store %arg20[%c0_66, %c0_67, %c0_68], %110 {strides = array<i32>} : memref<2x32x128xf32, #tpu.memory_space<vmem>>, vector<1x32x128xf32>,
    %c1_69 = arith.constant 1 : index
    %c0_70 = arith.constant 0 : index
    %c0_71 = arith.constant 0 : index
    %111 = vector.load %arg1[%c1_69, %c0_70, %c0_71] : memref<2x8x512xbf16, #tpu.memory_space<vmem>>, vector<1x8x512xbf16>
    %112 = vector.shape_cast %111 : vector<1x8x512xbf16> to vector<8x512xbf16>
    %c0_72 = arith.constant 0 : index
    %c0_73 = arith.constant 0 : index
    %113 = vector.load %arg4[%c0_72, %c0_73] : memref<512x128xbf16, #tpu.memory_space<vmem>>, vector<512x128xbf16>
    %cst_74 = arith.constant dense<0.000000e+00> : vector<8x128xf32>
    %114 = tpu.matmul %112, %113, %cst_74 {dimension_numbers = #tpu.dot_dimension_numbers<[1], [0], [0], [1], [0, 0, 1, 1], [], []>} : vector<8x512xbf16>, vector<512x128xbf16>, vector<8x128xf32> -> vector<8x128xf32>
    %c0_75 = arith.constant 0 : index
    %c0_76 = arith.constant 0 : index
    %115 = vector.load %arg5[%c0_75, %c0_76] : memref<1x128xf32, #tpu.memory_space<vmem>>, vector<1x128xf32>
    %116 = vector.broadcast %115 : vector<1x128xf32> to vector<8x128xf32>
    %117 = arith.addf %114, %116 : vector<8x128xf32>
    %c1_77 = arith.constant 1 : index
    %c0_78 = arith.constant 0 : index
    %c0_79 = arith.constant 0 : index
    %118 = vector.load %arg2[%c1_77, %c0_78, %c0_79] : memref<2x4x1024xbf16, #tpu.memory_space<vmem>>, vector<1x4x1024xbf16>
    %119 = vector.shape_cast %118 : vector<1x4x1024xbf16> to vector<4x1024xbf16>
    %c0_80 = arith.constant 0 : index
    %c0_81 = arith.constant 0 : index
    %120 = vector.load %arg6[%c0_80, %c0_81] : memref<1024x128xbf16, #tpu.memory_space<vmem>>, vector<1024x128xbf16>
    %cst_82 = arith.constant dense<0.000000e+00> : vector<4x128xf32>
    %121 = tpu.matmul %119, %120, %cst_82 {dimension_numbers = #tpu.dot_dimension_numbers<[1], [0], [0], [1], [0, 0, 1, 1], [], []>} : vector<4x1024xbf16>, vector<1024x128xbf16>, vector<4x128xf32> -> vector<4x128xf32>
    %c0_83 = arith.constant 0 : index
    %c0_84 = arith.constant 0 : index
    %122 = vector.load %arg7[%c0_83, %c0_84] : memref<1x128xf32, #tpu.memory_space<vmem>>, vector<1x128xf32>
    %123 = vector.broadcast %122 : vector<1x128xf32> to vector<4x128xf32>
    %124 = arith.addf %121, %123 : vector<4x128xf32>
    %c1_85 = arith.constant 1 : index
    %c0_86 = arith.constant 0 : index
    %c0_87 = arith.constant 0 : index
    %125 = vector.load %arg3[%c1_85, %c0_86, %c0_87] : memref<2x32x128xbf16, #tpu.memory_space<vmem>>, vector<1x32x128xbf16>
    %126 = vector.shape_cast %125 : vector<1x32x128xbf16> to vector<32x128xbf16>
    %c0_88 = arith.constant 0 : index
    %c0_89 = arith.constant 0 : index
    %127 = vector.load %arg8[%c0_88, %c0_89] : memref<128x128xbf16, #tpu.memory_space<vmem>>, vector<128x128xbf16>
    %cst_90 = arith.constant dense<0.000000e+00> : vector<32x128xf32>
    %128 = tpu.matmul %126, %127, %cst_90 {dimension_numbers = #tpu.dot_dimension_numbers<[1], [0], [0], [1], [0, 0, 1, 1], [], []>} : vector<32x128xbf16>, vector<128x128xbf16>, vector<32x128xf32> -> vector<32x128xf32>
    %c0_91 = arith.constant 0 : index
    %c0_92 = arith.constant 0 : index
    %129 = vector.load %arg9[%c0_91, %c0_92] : memref<1x128xf32, #tpu.memory_space<vmem>>, vector<1x128xf32>
    %130 = vector.broadcast %129 : vector<1x128xf32> to vector<32x128xf32>
    %131 = arith.addf %128, %130 : vector<32x128xf32>
    %c1_93 = arith.constant 1 : index
    %c0_94 = arith.constant 0 : index
    %c0_95 = arith.constant 0 : index
    %132 = vector.load %arg3[%c1_93, %c0_94, %c0_95] : memref<2x32x128xbf16, #tpu.memory_space<vmem>>, vector<1x32x128xbf16>
    %133 = vector.shape_cast %132 : vector<1x32x128xbf16> to vector<32x128xbf16>
    %134 = arith.extf %133 : vector<32x128xbf16> to vector<32x128xf32>
    %cst_96 = arith.constant dense<0.000000e+00> : vector<128xf32>
    %135 = vector.multi_reduction <add>, %134, %cst_96 [0] : vector<32x128xf32> to vector<128xf32>
    %136 = vector.shape_cast %135 : vector<128xf32> to vector<1x128xf32>
    %c0_97 = arith.constant 0 : index
    %c0_98 = arith.constant 0 : index
    %137 = vector.load %arg10[%c0_97, %c0_98] : memref<128x32xf32, #tpu.memory_space<vmem>>, vector<128x32xf32>
    %cst_99 = arith.constant dense<0.000000e+00> : vector<1x32xf32>
    %138 = tpu.matmul %136, %137, %cst_99 {dimension_numbers = #tpu.dot_dimension_numbers<[1], [0], [0], [1], [0, 0, 1, 1], [], []>} : vector<1x128xf32>, vector<128x32xf32>, vector<1x32xf32> -> vector<1x32xf32>
    %c0_100 = arith.constant 0 : index
    %c0_101 = arith.constant 0 : index
    %139 = vector.load %arg11[%c0_100, %c0_101] : memref<1x32xf32, #tpu.memory_space<vmem>>, vector<1x32xf32>
    %140 = arith.addf %138, %139 : vector<1x32xf32>
    %cst_102 = arith.constant 0.000000e+00 : f32
    %141 = vector.broadcast %cst_102 : f32 to vector<1x32xf32>
    %142 = arith.maximumf %140, %141 : vector<1x32xf32>
    %c0_103 = arith.constant 0 : index
    %c0_104 = arith.constant 0 : index
    %143 = vector.load %arg12[%c0_103, %c0_104] : memref<32x16xf32, #tpu.memory_space<vmem>>, vector<32x16xf32>
    %cst_105 = arith.constant dense<0.000000e+00> : vector<1x16xf32>
    %144 = tpu.matmul %142, %143, %cst_105 {dimension_numbers = #tpu.dot_dimension_numbers<[1], [0], [0], [1], [0, 0, 1, 1], [], []>} : vector<1x32xf32>, vector<32x16xf32>, vector<1x16xf32> -> vector<1x16xf32>
    %c0_106 = arith.constant 0 : index
    %c0_107 = arith.constant 0 : index
    %145 = vector.load %arg13[%c0_106, %c0_107] : memref<1x16xf32, #tpu.memory_space<vmem>>, vector<1x16xf32>
    %146 = arith.addf %144, %145 : vector<1x16xf32>
    %147 = arith.truncf %146 : vector<1x16xf32> to vector<1x16xbf16>
    %c0_108 = arith.constant 0 : index
    %c0_109 = arith.constant 0 : index
    %148 = vector.load %arg14[%c0_108, %c0_109] : memref<16x1664xbf16, #tpu.memory_space<vmem>>, vector<16x1664xbf16>
    %cst_110 = arith.constant dense<0.000000e+00> : vector<1x1664xf32>
    %149 = tpu.matmul %147, %148, %cst_110 {dimension_numbers = #tpu.dot_dimension_numbers<[1], [0], [0], [1], [0, 0, 1, 1], [], []>} : vector<1x16xbf16>, vector<16x1664xbf16>, vector<1x1664xf32> -> vector<1x1664xf32>
    %c0_111 = arith.constant 0 : index
    %c0_112 = arith.constant 0 : index
    %150 = vector.load %arg15[%c0_111, %c0_112] : memref<1x1664xf32, #tpu.memory_space<vmem>>, vector<1x1664xf32>
    %151 = arith.addf %149, %150 : vector<1x1664xf32>
    %152 = arith.negf %151 : vector<1x1664xf32>
    %153 = math.exp %152 : vector<1x1664xf32>
    %cst_113 = arith.constant 1.000000e+00 : f32
    %154 = vector.broadcast %cst_113 : f32 to vector<1x1664xf32>
    %155 = arith.addf %154, %153 : vector<1x1664xf32>
    %156 = arith.divf %154, %155 : vector<1x1664xf32>
    %157 = vector.extract_strided_slice %156 {offsets = [0, 512], sizes = [1, 128], strides = [1, 1]} : vector<1x1664xf32> to vector<1x128xf32>
    %c0_114 = arith.constant 0 : index
    %c0_115 = arith.constant 0 : index
    %158 = vector.load %arg21[%c0_114, %c0_115] : memref<8x128xf32, #tpu.memory_space<vmem>>, vector<1x128xf32>
    tpu.vector_store %arg21[%c0_114, %c0_115], %157 {strides = array<i32>} : memref<8x128xf32, #tpu.memory_space<vmem>>, vector<1x128xf32>,
    %159 = vector.extract_strided_slice %156 {offsets = [0, 640], sizes = [1, 128], strides = [1, 1]} : vector<1x1664xf32> to vector<1x128xf32>
    %c1_116 = arith.constant 1 : index
    %c0_117 = arith.constant 0 : index
    %160 = vector.load %arg21[%c1_116, %c0_117] : memref<8x128xf32, #tpu.memory_space<vmem>>, vector<1x128xf32>
    tpu.vector_store %arg21[%c1_116, %c0_117], %159 {strides = array<i32>} : memref<8x128xf32, #tpu.memory_space<vmem>>, vector<1x128xf32>,
    %161 = vector.extract_strided_slice %156 {offsets = [0, 768], sizes = [1, 128], strides = [1, 1]} : vector<1x1664xf32> to vector<1x128xf32>
    %c2_118 = arith.constant 2 : index
    %c0_119 = arith.constant 0 : index
    %162 = vector.load %arg21[%c2_118, %c0_119] : memref<8x128xf32, #tpu.memory_space<vmem>>, vector<1x128xf32>
    tpu.vector_store %arg21[%c2_118, %c0_119], %161 {strides = array<i32>} : memref<8x128xf32, #tpu.memory_space<vmem>>, vector<1x128xf32>,
    %163 = vector.extract_strided_slice %156 {offsets = [0, 896], sizes = [1, 128], strides = [1, 1]} : vector<1x1664xf32> to vector<1x128xf32>
    %c3_120 = arith.constant 3 : index
    %c0_121 = arith.constant 0 : index
    %164 = vector.load %arg21[%c3_120, %c0_121] : memref<8x128xf32, #tpu.memory_space<vmem>>, vector<1x128xf32>
    tpu.vector_store %arg21[%c3_120, %c0_121], %163 {strides = array<i32>} : memref<8x128xf32, #tpu.memory_space<vmem>>, vector<1x128xf32>,
    %165 = vector.extract_strided_slice %156 {offsets = [0, 1024], sizes = [1, 128], strides = [1, 1]} : vector<1x1664xf32> to vector<1x128xf32>
    %c4_122 = arith.constant 4 : index
    %c0_123 = arith.constant 0 : index
    %166 = vector.load %arg21[%c4_122, %c0_123] : memref<8x128xf32, #tpu.memory_space<vmem>>, vector<1x128xf32>
    tpu.vector_store %arg21[%c4_122, %c0_123], %165 {strides = array<i32>} : memref<8x128xf32, #tpu.memory_space<vmem>>, vector<1x128xf32>,
    %167 = vector.extract_strided_slice %156 {offsets = [0, 1152], sizes = [1, 128], strides = [1, 1]} : vector<1x1664xf32> to vector<1x128xf32>
    %c5_124 = arith.constant 5 : index
    %c0_125 = arith.constant 0 : index
    %168 = vector.load %arg21[%c5_124, %c0_125] : memref<8x128xf32, #tpu.memory_space<vmem>>, vector<1x128xf32>
    tpu.vector_store %arg21[%c5_124, %c0_125], %167 {strides = array<i32>} : memref<8x128xf32, #tpu.memory_space<vmem>>, vector<1x128xf32>,
    %169 = vector.extract_strided_slice %156 {offsets = [0, 1280], sizes = [1, 128], strides = [1, 1]} : vector<1x1664xf32> to vector<1x128xf32>
    %c6_126 = arith.constant 6 : index
    %c0_127 = arith.constant 0 : index
    %170 = vector.load %arg21[%c6_126, %c0_127] : memref<8x128xf32, #tpu.memory_space<vmem>>, vector<1x128xf32>
    tpu.vector_store %arg21[%c6_126, %c0_127], %169 {strides = array<i32>} : memref<8x128xf32, #tpu.memory_space<vmem>>, vector<1x128xf32>,
    %171 = vector.extract_strided_slice %156 {offsets = [0, 1408], sizes = [1, 128], strides = [1, 1]} : vector<1x1664xf32> to vector<1x128xf32>
    %c7_128 = arith.constant 7 : index
    %c0_129 = arith.constant 0 : index
    %172 = vector.load %arg21[%c7_128, %c0_129] : memref<8x128xf32, #tpu.memory_space<vmem>>, vector<1x128xf32>
    tpu.vector_store %arg21[%c7_128, %c0_129], %171 {strides = array<i32>} : memref<8x128xf32, #tpu.memory_space<vmem>>, vector<1x128xf32>,
    %c0_130 = arith.constant 0 : index
    %c0_131 = arith.constant 0 : index
    %173 = vector.load %arg21[%c0_130, %c0_131] : memref<8x128xf32, #tpu.memory_space<vmem>>, vector<8x128xf32>
    %174 = vector.extract_strided_slice %156 {offsets = [0, 0], sizes = [1, 128], strides = [1, 1]} : vector<1x1664xf32> to vector<1x128xf32>
    %175 = vector.broadcast %174 : vector<1x128xf32> to vector<8x128xf32>
    %176 = arith.mulf %117, %175 : vector<8x128xf32>
    %177 = vector.extract_strided_slice %156 {offsets = [0, 128], sizes = [1, 128], strides = [1, 1]} : vector<1x1664xf32> to vector<1x128xf32>
    %178 = vector.broadcast %177 : vector<1x128xf32> to vector<8x128xf32>
    %179 = arith.mulf %117, %178 : vector<8x128xf32>
    %180 = vector.extract_strided_slice %156 {offsets = [0, 256], sizes = [1, 128], strides = [1, 1]} : vector<1x1664xf32> to vector<1x128xf32>
    %181 = vector.broadcast %180 : vector<1x128xf32> to vector<8x128xf32>
    %182 = arith.mulf %117, %181 : vector<8x128xf32>
    %183 = vector.extract_strided_slice %156 {offsets = [0, 384], sizes = [1, 128], strides = [1, 1]} : vector<1x1664xf32> to vector<1x128xf32>
    %184 = vector.broadcast %183 : vector<1x128xf32> to vector<8x128xf32>
    %185 = arith.mulf %117, %184 : vector<8x128xf32>
    %186 = tpu.concatenate %176, %179, %182, %185 in 0 : vector<8x128xf32>, vector<8x128xf32>, vector<8x128xf32>, vector<8x128xf32> -> vector<32x128xf32>
    %187 = vector.extract_strided_slice %124 {offsets = [0, 0], sizes = [1, 128], strides = [1, 1]} : vector<4x128xf32> to vector<1x128xf32>
    %188 = vector.broadcast %187 : vector<1x128xf32> to vector<8x128xf32>
    %189 = arith.mulf %188, %173 : vector<8x128xf32>
    %190 = vector.extract_strided_slice %124 {offsets = [1, 0], sizes = [1, 128], strides = [1, 1]} : vector<4x128xf32> to vector<1x128xf32>
    %191 = vector.broadcast %190 : vector<1x128xf32> to vector<8x128xf32>
    %192 = arith.mulf %191, %173 : vector<8x128xf32>
    %193 = vector.extract_strided_slice %124 {offsets = [2, 0], sizes = [1, 128], strides = [1, 1]} : vector<4x128xf32> to vector<1x128xf32>
    %194 = vector.broadcast %193 : vector<1x128xf32> to vector<8x128xf32>
    %195 = arith.mulf %194, %173 : vector<8x128xf32>
    %196 = vector.extract_strided_slice %124 {offsets = [3, 0], sizes = [1, 128], strides = [1, 1]} : vector<4x128xf32> to vector<1x128xf32>
    %197 = vector.broadcast %196 : vector<1x128xf32> to vector<8x128xf32>
    %198 = arith.mulf %197, %173 : vector<8x128xf32>
    %199 = tpu.concatenate %189, %192, %195, %198 in 0 : vector<8x128xf32>, vector<8x128xf32>, vector<8x128xf32>, vector<8x128xf32> -> vector<32x128xf32>
    %200 = vector.extract_strided_slice %156 {offsets = [0, 1536], sizes = [1, 128], strides = [1, 1]} : vector<1x1664xf32> to vector<1x128xf32>
    %201 = vector.broadcast %200 : vector<1x128xf32> to vector<32x128xf32>
    %202 = arith.mulf %131, %201 : vector<32x128xf32>
    %203 = arith.truncf %186 : vector<32x128xf32> to vector<32x128xbf16>
    %c0_132 = arith.constant 0 : index
    %c0_133 = arith.constant 0 : index
    %204 = vector.load %arg16[%c0_132, %c0_133] : memref<128x128xbf16, #tpu.memory_space<vmem>>, vector<128x128xbf16>
    %cst_134 = arith.constant dense<0.000000e+00> : vector<32x128xf32>
    %205 = tpu.matmul %203, %204, %cst_134 {dimension_numbers = #tpu.dot_dimension_numbers<[1], [0], [0], [1], [0, 0, 1, 1], [], []>} : vector<32x128xbf16>, vector<128x128xbf16>, vector<32x128xf32> -> vector<32x128xf32>
    %206 = arith.truncf %199 : vector<32x128xf32> to vector<32x128xbf16>
    %c0_135 = arith.constant 0 : index
    %c0_136 = arith.constant 0 : index
    %207 = vector.load %arg17[%c0_135, %c0_136] : memref<128x128xbf16, #tpu.memory_space<vmem>>, vector<128x128xbf16>
    %cst_137 = arith.constant dense<0.000000e+00> : vector<32x128xf32>
    %208 = tpu.matmul %206, %207, %cst_137 {dimension_numbers = #tpu.dot_dimension_numbers<[1], [0], [0], [1], [0, 0, 1, 1], [], []>} : vector<32x128xbf16>, vector<128x128xbf16>, vector<32x128xf32> -> vector<32x128xf32>
    %209 = arith.addf %205, %208 : vector<32x128xf32>
    %210 = arith.truncf %202 : vector<32x128xf32> to vector<32x128xbf16>
    %c0_138 = arith.constant 0 : index
    %c0_139 = arith.constant 0 : index
    %211 = vector.load %arg18[%c0_138, %c0_139] : memref<128x128xbf16, #tpu.memory_space<vmem>>, vector<128x128xbf16>
    %cst_140 = arith.constant dense<0.000000e+00> : vector<32x128xf32>
    %212 = tpu.matmul %210, %211, %cst_140 {dimension_numbers = #tpu.dot_dimension_numbers<[1], [0], [0], [1], [0, 0, 1, 1], [], []>} : vector<32x128xbf16>, vector<128x128xbf16>, vector<32x128xf32> -> vector<32x128xf32>
    %213 = arith.addf %209, %212 : vector<32x128xf32>
    %c0_141 = arith.constant 0 : index
    %c0_142 = arith.constant 0 : index
    %214 = vector.load %arg19[%c0_141, %c0_142] : memref<1x128xf32, #tpu.memory_space<vmem>>, vector<1x128xf32>
    %215 = vector.broadcast %214 : vector<1x128xf32> to vector<32x128xf32>
    %216 = arith.addf %213, %215 : vector<32x128xf32>
    %cst_143 = arith.constant 0.000000e+00 : f32
    %217 = vector.broadcast %cst_143 : f32 to vector<32x128xf32>
    %218 = arith.maximumf %216, %217 : vector<32x128xf32>
    %c1_144 = arith.constant 1 : index
    %c0_145 = arith.constant 0 : index
    %c0_146 = arith.constant 0 : index
    %219 = vector.load %arg20[%c1_144, %c0_145, %c0_146] : memref<2x32x128xf32, #tpu.memory_space<vmem>>, vector<1x32x128xf32>
    %220 = vector.shape_cast %219 : vector<1x32x128xf32> to vector<32x128xf32>
    %221 = vector.shape_cast %218 : vector<32x128xf32> to vector<1x32x128xf32>
    tpu.vector_store %arg20[%c1_144, %c0_145, %c0_146], %221 {strides = array<i32>} : memref<2x32x128xf32, #tpu.memory_space<vmem>>, vector<1x32x128xf32>,
    return
  }
  func.func @transform_0(%arg0: i32) -> (i32, i32, i32) {
    %c0_i32 = arith.constant 0 : i32
    %c0_i32_0 = arith.constant 0 : i32
    %c0_i32_1 = arith.constant 0 : i32
    return %arg0, %c0_i32, %c0_i32_0 : i32, i32, i32
  }
  func.func @transform_1(%arg0: i32) -> (i32, i32, i32) {
    %c0_i32 = arith.constant 0 : i32
    %c0_i32_0 = arith.constant 0 : i32
    %c0_i32_1 = arith.constant 0 : i32
    return %arg0, %c0_i32, %c0_i32_0 : i32, i32, i32
  }
  func.func @transform_2(%arg0: i32) -> (i32, i32, i32) {
    %c0_i32 = arith.constant 0 : i32
    %c0_i32_0 = arith.constant 0 : i32
    %c0_i32_1 = arith.constant 0 : i32
    return %arg0, %c0_i32, %c0_i32_0 : i32, i32, i32
  }
  func.func @transform_3(%arg0: i32) -> (i32, i32) {
    %c0_i32 = arith.constant 0 : i32
    %c0_i32_0 = arith.constant 0 : i32
    %c0_i32_1 = arith.constant 0 : i32
    return %c0_i32, %c0_i32_0 : i32, i32
  }
  func.func @transform_4(%arg0: i32) -> (i32, i32) {
    %c0_i32 = arith.constant 0 : i32
    %c0_i32_0 = arith.constant 0 : i32
    %c0_i32_1 = arith.constant 0 : i32
    return %c0_i32, %c0_i32_0 : i32, i32
  }
  func.func @transform_5(%arg0: i32) -> (i32, i32) {
    %c0_i32 = arith.constant 0 : i32
    %c0_i32_0 = arith.constant 0 : i32
    %c0_i32_1 = arith.constant 0 : i32
    return %c0_i32, %c0_i32_0 : i32, i32
  }
  func.func @transform_6(%arg0: i32) -> (i32, i32) {
    %c0_i32 = arith.constant 0 : i32
    %c0_i32_0 = arith.constant 0 : i32
    %c0_i32_1 = arith.constant 0 : i32
    return %c0_i32, %c0_i32_0 : i32, i32
  }
  func.func @transform_7(%arg0: i32) -> (i32, i32) {
    %c0_i32 = arith.constant 0 : i32
    %c0_i32_0 = arith.constant 0 : i32
    %c0_i32_1 = arith.constant 0 : i32
    return %c0_i32, %c0_i32_0 : i32, i32
  }
  func.func @transform_8(%arg0: i32) -> (i32, i32) {
    %c0_i32 = arith.constant 0 : i32
    %c0_i32_0 = arith.constant 0 : i32
    %c0_i32_1 = arith.constant 0 : i32
    return %c0_i32, %c0_i32_0 : i32, i32
  }
  func.func @transform_9(%arg0: i32) -> (i32, i32) {
    %c0_i32 = arith.constant 0 : i32
    %c0_i32_0 = arith.constant 0 : i32
    %c0_i32_1 = arith.constant 0 : i32
    return %c0_i32, %c0_i32_0 : i32, i32
  }
  func.func @transform_10(%arg0: i32) -> (i32, i32) {
    %c0_i32 = arith.constant 0 : i32
    %c0_i32_0 = arith.constant 0 : i32
    %c0_i32_1 = arith.constant 0 : i32
    return %c0_i32, %c0_i32_0 : i32, i32
  }
  func.func @transform_11(%arg0: i32) -> (i32, i32) {
    %c0_i32 = arith.constant 0 : i32
    %c0_i32_0 = arith.constant 0 : i32
    %c0_i32_1 = arith.constant 0 : i32
    return %c0_i32, %c0_i32_0 : i32, i32
  }
  func.func @transform_12(%arg0: i32) -> (i32, i32) {
    %c0_i32 = arith.constant 0 : i32
    %c0_i32_0 = arith.constant 0 : i32
    %c0_i32_1 = arith.constant 0 : i32
    return %c0_i32, %c0_i32_0 : i32, i32
  }
  func.func @transform_13(%arg0: i32) -> (i32, i32) {
    %c0_i32 = arith.constant 0 : i32
    %c0_i32_0 = arith.constant 0 : i32
    %c0_i32_1 = arith.constant 0 : i32
    return %c0_i32, %c0_i32_0 : i32, i32
  }
  func.func @transform_14(%arg0: i32) -> (i32, i32) {
    %c0_i32 = arith.constant 0 : i32
    %c0_i32_0 = arith.constant 0 : i32
    %c0_i32_1 = arith.constant 0 : i32
    return %c0_i32, %c0_i32_0 : i32, i32
  }
  func.func @transform_15(%arg0: i32) -> (i32, i32) {
    %c0_i32 = arith.constant 0 : i32
    %c0_i32_0 = arith.constant 0 : i32
    %c0_i32_1 = arith.constant 0 : i32
    return %c0_i32, %c0_i32_0 : i32, i32
  }
  func.func @transform_16(%arg0: i32) -> (i32, i32) {
    %c0_i32 = arith.constant 0 : i32
    %c0_i32_0 = arith.constant 0 : i32
    %c0_i32_1 = arith.constant 0 : i32
    return %c0_i32, %c0_i32_0 : i32, i32
  }
  func.func @transform_17(%arg0: i32) -> (i32, i32) {
    %c0_i32 = arith.constant 0 : i32
    %c0_i32_0 = arith.constant 0 : i32
    %c0_i32_1 = arith.constant 0 : i32
    return %c0_i32, %c0_i32_0 : i32, i32
  }
  func.func @transform_18(%arg0: i32) -> (i32, i32) {
    %c0_i32 = arith.constant 0 : i32
    %c0_i32_0 = arith.constant 0 : i32
    %c0_i32_1 = arith.constant 0 : i32
    return %c0_i32, %c0_i32_0 : i32, i32
  }
  func.func @transform_19(%arg0: i32) -> (i32, i32, i32) {
    %c0_i32 = arith.constant 0 : i32
    %c0_i32_0 = arith.constant 0 : i32
    %c0_i32_1 = arith.constant 0 : i32
    return %arg0, %c0_i32, %c0_i32_0 : i32, i32, i32
  }
}

</mosaic_0001>

<bundles_post_ra>
// kernel: custom_tri_res_forward.1
= control target key start
LH: loop header
LB: loop body
LE: loop exit
PB: predicated region body
PF: predicated region fallthrough
CT: control target
= control target key end

     0   :  { %vm1193_vm0 = vcmask 261120   ;;  %vm7717_vm1 = vcmask 130048   ;;  %s7693_s3 = inlined_call_operand.vmem [shape: bf16[512,128], index: 3, kind: input, shape index: {}]   ;;  %s7694_s0 = inlined_call_operand.vmem [shape: bf16[2,8,512], index: 0, kind: input, shape index: {}]   ;;  %s7695_s5 = inlined_call_operand.vmem [shape: bf16[1024,128], index: 5, kind: input, shape index: {}]   ;;  %s7696_s4 = inlined_call_operand.vmem [shape: f32[1,128], index: 4, kind: input, shape index: {}]   ;;  %s7697_s1 = inlined_call_operand.vmem [shape: bf16[2,4,1024], index: 1, kind: input, shape index: {}]   ;;  %s7698_s6 = inlined_call_operand.vmem [shape: f32[1,128], index: 6, kind: input, shape index: {}]   ;;  %s7699_s2 = inlined_call_operand.vmem [shape: bf16[2,32,128], index: 2, kind: input, shape index: {}]   ;;  %s7700_s9 = inlined_call_operand.vmem [shape: f32[128,32], index: 9, kind: input, shape index: {}]   ;;  %s7701_s11 = inlined_call_operand.vmem [shape: f32[32,16], index: 11, kind: input, shape index: {}]   ;;  %s7702_s7 = inlined_call_operand.vmem [shape: bf16[128,128], index: 7, kind: input, shape index: {}]   ;;  %s7703_s13 = inlined_call_operand.vmem [shape: bf16[16,1664], index: 13, kind: input, shape index: {}]   ;;  %s7704_s10 = inlined_call_operand.vmem [shape: f32[1,32], index: 10, kind: input, shape index: {}]   ;;  %s7705_s8 = inlined_call_operand.vmem [shape: f32[1,128], index: 8, kind: input, shape index: {}]   ;;  %s7706_s12 = inlined_call_operand.vmem [shape: f32[1,16], index: 12, kind: input, shape index: {}]   ;;  %s7707_s15 = inlined_call_operand.vmem [shape: bf16[128,128], index: 15, kind: input, shape index: {}]   ;;  %s7708_s14 = inlined_call_operand.vmem [shape: f32[1,1664], index: 14, kind: input, shape index: {}]   ;;  %s7709_s17 = inlined_call_operand.vmem [shape: bf16[128,128], index: 17, kind: input, shape index: {}]   ;;  %s7710_s16 = inlined_call_operand.vmem [shape: bf16[128,128], index: 16, kind: input, shape index: {}]   ;;  %s7711_s18 = inlined_call_operand.vmem [shape: f32[1,128], index: 18, kind: input, shape index: {}]   ;;  %s7712_s19 = inlined_call_operand.vmem [shape: f32[2,32,128], index: 19, kind: output, shape index: {}]  }
   0x1   :  { %7718 = sst [smem:[#allocation3_spill]] %s7693_s3  ;;  %v391_v52 = vld [vmem:[%s7697_s1] sm:$0xff] }
   0x2   :  { %7719 = sst [smem:[#allocation4_spill]] %s7694_s0  ;;  %526 = vst [vmem:[#allocation1] ss:$4 sm:$0xff] %v391_v52 }
   0x3   :  { %7720 = sst [smem:[#allocation5_spill]] %s7695_s5 }
   0x4   :  { %7721 = sst [smem:[#allocation6_spill]] %s7696_s4 }
   0x5   :  { %s7722_s20 = sld [smem:[#allocation3_spill]] }
   0x6   :  { %s7723_s21 = sld [smem:[#allocation4_spill]] }
   0x7   :  { %s7724_s27 = sld [smem:[#allocation5_spill]] }
   0x8   :  { %s7725_s30 = sld [smem:[#allocation6_spill]] }
   0x9   :  { %v532_v63 = vld.sshfl [vmem:[#allocation1 + $0x10] sm:$0xff pattern:$0x73625140] }
   0xb   :  { %v5274_v0 = vld [vmem:[%s7722_s20 + $0x78] sm:$0xff]  ;;  %v5273_v4 = vld [vmem:[%s7722_s20 + $0x70] sm:$0xff]  ;;  %v5272_v8 = vld [vmem:[%s7722_s20 + $0x68] sm:$0xff] }
   0xc   :  { %v5282_v1 = vld [vmem:[%s7722_s20 + $0xb8] sm:$0xff]  ;;  %352 = vmatpush.bf16.msra.mxu1 %v5274_v0  ;;  %v5281_v5 = vld [vmem:[%s7722_s20 + $0xb0] sm:$0xff]  ;;  %v5280_v9 = vld [vmem:[%s7722_s20 + $0xa8] sm:$0xff] }
   0xd   :  { %v5266_v2 = vld [vmem:[%s7722_s20 + $0x38] sm:$0xff]  ;;  %365 = vmatpush.bf16.msra.mxu2 %v5282_v1  ;;  %v5265_v6 = vld [vmem:[%s7722_s20 + $0x30] sm:$0xff]  ;;  %v5264_v10 = vld [vmem:[%s7722_s20 + $0x28] sm:$0xff] }
   0xe   :  { %v5290_v3 = vld [vmem:[%s7722_s20 + $0xf8] sm:$0xff]  ;;  %339 = vmatpush.bf16.msra.mxu0 %v5266_v2  ;;  %v5289_v7 = vld [vmem:[%s7722_s20 + $0xf0] sm:$0xff]  ;;  %v5288_v11 = vld [vmem:[%s7722_s20 + $0xe8] sm:$0xff] }
   0xf   :  { %378 = vmatpush.bf16.msra.mxu3 %v5290_v3  ;;  %v5271_v12 = vld [vmem:[%s7722_s20 + $0x60] sm:$0xff]  ;;  %v5270_v16 = vld [vmem:[%s7722_s20 + $0x58] sm:$0xff]  ;;  %v5269_v20 = vld [vmem:[%s7722_s20 + $0x50] sm:$0xff] }
  0x10   :  { %353 = vmatpush.bf16.msra.mxu1 %v5273_v4  ;;  %v5279_v13 = vld [vmem:[%s7722_s20 + $0xa0] sm:$0xff]  ;;  %v5278_v17 = vld [vmem:[%s7722_s20 + $0x98] sm:$0xff]  ;;  %v5277_v21 = vld [vmem:[%s7722_s20 + $0x90] sm:$0xff] }
  0x11   :  { %366 = vmatpush.bf16.msra.mxu2 %v5281_v5  ;;  %v5263_v14 = vld [vmem:[%s7722_s20 + $0x20] sm:$0xff]  ;;  %v5262_v18 = vld [vmem:[%s7722_s20 + $0x18] sm:$0xff]  ;;  %v5261_v22 = vld [vmem:[%s7722_s20 + $0x10] sm:$0xff] }
  0x12   :  { %340 = vmatpush.bf16.msra.mxu0 %v5265_v6  ;;  %v5287_v15 = vld [vmem:[%s7722_s20 + $0xe0] sm:$0xff]  ;;  %v5286_v19 = vld [vmem:[%s7722_s20 + $0xd8] sm:$0xff]  ;;  %v5285_v23 = vld [vmem:[%s7722_s20 + $0xd0] sm:$0xff] }
  0x13   :  { %379 = vmatpush.bf16.msra.mxu3 %v5289_v7  ;;  %v5268_v24 = vld [vmem:[%s7722_s20 + $0x48] sm:$0xff]  ;;  %v63_v28 = vld [vmem:[%s7723_s21] sm:$0xff]  ;;  %v5306_v34 = vld [vmem:[%s7724_s27 + $0x78] sm:$0xff] }
  0x14   :  { %354 = vmatpush.bf16.msra.mxu1 %v5272_v8  ;;  %v5276_v25 = vld [vmem:[%s7722_s20 + $0x88] sm:$0xff]  ;;  %v5267_v30 = vld [vmem:[%s7722_s20 + $0x40] sm:$0xff]  ;;  %v136_v32 = vunpack.c.h.b16 %v63_v28  ;;  %v5314_v35 = vld [vmem:[%s7724_s27 + $0xb8] sm:$0xff]  ;;  %v135_v38 = vunpack.c.l.b16 %v63_v28 }
  0x15   :  { %367 = vmatpush.bf16.msra.mxu2 %v5280_v9  ;;  %v5260_v26 = vld [vmem:[%s7722_s20 + $0x8] sm:$0xff]  ;;  %v5275_v31 = vld [vmem:[%s7722_s20 + $0x80] sm:$0xff]  ;;  %v5298_v40 = vld [vmem:[%s7724_s27 + $0x38] sm:$0xff] }
  0x16   :  { %341 = vmatpush.bf16.msra.mxu0 %v5264_v10  ;;  %v5284_v27 = vld [vmem:[%s7722_s20 + $0xc8] sm:$0xff]  ;;  %v5259_v36 = vld [vmem:[%s7722_s20] sm:$0xff]  ;;  %v5322_v41 = vld [vmem:[%s7724_s27 + $0xf8] sm:$0xff]  ;;  %v140_v42 = vpack.c.b16 %v136_v32, %v136_v32  ;;  %v139_v46 = vpack.c.b16 %v135_v38, %v135_v38 }
  0x17   :  { %380 = vmatpush.bf16.msra.mxu3 %v5288_v11  ;;  %v64_v29 = vld [vmem:[%s7723_s21 + $0x8] sm:$0xff]  ;;  %v5283_v37 = vld [vmem:[%s7722_s20 + $0xc0] sm:$0xff]  ;;  %v5305_v44 = vld [vmem:[%s7724_s27 + $0x70] sm:$0xff] }
  0x18   :  { %355 = vmatpush.bf16.msra.mxu1 %v5271_v12  ;;  %v137_v33 = vunpack.c.l.b16 %v64_v29  ;;  %v138_v39 = vunpack.c.h.b16 %v64_v29  ;;  %v5313_v45 = vld [vmem:[%s7724_s27 + $0xb0] sm:$0xff]  ;;  %v5304_v50 = vld [vmem:[%s7724_s27 + $0x68] sm:$0xff]  ;;  %v5303_v55 = vld [vmem:[%s7724_s27 + $0x60] sm:$0xff] }
  0x19   :  { %368 = vmatpush.bf16.msra.mxu2 %v5279_v13  ;;  %v5297_v48 = vld [vmem:[%s7724_s27 + $0x30] sm:$0xff]  ;;  %v5312_v51 = vld [vmem:[%s7724_s27 + $0xa8] sm:$0xff]  ;;  %v5311_v56 = vld [vmem:[%s7724_s27 + $0xa0] sm:$0xff] }
  0x1a   :  { %342 = vmatpush.bf16.msra.mxu0 %v5263_v14  ;;  %v141_v43 = vpack.c.b16 %v137_v33, %v137_v33  ;;  %v142_v47 = vpack.c.b16 %v138_v39, %v138_v39  ;;  %v5321_v49 = vld [vmem:[%s7724_s27 + $0xf0] sm:$0xff]  ;;  %v5296_v53 = vld [vmem:[%s7724_s27 + $0x28] sm:$0xff]  ;;  %v5295_v57 = vld [vmem:[%s7724_s27 + $0x20] sm:$0xff] }
  0x1b   :  { %381 = vmatpush.bf16.msra.mxu3 %v5287_v15  ;;  %v5320_v54 = vld [vmem:[%s7724_s27 + $0xe8] sm:$0xff]  ;;  %v5319_v58 = vld [vmem:[%s7724_s27 + $0xe0] sm:$0xff]  ;;  %v5302_v59 = vld [vmem:[%s7724_s27 + $0x58] sm:$0xff] }
  0x1c   :  { %356 = vmatpush.bf16.msra.mxu1 %v5270_v16  ;;  %v5310_v60 = vld [vmem:[%s7724_s27 + $0x98] sm:$0xff]  ;;  %v530_v0 = vld.sshfl [vmem:[#allocation1] sm:$0xff pattern:$0x73625140]  ;;  %v4778_v3 = vld [vmem:[%s7697_s1 + $0x10] sm:$0xff] }
  0x1d   :  { %369 = vmatpush.bf16.msra.mxu2 %v5278_v17  ;;  %v5294_v61 = vld [vmem:[%s7724_s27 + $0x18] sm:$0xff]  ;;  %v531_v2 = vld.sshfl [vmem:[#allocation1 + $0x8] sm:$0xff pattern:$0x73625140]  ;;  %v5301_v4 = vld [vmem:[%s7724_s27 + $0x50] sm:$0xff] }
  0x1e   :  { %343 = vmatpush.bf16.msra.mxu0 %v5262_v18  ;;  %v5318_v62 = vld [vmem:[%s7724_s27 + $0xd8] sm:$0xff]  ;;  %v5309_v5 = vld [vmem:[%s7724_s27 + $0x90] sm:$0xff]  ;;  %v5300_v8 = vld [vmem:[%s7724_s27 + $0x48] sm:$0xff] }
  0x1f   :  { %382 = vmatpush.bf16.msra.mxu3 %v5286_v19  ;;  %v533_v1 = vld.sshfl [vmem:[#allocation1 + $0x18] sm:$0xff pattern:$0x73625140]  ;;  %v5293_v6 = vld [vmem:[%s7724_s27 + $0x10] sm:$0xff]  ;;  %v5308_v9 = vld [vmem:[%s7724_s27 + $0x88] sm:$0xff] }
  0x20   :  { %357 = vmatpush.bf16.msra.mxu1 %v5269_v20  ;;  %2518 = vst [vmem:[#allocation1] ss:$4 sm:$0xff] %v4778_v3  ;;  %v5317_v7 = vld [vmem:[%s7724_s27 + $0xd0] sm:$0xff]  ;;  %v392_v10 = vld [vmem:[%s7697_s1 + $0x8] sm:$0xff]  ;;  %v5299_v13 = vld [vmem:[%s7724_s27 + $0x40] sm:$0xff] }
  0x21   :  { %370 = vmatpush.bf16.msra.mxu2 %v5277_v21  ;;  %529 = vst [vmem:[#allocation1 + $0x20] ss:$4 sm:$0xff] %v392_v10  ;;  %v5292_v11 = vld [vmem:[%s7724_s27 + $0x8] sm:$0xff]  ;;  %v5307_v14 = vld [vmem:[%s7724_s27 + $0x80] sm:$0xff]  ;;  %v5338_v15 = vld [vmem:[%s7724_s27 + $0x178] sm:$0xff] }
  0x22   :  { %344 = vmatpush.bf16.msra.mxu0 %v5261_v22  ;;  %v5316_v12 = vld [vmem:[%s7724_s27 + $0xc8] sm:$0xff]  ;;  %v5346_v16 = vld [vmem:[%s7724_s27 + $0x1b8] sm:$0xff]  ;;  %v5291_v17 = vld [vmem:[%s7724_s27] sm:$0xff] }
  0x23   :  { %383 = vmatpush.bf16.msra.mxu3 %v5285_v23  ;;  %v5315_v18 = vld [vmem:[%s7724_s27 + $0xc0] sm:$0xff]  ;;  %v5330_v19 = vld [vmem:[%s7724_s27 + $0x138] sm:$0xff]  ;;  %v5337_v21 = vld [vmem:[%s7724_s27 + $0x170] sm:$0xff] }
  0x24   :  { %358 = vmatpush.bf16.msra.mxu1 %v5268_v24  ;;  %v5354_v20 = vld [vmem:[%s7724_s27 + $0x1f8] sm:$0xff]  ;;  %v5345_v22 = vld [vmem:[%s7724_s27 + $0x1b0] sm:$0xff]  ;;  %v5328_v32 = vld [vmem:[%s7724_s27 + $0x128] sm:$0xff] }
  0x25   :  { %371 = vmatpush.bf16.msra.mxu2 %v5276_v25  ;;  %v5329_v23 = vld [vmem:[%s7724_s27 + $0x130] sm:$0xff]  ;;  %v4779_v29 = vld [vmem:[%s7697_s1 + $0x18] sm:$0xff]  ;;  %v5352_v33 = vld [vmem:[%s7724_s27 + $0x1e8] sm:$0xff] }
  0x26   :  { %345 = vmatpush.bf16.msra.mxu0 %v5260_v26  ;;  %v5353_v24 = vld [vmem:[%s7724_s27 + $0x1f0] sm:$0xff]  ;;  %v5334_v38 = vld [vmem:[%s7724_s27 + $0x158] sm:$0xff]  ;;  %v5324_v52 = vld [vmem:[%s7724_s27 + $0x108] sm:$0xff] }
  0x27   :  { %384 = vmatpush.bf16.msra.mxu3 %v5284_v27  ;;  %v5342_v39 = vld [vmem:[%s7724_s27 + $0x198] sm:$0xff]  ;;  %v1156_v10 = vld [vmem:[%s7700_s9 + $0x30] sm:$0xff] }
  0x28   :  { %359 = vmatpush.bf16.msra.mxu1 %v5267_v30  ;;  %v5989_v25 = vld.sshfl [vmem:[#allocation1 + $0x30] sm:$0xff pattern:$0x73625140]  ;;  %v5991_v26 = vld.sshfl [vmem:[#allocation1 + $0x20] sm:$0xff pattern:$0x73625140] }
  0x29   :  { %372 = vmatpush.bf16.msra.mxu2 %v5275_v31  ;;  %v5993_v27 = vld.sshfl [vmem:[#allocation1 + $0x38] sm:$0xff pattern:$0x73625140]  ;;  %v5995_v28 = vld.sshfl [vmem:[#allocation1 + $0x28] sm:$0xff pattern:$0x73625140] }
  0x2a   :  { %346 = vmatpush.bf16.msra.mxu0 %v5259_v36  ;;  %v5336_v30 = vld [vmem:[%s7724_s27 + $0x168] sm:$0xff]  ;;  %2521 = vst [vmem:[#allocation1 + $0x20] ss:$4 sm:$0xff] %v4779_v29  ;;  %v5327_v36 = vld [vmem:[%s7724_s27 + $0x120] sm:$0xff]  ;;  %v1161_v3 = vld [vmem:[%s7700_s9 + $0x58] sm:$0xff] }
  0x2b   :  { %385 = vmatpush.bf16.msra.mxu3 %v5283_v37  ;;  %360 = vmatmul.bf16.vlgmr.msra.gmra.mxu1 %v140_v42  ;;  %v5344_v31 = vld [vmem:[%s7724_s27 + $0x1a8] sm:$0xff]  ;;  %v5351_v37 = vld [vmem:[%s7724_s27 + $0x1e0] sm:$0xff]  ;;  %v5333_v42 = vld [vmem:[%s7724_s27 + $0x150] sm:$0xff] }
  0x2c   :  { %943 = vmatpush.bf16.msrb.mxu1 %v5306_v34  ;;  %373 = vmatmul.bf16.vlgmr.msra.gmra.mxu2 %v141_v43  ;;  %v5335_v34 = vld [vmem:[%s7724_s27 + $0x160] sm:$0xff]  ;;  %v5341_v43 = vld [vmem:[%s7724_s27 + $0x190] sm:$0xff] }
  0x2d   :  { %956 = vmatpush.bf16.msrb.mxu2 %v5314_v35  ;;  %347 = vmatmul.bf16.vlgmr.msra.gmra.mxu0 %v139_v46  ;;  %v5343_v35 = vld [vmem:[%s7724_s27 + $0x1a0] sm:$0xff]  ;;  %v5349_v46 = vld [vmem:[%s7724_s27 + $0x1d0] sm:$0xff] }
  0x2e   :  { %930 = vmatpush.bf16.msrb.mxu0 %v5298_v40  ;;  %386 = vmatmul.bf16.vlgmr.msra.gmra.mxu3 %v142_v47  ;;  %v5326_v40 = vld [vmem:[%s7724_s27 + $0x118] sm:$0xff]  ;;  %v5332_v47 = vld [vmem:[%s7724_s27 + $0x148] sm:$0xff] }
  0x2f   :  { %969 = vmatpush.bf16.msrb.mxu3 %v5322_v41  ;;  %v5350_v41 = vld [vmem:[%s7724_s27 + $0x1d8] sm:$0xff] }
  0x30   :  { %944 = vmatpush.bf16.msrb.mxu1 %v5305_v44  ;;  %v1034_v44 = vld [vmem:[%s7699_s2] sm:$0xff]  }
  0x31   :  { %957 = vmatpush.bf16.msrb.mxu2 %v5313_v45  ;;  %v5325_v45 = vld [vmem:[%s7724_s27 + $0x110] sm:$0xff] }
  0x32   :  { %931 = vmatpush.bf16.msrb.mxu0 %v5297_v48  ;;  %v5340_v48 = vld [vmem:[%s7724_s27 + $0x188] sm:$0xff] }
  0x33   :  { %970 = vmatpush.bf16.msrb.mxu3 %v5321_v49  ;;  %v1137_v49 = vunpack.c.l.bf16 %v1034_v44 }
  0x34   :  { %945 = vmatpush.bf16.msrb.mxu1 %v5304_v50  ;;  %v1138_v50 = vunpack.c.h.bf16 %v1034_v44  ;;  %v5363_v44 = vld [vmem:[%s7702_s7 + $0x30] sm:$0xff] }
  0x35   :  { %958 = vmatpush.bf16.msrb.mxu2 %v5312_v51  ;;  %v1036_v51 = vld [vmem:[%s7699_s2 + $0x8] sm:$0xff]  }
  0x36   :  { %932 = vmatpush.bf16.msrb.mxu0 %v5296_v53  ;;  %v5348_v53 = vld [vmem:[%s7724_s27 + $0x1c8] sm:$0xff] }
  0x37   :  { %971 = vmatpush.bf16.msrb.mxu3 %v5320_v54  ;;  %v5331_v54 = vld [vmem:[%s7724_s27 + $0x140] sm:$0xff] }
  0x38   :  { %946 = vmatpush.bf16.msrb.mxu1 %v5303_v55  ;;  %v5339_v55 = vld [vmem:[%s7724_s27 + $0x180] sm:$0xff] }
  0x39   :  { %959 = vmatpush.bf16.msrb.mxu2 %v5311_v56  ;;  %v1139_v56 = vunpack.c.l.bf16 %v1036_v51 }
  0x3a   :  { %933 = vmatpush.bf16.msrb.mxu0 %v5295_v57  ;;  %v1141_v57 = vadd.f32 %v1138_v50, %v1137_v49  ;;  %v5361_v50 = vld [vmem:[%s7702_s7 + $0x20] sm:$0xff] }
  0x3b   :  { %972 = vmatpush.bf16.msrb.mxu3 %v5319_v58  ;;  %v6075_v58 = vld [vmem:[%s7700_s9 + $0x78] sm:$0xff] }
  0x3c   :  { %947 = vmatpush.bf16.msrb.mxu1 %v5302_v59  ;;  %v5323_v59 = vld [vmem:[%s7724_s27 + $0x100] sm:$0xff] }
  0x3d   :  { %960 = vmatpush.bf16.msrb.mxu2 %v5310_v60  ;;  %v5347_v60 = vld [vmem:[%s7724_s27 + $0x1c0] sm:$0xff] }
  0x3e   :  { %934 = vmatpush.bf16.msrb.mxu0 %v5294_v61  ;;  %v6086_v61 = vld [vmem:[%s7700_s9 + $0x70] sm:$0xff] }
  0x3f   :  { %973 = vmatpush.bf16.msrb.mxu3 %v5318_v62  ;;  %v1140_v62 = vunpack.c.h.bf16 %v1036_v51 }
  0x40   :  { %948 = vmatpush.bf16.msrb.mxu1 %v5301_v4  ;;  %v1160_v4 = vld [vmem:[%s7700_s9 + $0x50] sm:$0xff] }
  0x41   :  { %961 = vmatpush.bf16.msrb.mxu2 %v5309_v5 }
  0x42   :  { %935 = vmatpush.bf16.msrb.mxu0 %v5293_v6  ;;  %v1159_v6 = vld [vmem:[%s7700_s9 + $0x48] sm:$0xff] }
  0x43   :  { %974 = vmatpush.bf16.msrb.mxu3 %v5317_v7  ;;  %v1158_v7 = vld [vmem:[%s7700_s9 + $0x40] sm:$0xff] }
  0x44   :  { %949 = vmatpush.bf16.msrb.mxu1 %v5300_v8 }
  0x45   :  { %962 = vmatpush.bf16.msrb.mxu2 %v5308_v9  ;;  %v1157_v9 = vld [vmem:[%s7700_s9 + $0x38] sm:$0xff] }
  0x46   :  { %936 = vmatpush.bf16.msrb.mxu0 %v5292_v11 }
  0x47   :  { %975 = vmatpush.bf16.msrb.mxu3 %v5316_v12  ;;  %v1155_v12 = vld [vmem:[%s7700_s9 + $0x28] sm:$0xff] }
  0x48   :  { %950 = vmatpush.bf16.msrb.mxu1 %v5299_v13  ;;  %v1154_v13 = vld [vmem:[%s7700_s9 + $0x20] sm:$0xff] }
  0x49   :  { %963 = vmatpush.bf16.msrb.mxu2 %v5307_v14 }
  0x4a   :  { %937 = vmatpush.bf16.msrb.mxu0 %v5291_v17 }
  0x4b   :  { %976 = vmatpush.bf16.msrb.mxu3 %v5315_v18  ;;  %951 = vmatmul.bf16.vlgmr.msrb.gmra.mxu1 %v531_v2  ;;  %v1151_v18 = vld [vmem:[%s7700_s9 + $0x8] sm:$0xff] }
  0x4c   :  { %995 = vmatpush.bf16.msra.mxu1 %v5338_v15  ;;  %964 = vmatmul.bf16.vlgmr.msrb.gmra.mxu2 %v532_v63  ;;  %v1142_v63 = vadd.f32 %v1141_v57, %v1139_v56  ;;  %v1153_v15 = vld [vmem:[%s7700_s9 + $0x18] sm:$0xff]  ;;  %v5359_v56 = vld [vmem:[%s7702_s7 + $0x10] sm:$0xff] }
  0x4d   :  { %1008 = vmatpush.bf16.msra.mxu2 %v5346_v16  ;;  %938 = vmatmul.bf16.vlgmr.msrb.gmra.mxu0 %v530_v0  ;;  %v6092_v0 = vld [vmem:[%s7700_s9 + $0x68] sm:$0xff]  ;;  %v1152_v16 = vld [vmem:[%s7700_s9 + $0x10] sm:$0xff] }
  0x4e   :  { %982 = vmatpush.bf16.msra.mxu0 %v5330_v19  ;;  %977 = vmatmul.bf16.vlgmr.msrb.gmra.mxu3 %v533_v1  ;;  %v6099_v1 = vld [vmem:[%s7700_s9 + $0x60] sm:$0xff]  ;;  %v1143_v2 = vadd.f32 %v1142_v63, %v1140_v62 }
  0x4f   :  { %1021 = vmatpush.bf16.msra.mxu3 %v5354_v20  ;;  %v1150_v19 = vld [vmem:[%s7700_s9] sm:$0xff] }
  0x50   :  { %996 = vmatpush.bf16.msra.mxu1 %v5337_v21  ;;  %v1144_v5 = vrot.slane %v1143_v2, 4  ;;  %v5357_v62 = vld [vmem:[%s7702_s7] sm:$0xff] }
  0x51   :  { %1009 = vmatpush.bf16.msra.mxu2 %v5345_v22 }
  0x52   :  { %983 = vmatpush.bf16.msra.mxu0 %v5329_v23  ;;  %v1145_v8 = vadd.f32 %v1144_v5, %v1143_v2  ;;  %v5356_v5 = vld [vmem:[%s7699_s2 + $0x8] sm:$0xff] }
  0x53   :  { %1022 = vmatpush.bf16.msra.mxu3 %v5353_v24 }
  0x54   :  { %997 = vmatpush.bf16.msra.mxu1 %v5336_v30  ;;  %v1146_v11 = vrot.slane %v1145_v8, 2 }
  0x55   :  { %1010 = vmatpush.bf16.msra.mxu2 %v5344_v31 }
  0x56   :  { %984 = vmatpush.bf16.msra.mxu0 %v5328_v32  ;;  %v1147_v14 = vadd.f32 %v1146_v11, %v1145_v8  ;;  %v5366_v8 = vld [vmem:[%s7703_s13 + $0xc] sm:$0xf]  ;;  %v4492_v11 = vld [vmem:[%s7703_s13 + $0x10] sm:$0xf] }
  0x57   :  { %1023 = vmatpush.bf16.msra.mxu3 %v5352_v33 }
  0x58   :  { %998 = vmatpush.bf16.msra.mxu1 %v5335_v34  ;;  %v1148_v17 = vrot.slane %v1147_v14, 1  ;;  %v1191_v34 = vld [vmem:[%s7701_s11 + $0x18] sm:$0xff] }
  0x59   :  { %1011 = vmatpush.bf16.msra.mxu2 %v5343_v35  ;;  %v1190_v35 = vld [vmem:[%s7701_s11 + $0x10] sm:$0xff] }
  0x5a   :  { %985 = vmatpush.bf16.msra.mxu0 %v5327_v36  ;;  %v1149_v20 = vadd.f32 %v1148_v17, %v1147_v14 }
  0x5b   :  { %1024 = vmatpush.bf16.msra.mxu3 %v5351_v37  ;;  %v1189_v37 = vld [vmem:[%s7701_s11 + $0x8] sm:$0xff] }
  0x5c   :  { %999 = vmatpush.bf16.msra.mxu1 %v5334_v38 }
  0x5d   :  { %1012 = vmatpush.bf16.msra.mxu2 %v5342_v39 }
  0x5e   :  { %986 = vmatpush.bf16.msra.mxu0 %v5326_v40  ;;  %v1188_v40 = vld [vmem:[%s7701_s11] sm:$0xff] }
  0x5f   :  { %1025 = vmatpush.bf16.msra.mxu3 %v5350_v41 }
  0x60   :  { %1000 = vmatpush.bf16.msra.mxu1 %v5333_v42 }
  0x61   :  { %1013 = vmatpush.bf16.msra.mxu2 %v5341_v43  ;;  %v5364_v43 = vld [vmem:[%s7702_s7 + $0x38] sm:$0xff] }
  0x62   :  { %987 = vmatpush.bf16.msra.mxu0 %v5325_v45 }
  0x63   :  { %1026 = vmatpush.bf16.msra.mxu3 %v5349_v46  ;;  %v5362_v46 = vld [vmem:[%s7702_s7 + $0x28] sm:$0xff] }
  0x64   :  { %1001 = vmatpush.bf16.msra.mxu1 %v5332_v47 }
  0x65   :  { %1014 = vmatpush.bf16.msra.mxu2 %v5340_v48 }
  0x66   :  { %988 = vmatpush.bf16.msra.mxu0 %v5324_v52  ;;  %v5360_v52 = vld [vmem:[%s7702_s7 + $0x18] sm:$0xff] }
  0x67   :  { %1027 = vmatpush.bf16.msra.mxu3 %v5348_v53 }
  0x68   :  { %1002 = vmatpush.bf16.msra.mxu1 %v5331_v54  ;;  %v4476_v54 = vld [vmem:[%s7703_s13] sm:$0xf] }
  0x69   :  { %1015 = vmatpush.bf16.msra.mxu2 %v5339_v55  ;;  %v5371_v55 = vld [vmem:[%s7703_s13 + $0x30] sm:$0xf0] }
  0x6a   :  { %989 = vmatpush.bf16.msra.mxu0 %v5323_v59  ;;  %v4477_v57 = vor.u32 %v5371_v55, %v4476_v54  ;;  %v5358_v59 = vld [vmem:[%s7702_s7 + $0x8] sm:$0xff]  ;;  %v5369_v55 = vld [vmem:[%s7703_s13 + $0x24] sm:$0xf] }
  0x6b   :  { %1028 = vmatpush.bf16.msra.mxu3 %v5347_v60  ;;  %1003 = vmatmul.bf16.vlgmr.msra.gmra.mxu1 %v5995_v28  ;;  %v1166_v60 = vld [vmem:[%s7704_s10] sm:$0x1] }
  0x6c   :  { %1167 = vmatpush.msrb.mxu1 %v6075_v58  ;;  %1016 = vmatmul.bf16.vlgmr.msra.gmra.mxu2 %v5989_v25 }
  0x6d   :  { %990 = vmatmul.bf16.vlgmr.msra.gmra.mxu0 %v5991_v26  ;;  %1209 = vmatpush.msrb.mxu2 %v1191_v34 }
  0x6e   :  { %1168 = vmatpush.msrb.mxu1 %v6086_v61  ;;  %1029 = vmatmul.bf16.vlgmr.msra.gmra.mxu3 %v5993_v27 }
  0x6f   :  { %1210 = vmatpush.msrb.mxu2 %v1190_v35  ;;  %1118 = vmatpush.bf16.msrb.mxu0 %v5364_v43  ;;  %v1192_v35 = vld [vmem:[%s7706_s12] sm:$0x1] }
  0x70   :  { %1169 = vmatpush.msrb.mxu1 %v6092_v0  ;;  %1339 = vmatpush.bf16.msrb.mxu3 %v4477_v57  ;;  %v5409_v57 = vld [vmem:[%s7722_s20 + $0x38] sm:$0xff] }
  0x71   :  { %1211 = vmatpush.msrb.mxu2 %v1189_v37 }
  0x72   :  { %1170 = vmatpush.msrb.mxu1 %v6099_v1 }
  0x73   :  { %1212 = vmatpush.msrb.mxu2 %v1188_v40  ;;  %1119 = vmatpush.bf16.msrb.mxu0 %v5363_v44  ;;  %v4494_v40 = vld [vmem:[%s7703_s13 + $0x44] sm:$0xf0] }
  0x74   :  { %1171 = vmatpush.msrb.mxu1 %v1161_v3  ;;  %v5355_v3 = vld [vmem:[%s7699_s2] sm:$0xff]  ;;  %v4516_v44 = vld [vmem:[%s7703_s13 + $0x28] sm:$0xf] }
  0x76   :  { %1172 = vmatpush.msrb.mxu1 %v1160_v4 }
  0x77   :  { %1120 = vmatpush.bf16.msrb.mxu0 %v5362_v46  ;;  %v5376_v46 = vld [vmem:[%s7703_s13 + $0x58] sm:$0xf0] }
  0x78   :  { %1173 = vmatpush.msrb.mxu1 %v1159_v6  ;;  %v5365_v6 = vld [vmem:[%s7703_s13 + $0x4] sm:$0xf] }
  0x7a   :  { %1174 = vmatpush.msrb.mxu1 %v1158_v7  ;;  %v4478_v7 = vld [vmem:[%s7703_s13 + $0x34] sm:$0xf0] }
  0x7b   :  { %1121 = vmatpush.bf16.msrb.mxu0 %v5361_v50 }
  0x7c   :  { %1175 = vmatpush.msrb.mxu1 %v1157_v9  ;;  %v4481_v9 = vor.u32 %v5365_v6, %v4478_v7  ;;  %v5402_v7 = vld [vmem:[%s7722_s20] sm:$0xff] }
  0x7e   :  { %1176 = vmatpush.msrb.mxu1 %v1156_v10  ;;  %v4486_v10 = vld [vmem:[%s7703_s13 + $0x3c] sm:$0xf0] }
  0x7f   :  { %1122 = vmatpush.bf16.msrb.mxu0 %v5360_v52 }
  0x80   :  { %1177 = vmatpush.msrb.mxu1 %v1155_v12  ;;  %v5373_v12 = vld [vmem:[%s7703_s13 + $0x40] sm:$0xf0] }
  0x81   :  { %v4493_v14 = vor.u32 %v5373_v12, %v4492_v11  ;;  %v5439_v11 = vld [vmem:[%s7724_s27 + $0x28] sm:$0xff]  ;;  %v5438_v12 = vld [vmem:[%s7724_s27 + $0x20] sm:$0xff] }
  0x82   :  { %1178 = vmatpush.msrb.mxu1 %v1154_v13  ;;  %v4489_v13 = vor.u32 %v5366_v8, %v4486_v10  ;;  %v5441_v8 = vld [vmem:[%s7724_s27 + $0x38] sm:$0xff]  ;;  %v5440_v10 = vld [vmem:[%s7724_s27 + $0x30] sm:$0xff] }
  0x83   :  { %1123 = vmatpush.bf16.msrb.mxu0 %v5359_v56  ;;  %1391 = vmatpush.bf16.msra.mxu2 %v4493_v14  ;;  %v4510_v56 = vld [vmem:[%s7703_s13 + $0x54] sm:$0xf0]  ;;  %v5436_v14 = vld [vmem:[%s7724_s27 + $0x10] sm:$0xff] }
  0x84   :  { %1179 = vmatpush.msrb.mxu1 %v1153_v15  ;;  %v4484_v15 = vld [vmem:[%s7703_s13 + $0x8] sm:$0xf] }
  0x86   :  { %1180 = vmatpush.msrb.mxu1 %v1152_v16  ;;  %v5372_v16 = vld [vmem:[%s7703_s13 + $0x38] sm:$0xf0] }
  0x87   :  { %1124 = vmatpush.bf16.msrb.mxu0 %v5358_v59  ;;  %v4485_v17 = vor.u32 %v5372_v16, %v4484_v15  ;;  %v4513_v59 = vor.u32 %v5369_v55, %v4510_v56  ;;  %v5435_v15 = vld [vmem:[%s7724_s27 + $0x8] sm:$0xff]  ;;  %v5434_v16 = vld [vmem:[%s7724_s27] sm:$0xff]  ;;  %v5381_v55 = vld [vmem:[%s7707_s15 + $0x18] sm:$0xff] }
  0x88   :  { %1181 = vmatpush.msrb.mxu1 %v1151_v18  ;;  %v4508_v18 = vld [vmem:[%s7703_s13 + $0x20] sm:$0xf] }
  0x89   :  { %1365 = vmatpush.bf16.msra.mxu3 %v4485_v17  ;;  %v5473_v17 = vld [vmem:[%s7724_s27 + $0x138] sm:$0xff] }
  0x8a   :  { %1182 = vmatpush.msrb.mxu1 %v1150_v19  ;;  %v5375_v19 = vld [vmem:[%s7703_s13 + $0x50] sm:$0xf0] }
  0x8b   :  { %1183 = vmatmul.f32.vlgmr.msrb.gmra.mxu1 %v1149_v20  ;;  %1125 = vmatpush.bf16.msrb.mxu0 %v5357_v62  ;;  %v4500_v20 = vld [vmem:[%s7703_s13 + $0x18] sm:$0xf]  ;;  %v5407_v62 = vld [vmem:[%s7722_s20 + $0x28] sm:$0xff] }
  0x8c   :  { %1378 = vmatpush.bf16.msra.mxu1 %v4489_v13  ;;  %v5437_v13 = vld [vmem:[%s7724_s27 + $0x18] sm:$0xff] }
  0x8e   :  { %1126 = vmatmul.bf16.vlgmr.msrb.gmra.mxu0 %v5355_v3  ;;  %v5404_v3 = vld [vmem:[%s7722_s20 + $0x10] sm:$0xff] }
  0x8f   :  { %1352 = vmatpush.bf16.msra.mxu0 %v4481_v9 }
  0x9e   :  { %1131 = vmatmul.bf16.gmra.mxu0 %v5356_v5  ;;  %v4648_v5 = vld [vmem:[%s7723_s21 + $0x10] sm:$0xff] }
  0x9f   :  { %v2126_v6 = vunpack.c.l.b16 %v4648_v5 }
  0xa1   :  { %v2130_v9 = vpack.c.b16 %v2126_v6, %v2126_v6 }
  0xa8   :  { %v6142_v21 = vpop.f32.mrf.mxu1 }
  0xaa   :  { %v6144_v22 = vpop.f32.mrf.mxu0 }
  0xaf   :  { %v6146_v23 = vpop.f32.mrf.mxu2 }
  0xb0   :  { %v363_v24 = vpop.f32.mrf.mxu1 }
  0xb1   :  { %v6148_v25 = vpop.f32.mrf.mxu3  ;;  %v4509_v24 = vor.u32 %v5375_v19, %v4508_v18  ;;  %v2522_v18 = vld.sshfl [vmem:[#allocation1] sm:$0xff pattern:$0x73625140]  ;;  %v5472_v19 = vld [vmem:[%s7724_s27 + $0x130] sm:$0xff] }
  0xb2   :  { %v350_v26 = vpop.f32.mrf.mxu0 }
  0xb3   :  { %v5374_v26 = vld [vmem:[%s7703_s13 + $0x48] sm:$0xf0]  ;;  %1443 = vmatpush.bf16.msrb.mxu0 %v4509_v24  ;;  %v5470_v24 = vld [vmem:[%s7724_s27 + $0x120] sm:$0xff] }
  0xb7   :  { %v376_v27 = vpop.f32.mrf.mxu2 }
  0xb8   :  { %v5368_v27 = vld [vmem:[%s7703_s13 + $0x1c] sm:$0xf] }
  0xb9   :  { %v389_v28 = vpop.f32.mrf.mxu3 }
  0xba   :  { %v4502_v28 = vld [vmem:[%s7703_s13 + $0x4c] sm:$0xf0] }
  0xbb   :  { %v4505_v34 = vor.u32 %v5368_v27, %v4502_v28  ;;  %v5469_v27 = vld [vmem:[%s7724_s27 + $0x118] sm:$0xff]  ;;  %v5468_v28 = vld [vmem:[%s7724_s27 + $0x110] sm:$0xff] }
  0xc8   :  { %v6150_v29 = vpop.f32.mrf.mxu1 }
  0xca   :  { %v6152_v30 = vpop.f32.mrf.mxu0 }
  0xcf   :  { %v6154_v31 = vpop.f32.mrf.mxu2 }
  0xd0   :  { %v954_v33 = vpop.f32.mrf.mxu1 }
  0xd1   :  { %v6156_v32 = vpop.f32.mrf.mxu3  ;;  %v4501_v33 = vor.u32 %v5374_v26, %v4500_v20  ;;  %v5471_v20 = vld [vmem:[%s7724_s27 + $0x128] sm:$0xff] }
  0xd2   :  { %v941_v36 = vpop.f32.mrf.mxu0 }
  0xd3   :  { %1417 = vmatpush.bf16.msrb.mxu1 %v4501_v33  ;;  %v4524_v36 = vld [vmem:[%s7703_s13 + $0x30] sm:$0xf]  ;;  %v5467_v33 = vld [vmem:[%s7724_s27 + $0x108] sm:$0xff] }
  0xd7   :  { %v967_v38 = vpop.f32.mrf.mxu2 }
  0xd8   :  { %v5377_v38 = vld [vmem:[%s7703_s13 + $0x60] sm:$0xf0] }
  0xd9   :  { %v980_v39 = vpop.f32.mrf.mxu3 }
  0xda   :  { %v5367_v39 = vld [vmem:[%s7703_s13 + $0x14] sm:$0xf] }
  0xdb   :  { %v4497_v52 = vor.u32 %v5367_v39, %v4494_v40  ;;  %v5385_v39 = vld [vmem:[%s7707_s15 + $0x38] sm:$0xff] }
  0xe8   :  { %v6170_v41 = vpop.f32.mrf.mxu1 }
  0xea   :  { %v6172_v42 = vpop.f32.mrf.mxu0 }
  0xef   :  { %v6180_v45 = vpop.f32.mrf.mxu2 }
  0xf0   :  { %v1006_v48 = vpop.f32.mrf.mxu1 }
  0xf1   :  { %v6185_v47 = vpop.f32.mrf.mxu3  ;;  %v5370_v48 = vld [vmem:[%s7703_s13 + $0x2c] sm:$0xf] }
  0xf2   :  { %v993_v49 = vpop.f32.mrf.mxu0 }
  0xf3   :  { %v4518_v49 = vld [vmem:[%s7703_s13 + $0x5c] sm:$0xf0] }
  0xf4   :  { %v4521_v54 = vor.u32 %v5370_v48, %v4518_v49  ;;  %v5383_v48 = vld [vmem:[%s7707_s15 + $0x28] sm:$0xff] }
  0xf7   :  { %v1019_v51 = vpop.f32.mrf.mxu2 }
  0xf8   :  { %v4525_v51 = vor.u32 %v5377_v38, %v4524_v36  ;;  %v5507_v36 = vld [vmem:[%s7702_s7 + $0x38] sm:$0xff]  ;;  %v5506_v38 = vld [vmem:[%s7702_s7 + $0x30] sm:$0xff] }
  0xf9   :  { %v1032_v53 = vpop.f32.mrf.mxu3 }
  0xfa   :  { %v4517_v53 = vor.u32 %v5376_v46, %v4516_v44  ;;  %v5384_v44 = vld [vmem:[%s7707_s15 + $0x30] sm:$0xff]  ;;  %v5504_v46 = vld [vmem:[%s7702_s7 + $0x20] sm:$0xff] }
 0x108   :  { %v1184_v63 = vpop.f32.mrf.mxu1 }
 0x109   :  { %v1185_v2 = vadd.f32 %v1184_v63, %v1166_v60  ;;  %v5408_v60 = vld [vmem:[%s7722_s20 + $0x30] sm:$0xff]  ;;  %v5406_v63 = vld [vmem:[%s7722_s20 + $0x20] sm:$0xff] }
 0x10b   :  { %v1187_v4 = vmax.f32 %v1185_v2, 0.0  ;;  %v5405_v2 = vld [vmem:[%s7722_s20 + $0x18] sm:$0xff]  ;;  %v6369_v26 = vpop.f32.mrf.mxu0 }
 0x10d   :  { %4473 = vmatmul.msk.f32.vlgmr.msrb.gmra.mxu2 %vm1193_vm0, %v1187_v4  ;;  %v5403_v4 = vld [vmem:[%s7722_s20 + $0x8] sm:$0xff] }
 0x10e   :  { %1430 = vmatpush.bf16.msrb.mxu2 %v4505_v34 }
 0x113   :  { %v6380_v34 = vpop.f32.mrf.mxu0 }
 0x11b   :  { %v6394_v40 = vpop.f32.mrf.mxu0 }
 0x123   :  { %v6408_v49 = vpop.f32.mrf.mxu0 }
 0x190   :  { %v1214_v37 = vpop.f32.mrf.mxu2 }
 0x191   :  { %v1215_v43 = vadd.f32 %v1214_v37, %v1192_v35  ;;  %v5466_v35 = vld [vmem:[%s7724_s27 + $0x100] sm:$0xff] }
 0x192   :  { %v2526_v37 = vld.sshfl [vmem:[#allocation1 + $0x20] sm:$0xff pattern:$0x73625140] }
 0x193   :  { %v1217_v50 = vpack.c.bf16 %v1215_v43, %v1215_v43  ;;  %v5505_v43 = vld [vmem:[%s7702_s7 + $0x28] sm:$0xff] }
 0x195   :  { %4526 = vmatmul.msk.bf16.vlgmr.msrb.gmra.mxu3 %vm7717_vm1, %v1217_v50  ;;  %4527 = vmatmul.msk.bf16.vlgmr.msra.gmra.mxu0 %vm7717_vm1, %v1217_v50 }
 0x196   :  { %4529 = vmatmul.msk.bf16.vlgmr.msra.gmra.mxu1 %vm7717_vm1, %v1217_v50  ;;  %4530 = vmatmul.msk.bf16.vlgmr.msra.gmra.mxu2 %vm7717_vm1, %v1217_v50 }
 0x197   :  { %1495 = vmatpush.bf16.msra.mxu0 %v4525_v51  ;;  %1404 = vmatpush.bf16.msrb.mxu3 %v4497_v52  ;;  %v5382_v51 = vld [vmem:[%s7707_s15 + $0x20] sm:$0xff] }
 0x198   :  { %1469 = vmatpush.bf16.msra.mxu1 %v4517_v53  ;;  %1482 = vmatpush.bf16.msra.mxu2 %v4521_v54  ;;  %v6419_v52 = vld [vmem:[%s7708_s14] sm:$0xff]  ;;  %v5502_v53 = vld [vmem:[%s7702_s7 + $0x10] sm:$0xff] }
 0x199   :  { %v1303_v54 = vperm.slane %v6419_v52, 1  ;;  %v1305_v56 = vperm.slane %v6419_v52, 3  ;;  %v1302_v5 = vperm.slane %v6419_v52, 0 }
 0x1a5   :  { %4528 = vmatmul.msk.bf16.vlgmr.msra.gmra.mxu3 %vm7717_vm1, %v1217_v50  ;;  %4534 = vmatmul.msk.bf16.vlgmr.msrb.gmra.mxu0 %vm7717_vm1, %v1217_v50 }
 0x1a6   :  { %4532 = vmatmul.msk.bf16.vlgmr.msrb.gmra.mxu1 %vm7717_vm1, %v1217_v50  ;;  %4533 = vmatmul.msk.bf16.vlgmr.msrb.gmra.mxu2 %vm7717_vm1, %v1217_v50 }
 0x1a7   :  { %2330 = vmatpush.bf16.msrb.mxu0 %v5409_v57  ;;  %1456 = vmatpush.bf16.msra.mxu3 %v4513_v59  ;;  %v5545_v57 = vld [vmem:[%s7725_s30] ss:$0 sm:$0xff] }
 0x1a8   :  { %1929 = vmatpush.bf16.msrb.mxu1 %v5385_v39  ;;  %v349_v6 = vadd.f32 %v5545_v57, %v6144_v22  ;;  %v5379_v22 = vld [vmem:[%s7707_s15 + $0x8] sm:$0xff] }
 0x1ab   :  { %2331 = vmatpush.bf16.msrb.mxu0 %v5408_v60  ;;  %v5501_v60 = vld [vmem:[%s7702_s7 + $0x8] sm:$0xff] }
 0x1ac   :  { %1930 = vmatpush.bf16.msrb.mxu1 %v5384_v44 }
 0x1af   :  { %2332 = vmatpush.bf16.msrb.mxu0 %v5407_v62 }
 0x1b0   :  { %1931 = vmatpush.bf16.msrb.mxu1 %v5383_v48 }
 0x1b3   :  { %2333 = vmatpush.bf16.msrb.mxu0 %v5406_v63 }
 0x1b4   :  { %1932 = vmatpush.bf16.msrb.mxu1 %v5382_v51 }
 0x1b5   :  { %4531 = vmatmul.msk.bf16.vlgmr.msrb.gmra.mxu3 %vm7717_vm1, %v1217_v50  ;;  %4538 = vmatmul.msk.bf16.vlgmr.msra.gmra.mxu0 %vm7717_vm1, %v1217_v50 }
 0x1b6   :  { %4536 = vmatmul.msk.bf16.vlgmr.msra.gmra.mxu1 %vm7717_vm1, %v1217_v50  ;;  %4537 = vmatmul.msk.bf16.vlgmr.msra.gmra.mxu2 %vm7717_vm1, %v1217_v50 }
 0x1b7   :  { %2334 = vmatpush.bf16.msrb.mxu0 %v5405_v2  ;;  %v5380_v2 = vld [vmem:[%s7707_s15 + $0x10] sm:$0xff] }
 0x1b8   :  { %1933 = vmatpush.bf16.msrb.mxu1 %v5381_v55 }
 0x1bb   :  { %2335 = vmatpush.bf16.msrb.mxu0 %v5404_v3 }
 0x1bc   :  { %1934 = vmatpush.bf16.msrb.mxu1 %v5380_v2 }
 0x1bf   :  { %2336 = vmatpush.bf16.msrb.mxu0 %v5403_v4 }
 0x1c0   :  { %1935 = vmatpush.bf16.msrb.mxu1 %v5379_v22  ;;  %v1309_v22 = vperm.slane %v6419_v52, 7 }
 0x1c3   :  { %2337 = vmatpush.bf16.msrb.mxu0 %v5402_v7 }
 0x1c5   :  { %4535 = vmatmul.msk.bf16.vlgmr.msra.gmra.mxu3 %vm7717_vm1, %v1217_v50  ;;  %v5503_v50 = vld [vmem:[%s7702_s7 + $0x18] sm:$0xff] }
 0x1c6   :  { %2338 = vmatmul.bf16.vlgmr.msrb.gmra.mxu0 %v2130_v9  ;;  %v5500_v9 = vld [vmem:[%s7702_s7] sm:$0xff] }
 0x1c7   :  { %2922 = vmatpush.bf16.msra.mxu0 %v5441_v8  ;;  %v1306_v8 = vperm.slane %v6419_v52, 4 }
 0x1cb   :  { %2923 = vmatpush.bf16.msra.mxu0 %v5440_v10  ;;  %v5036_v10 = vld [vmem:[%s7699_s2 + $0x10] sm:$0xff]  }
 0x1cf   :  { %2924 = vmatpush.bf16.msra.mxu0 %v5439_v11  ;;  %v5546_v11 = vld [vmem:[%s7698_s6] ss:$0 sm:$0xff] }
 0x1d3   :  { %2925 = vmatpush.bf16.msra.mxu0 %v5438_v12  ;;  %v3130_v12 = vunpack.c.l.bf16 %v5036_v10 }
 0x1d7   :  { %2926 = vmatpush.bf16.msra.mxu0 %v5437_v13  ;;  %v3131_v13 = vunpack.c.h.bf16 %v5036_v10 }
 0x1db   :  { %2927 = vmatpush.bf16.msra.mxu0 %v5436_v14 }
 0x1df   :  { %2928 = vmatpush.bf16.msra.mxu0 %v5435_v15  ;;  %v5038_v15 = vld [vmem:[%s7699_s2 + $0x18] sm:$0xff]  }
 0x1e0   :  { %v3133_v39 = vunpack.c.h.bf16 %v5038_v15 }
 0x1e3   :  { %2929 = vmatpush.bf16.msra.mxu0 %v5434_v16 }
 0x1e6   :  { %2930 = vmatmul.bf16.vlgmr.msra.gmra.mxu0 %v2522_v18  ;;  %v5498_v18 = vld [vmem:[%s7699_s2 + $0x10] sm:$0xff] }
 0x1e7   :  { %2974 = vmatpush.bf16.msrb.mxu0 %v5473_v17 }
 0x1eb   :  { %2975 = vmatpush.bf16.msrb.mxu0 %v5472_v19  ;;  %v5401_v19 = vld [vmem:[%s7709_s17 + $0x38] sm:$0xff] }
 0x1ec   :  { %2014 = vmatpush.bf16.msrb.mxu2 %v5401_v19 }
 0x1ef   :  { %2976 = vmatpush.bf16.msrb.mxu0 %v5471_v20  ;;  %v3132_v20 = vunpack.c.l.bf16 %v5038_v15 }
 0x1f3   :  { %2977 = vmatpush.bf16.msrb.mxu0 %v5470_v24  ;;  %v3134_v24 = vadd.f32 %v3131_v13, %v3130_v12 }
 0x1f7   :  { %2978 = vmatpush.bf16.msrb.mxu0 %v5469_v27  ;;  %v362_v27 = vadd.f32 %v6142_v21, %v349_v6  ;;  %v6471_v21 = vld [vmem:[%s7708_s14 + $0x8] sm:$0x1f] }
 0x1fb   :  { %2979 = vmatpush.bf16.msrb.mxu0 %v5468_v28 }
 0x1ff   :  { %2980 = vmatpush.bf16.msrb.mxu0 %v5467_v33 }
 0x203   :  { %2981 = vmatpush.bf16.msrb.mxu0 %v5466_v35  ;;  %v940_v35 = vadd.f32 %v5546_v11, %v6152_v30  ;;  %v1304_v11 = vperm.slane %v6419_v52, 2 }
 0x206   :  { %2982 = vmatmul.bf16.vlgmr.msrb.gmra.mxu0 %v2526_v37 }
 0x207   :  { %3111 = vmatpush.bf16.msra.mxu0 %v5507_v36 }
 0x20b   :  { %3112 = vmatpush.bf16.msra.mxu0 %v5506_v38  ;;  %v5378_v38 = vld [vmem:[%s7707_s15] sm:$0xff] }
 0x20c   :  { %1936 = vmatpush.bf16.msrb.mxu1 %v5378_v38 }
 0x20f   :  { %3113 = vmatpush.bf16.msra.mxu0 %v5505_v43  ;;  %v3135_v43 = vadd.f32 %v3134_v24, %v3132_v20  ;;  %v1314_v24 = vperm.slane %v6471_v21, 4 }
 0x211   :  { %v3136_v30 = vadd.f32 %v3135_v43, %v3133_v39  ;;  %v5499_v39 = vld [vmem:[%s7699_s2 + $0x18] sm:$0xff] }
 0x212   :  { %v1354_v59 = vpop.f32.mrf.mxu0  ;;  %v3150_v43 = vld [vmem:[%s7700_s9 + $0x38] sm:$0xff] }
 0x213   :  { %3114 = vmatpush.bf16.msra.mxu0 %v5504_v46  ;;  %v1355_v62 = vadd.f32 %v1354_v59, %v1303_v54  ;;  %v1380_v63 = vpop.f32.mrf.mxu1  ;;  %v953_v54 = vadd.f32 %v6150_v29, %v940_v35  ;;  %v3137_v57 = vrot.slane %v3136_v30, 4  ;;  %v1308_v59 = vperm.slane %v6419_v52, 6 }
 0x214   :  { %v1381_v3 = vadd.f32 %v1380_v63, %v1305_v56  ;;  %v1310_v56 = vperm.slane %v6471_v21, 0 }
 0x215   :  { %v4540_v4 = vmul.f32 -1.442695, %v1355_v62  ;;  %v3138_v6 = vadd.f32 %v3137_v57, %v3136_v30  ;;  %v1313_v30 = vperm.slane %v6471_v21, 3  ;;  %v3149_v57 = vld [vmem:[%s7700_s9 + $0x30] sm:$0xff] }
 0x216   :  { %v4542_v7 = vmul.f32 -1.442695, %v1381_v3  ;;  %v6504_v3 = vadd.f32 %v6154_v31, %v953_v54 }
 0x217   :  { %3115 = vmatpush.bf16.msra.mxu0 %v5503_v50  ;;  %5553 = vpow2.f32 %v4540_v4  ;;  %v375_v50 = vadd.f32 %v6146_v23, %v362_v27  ;;  %v6490_v23 = vld [vmem:[%s7705_s8] ss:$0 sm:$0xff]  ;;  %v1307_v27 = vperm.slane %v6419_v52, 5 }
 0x218   :  { %5555 = vpow2.f32 %v4542_v7  ;;  %v1341_v14 = vpop.f32.mrf.mxu3 }
 0x219   :  { %v1342_v16 = vadd.f32 %v1341_v14, %v1302_v5  ;;  %v1393_v17 = vpop.f32.mrf.mxu2  ;;  %v6501_v2 = vadd.f32 %v6148_v25, %v375_v50  ;;  %v3153_v5 = vld [vmem:[%s7700_s9 + $0x50] sm:$0xff]  ;;  %v1312_v14 = vperm.slane %v6471_v21, 2 }
 0x21a   :  { %v1394_v28 = vadd.f32 %v1393_v17, %v1306_v8  ;;  %v1356_v33 = vpop.f32.mrf.mxu0  ;;  %v6511_v8 = vadd.f32 %v6490_v23, %v6369_v26  ;;  %v3152_v26 = vld [vmem:[%s7700_s9 + $0x48] sm:$0xff]  ;;  %v3151_v17 = vld [vmem:[%s7700_s9 + $0x40] sm:$0xff] }
 0x21b   :  { %3116 = vmatpush.bf16.msra.mxu0 %v5502_v53  ;;  %v4539_v36 = vmul.f32 -1.442695, %v1342_v16  ;;  %v1382_v37 = vpop.f32.mrf.mxu1  ;;  %v5393_v53 = vld [vmem:[%s7710_s16 + $0x38] sm:$0xff]  ;;  %v5399_v33 = vld [vmem:[%s7709_s17 + $0x28] sm:$0xff] }
 0x21c   :  { %v4543_v44 = vmul.f32 -1.442695, %v1394_v28  ;;  %1862 = vmatpush.bf16.msrb.mxu3 %v5393_v53 }
 0x21d   :  { %v5554_v46 = vpop.eup %5553  ;;  %5557 = vpow2.f32 %v4539_v36 }
 0x21e   :  { %v5556_v48 = vpop.eup %5555  ;;  %v6477_v51 = vadd.f32 1.0, %v5554_v46  ;;  %5559 = vpow2.f32 %v4543_v44  ;;  %v5392_v44 = vld [vmem:[%s7710_s16 + $0x30] sm:$0xff] }
 0x21f   :  { %3117 = vmatpush.bf16.msra.mxu0 %v5501_v60  ;;  %v6484_v55 = vadd.f32 1.0, %v5556_v48  ;;  %v3154_v60 = vld [vmem:[%s7700_s9 + $0x58] sm:$0xff] }
 0x220   :  { %5561 = vrcp.f32 %v6477_v51  ;;  %v1577_v28 = vand.u32 2147483647, %v6477_v51  ;;  %1863 = vmatpush.bf16.msrb.mxu3 %v5392_v44  ;;  %vm1573_vm2 = vweird.f32 %v6477_v51 }
 0x221   :  { %5563 = vrcp.f32 %v6484_v55  ;;  %v1395_v29 = vpop.f32.mrf.mxu2  ;;  %v1609_v19 = vand.u32 2147483648, %v6484_v55  ;;  %v1607_v50 = vand.u32 2147483647, %v6484_v55 }
 0x222   :  { %v1445_v62 = vpop.f32.mrf.mxu0  ;;  %vm6574_vm3 = vcmp.eq.f32.partialorder %v1577_v28, 8.507059e+37 }
 0x223   :  { %3118 = vmatpush.bf16.msra.mxu0 %v5500_v9  ;;  %v5558_v63 = vpop.eup %5557  ;;  %v1419_v4 = vpop.f32.mrf.mxu1 }
 0x224   :  { %v5560_v7 = vpop.eup %5559  ;;  %v6517_v25 = vadd.f32 1.0, %v5558_v63  ;;  %v1420_v31 = vadd.f32 %v1419_v4, %v1308_v59  ;;  %v6567_v59 = vor.u32 1.1754944e-38, %v1609_v19 }
 0x225   :  { %v6519_v9 = vadd.f32 1.0, %v5560_v7 }
 0x226   :  { %3119 = vmatmul.bf16.vlgmr.msra.gmra.mxu0 %v5498_v18  ;;  %v6526_v12 = vpop.eup %5561  ;;  %5565 = vrcp.f32 %v6517_v25  ;;  %v4545_v13 = vmul.f32 -1.442695, %v1420_v31  ;;  %v3139_v18 = vrot.slane %v3138_v6, 2  ;;  %v3148_v31 = vld [vmem:[%s7700_s9 + $0x28] sm:$0xff]  ;;  %v1562_v19 = vand.u32 2147483647, %v6517_v25 }
 0x227   :  { %3160 = vmatpush.msrb.mxu0 %v6075_v58  ;;  %v5400_v58 = vld [vmem:[%s7709_s17 + $0x30] sm:$0xff]  ;;  %v6531_v15 = vpop.eup %5563  ;;  %v1569_v16 = vmul.f32 %v6526_v12, %v6477_v51  ;;  %5567 = vrcp.f32 %v6519_v9  ;;  %vm1574_vm4 = vweird.f32 %v6526_v12  ;;  %vm1618_vm5 = vweird.f32 %v6519_v9 }
 0x228   :  { %2015 = vmatpush.bf16.msrb.mxu2 %v5400_v58  ;;  %5569 = vpow2.f32 %v4545_v13  ;;  %v6548_v36 = vmul.f32 %v6531_v15, %v6484_v55  ;;  %vm1558_vm7 = vweird.f32 %v6517_v25  ;;  %vm6624_vm8 = vmor %vm1573_vm2, %vm1574_vm4  ;;  %vm6647_vm11 = vcmp.eq.f32.partialorder %v1562_v19, 8.507059e+37 }
 0x229   :  { %3161 = vmatpush.msrb.mxu0 %v6086_v61  ;;  %v1343_v61 = vpop.f32.mrf.mxu3  ;;  %v1570_v35 = vsub.f32 1.0, %v1569_v16  ;;  %v1432_v38 = vpop.f32.mrf.mxu2 }
 0x22a   :  { %v1433_v46 = vadd.f32 %v1432_v38, %v1309_v22  ;;  %v1447_v58 = vpop.f32.mrf.mxu0  ;;  %v3140_v61 = vadd.f32 %v3139_v18, %v3138_v6  ;;  %v1600_v6 = vsub.f32 1.0, %v6548_v36  ;;  %v3147_v18 = vld [vmem:[%s7700_s9 + $0x20] sm:$0xff] }
 0x22b   :  { %3162 = vmatpush.msrb.mxu0 %v6092_v0  ;;  %v1446_v0 = vadd.f32 %v1445_v62, %v1310_v56  ;;  %v1571_v53 = vmul.f32 %v6526_v12, %v1570_v35  ;;  %v1421_v56 = vpop.f32.mrf.mxu1  ;;  %v1624_v62 = vand.u32 2147483648, %v6519_v9  ;;  %v5390_v58 = vld [vmem:[%s7710_s16 + $0x20] sm:$0xff] }
 0x22c   :  { %2016 = vmatpush.bf16.msrb.mxu2 %v5399_v33  ;;  %v6569_v29 = vpop.eup %5565  ;;  %v4546_v63 = vmul.f32 -1.442695, %v1433_v46 }
 0x22d   :  { %3163 = vmatpush.msrb.mxu0 %v6099_v1  ;;  %v6515_v1 = vadd.f32 %v6490_v23, %v6380_v34  ;;  %v4547_v10 = vmul.f32 -1.442695, %v1446_v0  ;;  %v1579_v34 = vand.u32 2147483648, %v6477_v51  ;;  %v5398_v0 = vld [vmem:[%s7709_s17 + $0x20] sm:$0xff]  ;;  %v1554_v7 = vmul.f32 %v6569_v29, %v6517_v25 }
 0x22e   :  { %v1625_v38 = vor.u32 1.1754944e-38, %v1624_v62  ;;  %vm1559_vm10 = vweird.f32 %v6569_v29 }
 0x22f   :  { %3164 = vmatpush.msrb.mxu0 %v3154_v60  ;;  %5571 = vpow2.f32 %v4547_v10  ;;  %v6560_v48 = vor.u32 1.1754944e-38, %v1579_v34  ;;  %v1622_v60 = vand.u32 2147483647, %v6519_v9  ;;  %v1564_v10 = vand.u32 2147483648, %v6517_v25 }
 0x230   :  { %v1572_v34 = vadd.f32 %v6526_v12, %v1571_v53  ;;  %2017 = vmatpush.bf16.msrb.mxu2 %v5398_v0  ;;  %v1555_v16 = vsub.f32 1.0, %v1554_v7  ;;  %v6632_v53 = vmul.f32 %v6531_v15, %v1600_v6  ;;  %v3145_v0 = vld [vmem:[%s7700_s9 + $0x10] sm:$0xff] }
 0x231   :  { %3165 = vmatpush.msrb.mxu0 %v3153_v5  ;;  %v1367_v20 = vpop.f32.mrf.mxu3  ;;  %v6581_v5 = vpop.eup %5567  ;;  %vm6604_vm6 = vcmp.eq.f32.partialorder %v1622_v60, 8.507059e+37  ;;  %v6618_v44 = vor.u32 1.1754944e-38, %v1564_v10 }
 0x232   :  { %v1368_v37 = vadd.f32 %v1367_v20, %v1304_v11  ;;  %v5391_v11 = vld [vmem:[%s7710_s16 + $0x28] sm:$0xff]  ;;  %v5570_v22 = vpop.eup %5569  ;;  %v3141_v20 = vrot.slane %v3140_v61, 1  ;;  %vm1619_vm9 = vweird.f32 %v6581_v5  ;;  %v1497_v56 = vpop.f32.mrf.mxu0  ;;  %v1576_v51 = vsel %vm6624_vm8, %v6526_v12, %v1572_v34 }
 0x233   :  { %3166 = vmatpush.msrb.mxu0 %v3152_v26  ;;  %v1614_v26 = vmul.f32 %v6581_v5, %v6519_v9  ;;  %1864 = vmatpush.bf16.msrb.mxu3 %v5391_v11  ;;  %v1556_v60 = vmul.f32 %v6569_v29, %v1555_v16  ;;  %v1471_v62 = vpop.f32.mrf.mxu1  ;;  %vm1620_vm12 = vmor %vm1618_vm5, %vm1619_vm9  ;;  %v5389_v16 = vld [vmem:[%s7710_s16 + $0x18] sm:$0xff]  ;;  %vm1604_vm9 = vweird.f32 %v6531_v15 }
 0x234   :  { %v4541_v54 = vmul.f32 -1.442695, %v1368_v37  ;;  %v5397_v37 = vld [vmem:[%s7709_s17 + $0x18] sm:$0xff]  ;;  %v6651_v7 = vadd.f32 %v3141_v20, %v3140_v61 }
 0x235   :  { %3167 = vmatpush.msrb.mxu0 %v3151_v17  ;;  %v5572_v13 = vpop.eup %5571  ;;  %v6597_v17 = vadd.f32 1.0, %v5570_v22  ;;  %v1615_v28 = vsub.f32 1.0, %v1614_v26  ;;  %2018 = vmatpush.bf16.msrb.mxu2 %v5397_v37  ;;  %v5396_v22 = vld [vmem:[%s7709_s17 + $0x10] sm:$0xff] }
 0x236   :  { %5573 = vpow2.f32 %v4541_v54  ;;  %3124 = vmatmul.bf16.gmra.mxu0 %v5499_v39  ;;  %v6608_v35 = vadd.f32 1.0, %v5572_v13  ;;  %v1434_v39 = vpop.f32.mrf.mxu2  ;;  %v6672_v13 = vsel %vm6574_vm3, %v6560_v48, %v1576_v51  ;;  %vm1560_vm3 = vmor %vm1558_vm7, %vm1559_vm10 }
 0x237   :  { %3168 = vmatpush.msrb.mxu0 %v3150_v43  ;;  %5575 = vpow2.f32 %v4546_v63  ;;  %v3146_v43 = vld [vmem:[%s7700_s9 + $0x18] sm:$0xff]  ;;  %v1616_v54 = vmul.f32 %v6581_v5, %v1615_v28  ;;  %v1498_v63 = vadd.f32 %v1497_v56, %v1314_v24  ;;  %1865 = vmatpush.bf16.msrb.mxu3 %v5390_v58  ;;  %v1652_v10 = vand.u32 2147483647, %v6597_v17 }
 0x238   :  { %5577 = vrcp.f32 %v6597_v17  ;;  %v1472_v24 = vadd.f32 %v1471_v62, %v1312_v14  ;;  %v1654_v61 = vand.u32 2147483648, %v6597_v17  ;;  %v3144_v14 = vld [vmem:[%s7700_s9 + $0x8] sm:$0xff]  ;;  %v1684_v20 = vand.u32 2147483648, %v6608_v35 }
 0x239   :  { %3169 = vmatpush.msrb.mxu0 %v3149_v57  ;;  %v1369_v36 = vpop.f32.mrf.mxu3  ;;  %5579 = vrcp.f32 %v6608_v35  ;;  %v4551_v34 = vmul.f32 -1.442695, %v1498_v63  ;;  %2019 = vmatpush.bf16.msrb.mxu2 %v5396_v22  ;;  %v1557_v28 = vadd.f32 %v6569_v29, %v1556_v60  ;;  %vm1648_vm13 = vweird.f32 %v6597_v17 }
 0x23a   :  { %v4549_v19 = vmul.f32 -1.442695, %v1472_v24  ;;  %vm1678_vm14 = vweird.f32 %v6608_v35  ;;  %vm6694_vm15 = vcmp.eq.f32.partialorder %v1652_v10, 8.507059e+37  ;;  %v1655_v39 = vor.u32 1.1754944e-38, %v1654_v61 }
 0x23b   :  { %3170 = vmatpush.msrb.mxu0 %v3148_v31  ;;  %v1617_v31 = vadd.f32 %v6581_v5, %v1616_v54  ;;  %1866 = vmatpush.bf16.msrb.mxu3 %v5389_v16  ;;  %v1685_v62 = vor.u32 1.1754944e-38, %v1684_v20  ;;  %v1473_v63 = vpop.f32.mrf.mxu1 }
 0x23c   :  { %v5574_v57 = vpop.eup %5573 }
 0x23d   :  { %3171 = vmatpush.msrb.mxu0 %v3147_v18  ;;  %v5576_v12 = vpop.eup %5575  ;;  %v6655_v11 = vadd.f32 1.0, %v5574_v57  ;;  %v1621_v9 = vsel %vm1620_vm12, %v6581_v5, %v1617_v31  ;;  %v1682_v18 = vand.u32 2147483647, %v6608_v35  ;;  %v3143_v5 = vld [vmem:[%s7700_s9] sm:$0xff]  ;;  %v1499_v57 = vpop.f32.mrf.mxu0 }
 0x23e   :  { %v6667_v26 = vadd.f32 1.0, %v5576_v12  ;;  %v5578_v4 = vpop.eup %5577  ;;  %v1626_v48 = vsel %vm6604_vm6, %v1625_v38, %v1621_v9  ;;  %v1484_v46 = vpop.f32.mrf.mxu2 }
 0x23f   :  { %3172 = vmatpush.msrb.mxu0 %v3146_v43  ;;  %5581 = vrcp.f32 %v6655_v11  ;;  %v5580_v36 = vpop.eup %5579  ;;  %1748 = vst [vmem:[#allocation2] sm:$0x1] %v1626_v48  ;;  %v1644_v37 = vmul.f32 %v5578_v4, %v6597_v17  ;;  %vm6699_vm2 = vcmp.eq.f32.partialorder %v1682_v18, 8.507059e+37  ;;  %v1485_v51 = vadd.f32 %v1484_v46, %v1313_v30 }
 0x240   :  { %5583 = vrcp.f32 %v6667_v26  ;;  %v1674_v43 = vmul.f32 %v5580_v36, %v6608_v35  ;;  %vm1649_vm4 = vweird.f32 %v5578_v4  ;;  %vm1679_vm5 = vweird.f32 %v5580_v36 }
 0x241   :  { %3173 = vmatpush.msrb.mxu0 %v3145_v0  ;;  %5585 = vpow2.f32 %v4549_v19  ;;  %v1406_v33 = vpop.f32.mrf.mxu3  ;;  %v1645_v58 = vsub.f32 1.0, %v1644_v37  ;;  %v1561_v0 = vsel %vm1560_vm3, %v6569_v29, %v1557_v28  ;;  %v4550_v31 = vmul.f32 -1.442695, %v1485_v51  ;;  %vm1650_vm6 = vmor %vm1648_vm13, %vm1649_vm4 }
 0x242   :  { %5587 = vpow2.f32 %v4551_v34  ;;  %v1407_v56 = vadd.f32 %v1406_v33, %v1307_v27  ;;  %v1675_v60 = vsub.f32 1.0, %v1674_v43  ;;  %v1566_v30 = vsel %vm6647_vm11, %v6618_v44, %v1561_v0  ;;  %vm1680_vm7 = vmor %vm1678_vm14, %vm1679_vm5 }
 0x243   :  { %3174 = vmatpush.msrb.mxu0 %v3144_v14  ;;  %v1646_v52 = vmul.f32 %v5578_v4, %v1645_v58  ;;  %v1669_v25 = vand.u32 2147483648, %v6667_v26  ;;  %v1757_v22 = vperm.slane %v1566_v30, 0  ;;  %v1759_v14 = vperm.slane %v6672_v13, 0 }
 0x244   :  { %v4544_v27 = vmul.f32 -1.442695, %v1407_v56  ;;  %v1676_v24 = vmul.f32 %v5580_v36, %v1675_v60  ;;  %v1667_v28 = vand.u32 2147483647, %v6667_v26  ;;  %vm1663_vm10 = vweird.f32 %v6667_v26 }
 0x245   :  { %3175 = vmatpush.msrb.mxu0 %v3143_v5  ;;  %v6712_v12 = vpop.eup %5581  ;;  %v1647_v34 = vadd.f32 %v5578_v4, %v1646_v52  ;;  %v1758_v13 = vmul.f32 %v1757_v22, %v6501_v2  ;;  %v1760_v37 = vmul.f32 %v1759_v14, %v6501_v2  ;;  %v1670_v43 = vor.u32 1.1754944e-38, %v1669_v25  ;;  %v5395_v22 = vld [vmem:[%s7709_s17 + $0x8] sm:$0xff] }
 0x246   :  { %v5584_v10 = vpop.eup %5583  ;;  %3176 = vmatmul.f32.vlgmr.msrb.gmra.mxu0 %v6651_v7  ;;  %5589 = vpow2.f32 %v4544_v27  ;;  %v1677_v44 = vadd.f32 %v5580_v36, %v1676_v24  ;;  %v1584_v9 = vmul.f32 %v6712_v12, %v6655_v11  ;;  %v1486_v5 = vpop.f32.mrf.mxu2  ;;  %vm1603_vm11 = vweird.f32 %v6484_v55  ;;  %2020 = vmatpush.bf16.msrb.mxu2 %v5395_v22  ;;  %v5428_v55 = vld [vmem:[%s7722_s20 + $0xd0] sm:$0xff] }
 0x247   :  { %v5586_v61 = vpop.eup %5585  ;;  %v1659_v29 = vmul.f32 %v5584_v10, %v6667_v26  ;;  %5591 = vpow2.f32 %v4550_v31  ;;  %v1651_v7 = vsel %vm1650_vm6, %v5578_v4, %v1647_v34  ;;  %vm1664_vm8 = vweird.f32 %v5584_v10  ;;  %v5433_v5 = vld [vmem:[%s7722_s20 + $0xf8] sm:$0xff] }
 0x248   :  { %v5588_v16 = vpop.eup %5587  ;;  %v6724_v6 = vadd.f32 1.0, %v5586_v61  ;;  %v1656_v17 = vsel %vm6694_vm15, %v1655_v39, %v1651_v7  ;;  %v1681_v20 = vsel %vm1680_vm7, %v5580_v36, %v1677_v44  ;;  %v1585_v33 = vsub.f32 1.0, %v1584_v9  ;;  %vm1665_vm12 = vmor %vm1663_vm10, %vm1664_vm8  ;;  %v6788_v61 = vpop.f32.mrf.mxu0 }
 0x249   :  { %v1660_v18 = vsub.f32 1.0, %v1659_v29  ;;  %v6731_v19 = vadd.f32 1.0, %v5588_v16  ;;  %v1408_v48 = vpop.f32.mrf.mxu3  ;;  %1750 = vst [vmem:[#allocation2 + $0x2] sm:$0x1] %v1656_v17  ;;  %v1686_v35 = vsel %vm6699_vm2, %v1685_v62, %v1681_v20  ;;  %v6744_v36 = vadd.f32 %v6531_v15, %v6632_v53 }
 0x24a   :  { %5593 = vrcp.f32 %v6724_v6  ;;  %1752 = vst [vmem:[#allocation2 + $0x4] sm:$0x1] %v1686_v35  ;;  %v1778_v46 = vpack.c.bf16 %v1760_v37, %v1758_v13  ;;  %v1712_v54 = vand.u32 2147483647, %v6724_v6  ;;  %v1714_v56 = vand.u32 2147483648, %v6724_v6  ;;  %v5387_v13 = vld [vmem:[%s7710_s16 + $0x8] sm:$0xff] }
 0x24b   :  { %v1661_v4 = vmul.f32 %v5584_v10, %v1660_v18  ;;  %5595 = vrcp.f32 %v6731_v19  ;;  %v1744_v51 = vand.u32 2147483648, %v6731_v19  ;;  %vm1668_vm13 = vcmp.eq.f32.partialorder %v1667_v28, 8.507059e+37  ;;  %v5394_v18 = vld [vmem:[%s7709_s17] sm:$0xff] }
 0x24c   :  { %v5590_v38 = vpop.eup %5589  ;;  %v1742_v60 = vand.u32 2147483647, %v6731_v19  ;;  %1937 = vmatmul.bf16.vlgmr.msrb.gmra.mxu1 %v1778_v46  ;;  %v1311_v0 = vperm.slane %v6471_v21, 1  ;;  %v1586_v52 = vmul.f32 %v6712_v12, %v1585_v33  ;;  %vm1708_vm14 = vweird.f32 %v6724_v6  ;;  %2021 = vmatpush.bf16.msrb.mxu2 %v5394_v18  ;;  %v5416_v18 = vld [vmem:[%s7722_s20 + $0x70] sm:$0xff] }
 0x24d   :  { %v1662_v39 = vadd.f32 %v5584_v10, %v1661_v4  ;;  %v5592_v58 = vpop.eup %5591  ;;  %v6752_v53 = vadd.f32 1.0, %v5590_v38  ;;  %vm1738_vm15 = vweird.f32 %v6731_v19  ;;  %vm6769_vm2 = vcmp.eq.f32.partialorder %v1607_v50, 8.507059e+37  ;;  %v5388_v50 = vld [vmem:[%s7710_s16 + $0x10] sm:$0xff] }
 0x24e   :  { %v6755_v62 = vadd.f32 1.0, %v5592_v58  ;;  %vm6775_vm3 = vcmp.eq.f32.partialorder %v1712_v54, 8.507059e+37  ;;  %v1715_v24 = vor.u32 1.1754944e-38, %v1714_v56  ;;  %v6779_v25 = vor.u32 1.1754944e-38, %v1744_v51  ;;  %1867 = vmatpush.bf16.msrb.mxu3 %v5388_v50  ;;  %v5413_v56 = vld [vmem:[%s7722_s20 + $0x58] sm:$0xff] }
 0x24f   :  { %v1666_v57 = vsel %vm1665_vm12, %v5584_v10, %v1662_v39  ;;  %5597 = vrcp.f32 %v6752_v53  ;;  %vm1588_vm4 = vweird.f32 %v6655_v11  ;;  %vm6792_vm5 = vcmp.eq.f32.partialorder %v1742_v60, 8.507059e+37  ;;  %vm6823_vm12 = vmor %vm1603_vm11, %vm1604_vm9  ;;  %v5425_v39 = vld [vmem:[%s7722_s20 + $0xb8] sm:$0xff] }
 0x250   :  { %v6757_v26 = vpop.eup %5593  ;;  %v1671_v63 = vsel %vm1668_vm13, %v1670_v43, %v1666_v57  ;;  %5599 = vrcp.f32 %v6755_v62  ;;  %v1637_v16 = vand.u32 2147483647, %v6752_v53  ;;  %vm1589_vm6 = vweird.f32 %v6712_v12  ;;  %2369 = vmatpush.bf16.msra.mxu2 %v5433_v5  ;;  %2356 = vmatpush.bf16.msra.mxu1 %v5425_v39  ;;  %v2341_v50 = vpop.f32.mrf.mxu0 }
 0x251   :  { %1751 = vst [vmem:[#allocation2 + $0x3] sm:$0x1] %v1671_v63  ;;  %v1704_v27 = vmul.f32 %v6757_v26, %v6724_v6  ;;  %v1458_v31 = vpop.f32.mrf.mxu3  ;;  %v6773_v21 = vpop.eup %5595  ;;  %vm1709_vm7 = vweird.f32 %v6757_v26  ;;  %v1639_v44 = vand.u32 2147483648, %v6752_v53  ;;  %v1587_v7 = vadd.f32 %v6712_v12, %v1586_v52  ;;  %vm6844_vm9 = vmor %vm1588_vm4, %vm1589_vm6  ;;  %v5426_v50 = vld [vmem:[%s7722_s20 + $0xc0] sm:$0xff] }
 0x252   :  { %v1734_v29 = vmul.f32 %v6773_v21, %v6731_v19  ;;  %v1459_v9 = vadd.f32 %v1458_v31, %v1311_v0  ;;  %vm1633_vm8 = vweird.f32 %v6752_v53  ;;  %v1727_v20 = vand.u32 2147483647, %v6755_v62  ;;  %vm6856_vm11 = vmor %vm1708_vm14, %vm1709_vm7  ;;  %1868 = vmatpush.bf16.msrb.mxu3 %v5387_v13  ;;  %v5431_v13 = vld [vmem:[%s7722_s20 + $0xe8] sm:$0xff] }
 0x253   :  { %v1705_v34 = vsub.f32 1.0, %v1704_v27  ;;  %v1594_v28 = vand.u32 2147483648, %v6655_v11  ;;  %vm1739_vm10 = vweird.f32 %v6773_v21  ;;  %v1729_v4 = vand.u32 2147483648, %v6755_v62  ;;  %v5417_v27 = vld [vmem:[%s7722_s20 + $0x78] sm:$0xff] }
 0x254   :  { %v1735_v17 = vsub.f32 1.0, %v1734_v29  ;;  %v4548_v37 = vmul.f32 -1.442695, %v1459_v9  ;;  %v1592_v33 = vand.u32 2147483647, %v6655_v11  ;;  %vm6836_vm13 = vcmp.eq.f32.partialorder %v1637_v16, 8.507059e+37  ;;  %vm1740_vm14 = vmor %vm1738_vm15, %vm1739_vm10 }
 0x255   :  { %v1706_v48 = vmul.f32 %v6757_v26, %v1705_v34  ;;  %v6814_v35 = vpop.eup %5597  ;;  %v1606_v51 = vsel %vm6823_vm12, %v6531_v15, %v6744_v36  ;;  %v1591_v60 = vsel %vm6844_vm9, %v6712_v12, %v1587_v7  ;;  %v5386_v15 = vld [vmem:[%s7710_s16] sm:$0xff]  ;;  %v1595_v0 = vor.u32 1.1754944e-38, %v1594_v28  ;;  %v5432_v12 = vld [vmem:[%s7722_s20 + $0xf0] sm:$0xff] }
 0x256   :  { %v6830_v43 = vpop.eup %5599  ;;  %v1736_v58 = vmul.f32 %v6773_v21, %v1735_v17  ;;  %v1629_v54 = vmul.f32 %v6814_v35, %v6752_v53  ;;  %vm1634_vm1 = vweird.f32 %v6814_v35  ;;  %5601 = vpow2.f32 %v4548_v37  ;;  %v5424_v34 = vld [vmem:[%s7722_s20 + $0xb0] sm:$0xff]  ;;  %1869 = vmatpush.bf16.msrb.mxu3 %v5386_v15  ;;  %2370 = vmatpush.bf16.msra.mxu2 %v5432_v12 }
 0x257   :  { %v1707_v46 = vadd.f32 %v6757_v26, %v1706_v48  ;;  %v1719_v11 = vmul.f32 %v6830_v43, %v6755_v62  ;;  %vm1593_vm4 = vcmp.eq.f32.partialorder %v1592_v33, 8.507059e+37  ;;  %v1611_v22 = vsel %vm6769_vm2, %v6567_v59, %v1606_v51  ;;  %2357 = vmatpush.bf16.msra.mxu1 %v5424_v34  ;;  %v5420_v15 = vld [vmem:[%s7722_s20 + $0x90] sm:$0xff] }
 0x258   :  { %v1737_v36 = vadd.f32 %v6773_v21, %v1736_v58  ;;  %v1630_v63 = vsub.f32 1.0, %v1629_v54  ;;  %v1596_v29 = vsel %vm1593_vm4, %v1595_v0, %v1591_v60  ;;  %v1763_v16 = vperm.slane %v1611_v22, 0  ;;  %v5411_v22 = vld [vmem:[%s7722_s20 + $0x48] sm:$0xff] }
 0x259   :  { %v1711_v6 = vsel %vm6856_vm11, %v6757_v26, %v1707_v46  ;;  %v1460_v52 = vpop.f32.mrf.mxu3  ;;  %v1720_v26 = vsub.f32 1.0, %v1719_v11  ;;  %vm1724_vm15 = vweird.f32 %v6830_v43  ;;  %v1761_v9 = vperm.slane %v1596_v29, 0  ;;  %v5429_v46 = vld [vmem:[%s7722_s20 + $0xd8] sm:$0xff] }
 0x25a   :  { %v1716_v31 = vsel %vm6775_vm3, %v1715_v24, %v1711_v6  ;;  %v1741_v10 = vsel %vm1740_vm14, %v6773_v21, %v1737_v36  ;;  %v1631_v24 = vmul.f32 %v6814_v35, %v1630_v63  ;;  %v1640_v7 = vor.u32 1.1754944e-38, %v1639_v44  ;;  %2343 = vmatpush.bf16.msra.mxu3 %v5417_v27  ;;  %vm1635_vm3 = vmor %vm1633_vm8, %vm1634_vm1  ;;  %2371 = vmatpush.bf16.msra.mxu2 %v5431_v13  ;;  %v5463_v13 = vld [vmem:[%s7724_s27 + $0xe8] sm:$0xff] }
 0x25b   :  { %1754 = vst [vmem:[#allocation2 + $0x6] sm:$0x1] %v1716_v31  ;;  %v1721_v19 = vmul.f32 %v6830_v43, %v1720_v26  ;;  %v1746_v59 = vsel %vm6792_vm5, %v6779_v25, %v1741_v10  ;;  %vm1723_vm2 = vweird.f32 %v6755_v62  ;;  %v1730_v44 = vor.u32 1.1754944e-38, %v1729_v4  ;;  %v5423_v4 = vld [vmem:[%s7722_s20 + $0xa8] sm:$0xff] }
 0x25c   :  { %v1632_v30 = vadd.f32 %v6814_v35, %v1631_v24  ;;  %v6900_v21 = vperm.slane %v1746_v59, 0  ;;  %v5602_v14 = vpop.eup %5601  ;;  %v1762_v48 = vmul.f32 %v1761_v9, %v6501_v2  ;;  %v1764_v17 = vmul.f32 %v1763_v16, %v6501_v2  ;;  %vm1725_vm5 = vmor %vm1723_vm2, %vm1724_vm15  ;;  %2358 = vmatpush.bf16.msra.mxu1 %v5423_v4  ;;  %v5418_v24 = vld [vmem:[%s7722_s20 + $0x80] sm:$0xff]  ;;  %v5457_v16 = vld [vmem:[%s7724_s27 + $0xb8] sm:$0xff] }
 0x25d   :  { %v1722_v25 = vadd.f32 %v6830_v43, %v1721_v19  ;;  %v1549_v5 = vadd.f32 1.0, %v5602_v14  ;;  %vm1728_vm1 = vcmp.eq.f32.partialorder %v1727_v20, 8.507059e+37  ;;  %v979_v62 = vadd.f32 %v6156_v32, %v6504_v3  ;;  %v5422_v20 = vld [vmem:[%s7722_s20 + $0xa0] sm:$0xff]  ;;  %v5421_v32 = vld [vmem:[%s7722_s20 + $0x98] sm:$0xff]  ;;  %v5464_v9 = vld [vmem:[%s7724_s27 + $0xf0] sm:$0xff] }
 0x25e   :  { %v1636_v28 = vsel %vm1635_vm3, %v6814_v35, %v1632_v30  ;;  %v1774_v37 = vmul.f32 %v6900_v21, %v6511_v8  ;;  %v1775_v53 = vmul.f32 %v6900_v21, %v6515_v1  ;;  %v1779_v35 = vpack.c.bf16 %v1764_v17, %v1762_v48  ;;  %2344 = vmatpush.bf16.msra.mxu3 %v5416_v18  ;;  %v5415_v8 = vld [vmem:[%s7722_s20 + $0x68] sm:$0xff]  ;;  %v5430_v1 = vld [vmem:[%s7722_s20 + $0xe0] sm:$0xff]  ;;  %v5449_v14 = vld [vmem:[%s7724_s27 + $0x78] sm:$0xff] }
 0x25f   :  { %v1641_v2 = vsel %vm6836_vm13, %v1640_v7, %v1636_v28  ;;  %v1726_v33 = vsel %vm1725_vm5, %v6830_v43, %v1722_v25  ;;  %5603 = vrcp.f32 %v1549_v5  ;;  %v5414_v43 = vld [vmem:[%s7722_s20 + $0x60] sm:$0xff]  ;;  %2372 = vmatpush.bf16.msra.mxu2 %v5430_v1  ;;  %v992_v54 = vadd.f32 %v6172_v42, %v979_v62  ;;  %v5448_v17 = vld [vmem:[%s7724_s27 + $0x70] sm:$0xff]  ;;  %v4649_v28 = vld [vmem:[%s7723_s21 + $0x18] sm:$0xff] }
 0x260   :  { %1749 = vst [vmem:[#allocation2 + $0x1] sm:$0x1] %v1641_v2  ;;  %v1731_v38 = vsel %vm1728_vm1, %v1730_v44, %v1726_v33  ;;  %1942 = vmatmul.bf16.gmra.mxu1 %v1779_v35  ;;  %v1948_v39 = vpack.c.bf16 %v1775_v53, %v1774_v37  ;;  %v1133_v11 = vadd.f32 %v6490_v23, %v6394_v40  ;;  %v1699_v60 = vand.u32 2147483648, %v1549_v5  ;;  %v5427_v40 = vld [vmem:[%s7722_s20 + $0xc8] sm:$0xff]  ;;  %v5410_v19 = vld [vmem:[%s7722_s20 + $0x40] sm:$0xff]  ;;  %v5461_v53 = vld [vmem:[%s7724_s27 + $0xd8] sm:$0xff] }
 0x261   :  { %1755 = vst [vmem:[#allocation2 + $0x7] sm:$0x1] %v1731_v38  ;;  %2359 = vmatpush.bf16.msra.mxu1 %v5422_v20  ;;  %v1005_v42 = vadd.f32 %v6170_v41, %v992_v54  ;;  %v1135_v6 = vadd.f32 %v6490_v23, %v6408_v49  ;;  %v1697_v63 = vand.u32 2147483647, %v1549_v5  ;;  %v5412_v41 = vld [vmem:[%s7722_s20 + $0x50] sm:$0xff]  ;;  %vm1693_vm7 = vweird.f32 %v1549_v5  ;;  %v5419_v23 = vld [vmem:[%s7722_s20 + $0x88] sm:$0xff] }
 0x262   :  { %2022 = vmatmul.bf16.vlgmr.msrb.gmra.mxu2 %v1948_v39  ;;  %2345 = vmatpush.bf16.msra.mxu3 %v5415_v8  ;;  %v1776_v52 = vmul.f32 %v6900_v21, %v1133_v11  ;;  %v1700_v49 = vor.u32 1.1754944e-38, %v1699_v60  ;;  %v5455_v44 = vld [vmem:[%s7724_s27 + $0xa8] sm:$0xff]  ;;  %v5462_v48 = vld [vmem:[%s7724_s27 + $0xe0] sm:$0xff]  ;;  %v2129_v37 = vunpack.c.h.b16 %v4649_v28  ;;  %v5453_v33 = vld [vmem:[%s7724_s27 + $0x98] sm:$0xff]  ;;  %v2128_v35 = vunpack.c.l.b16 %v4649_v28 }
 0x263   :  { %2373 = vmatpush.bf16.msra.mxu2 %v5429_v46  ;;  %v6957_v51 = vpop.f32.mrf.mxu0  ;;  %v1777_v27 = vmul.f32 %v6900_v21, %v1135_v6  ;;  %v1018_v12 = vadd.f32 %v6180_v45, %v1005_v42  ;;  %vm1698_vm10 = vcmp.eq.f32.partialorder %v1697_v63, 8.507059e+37  ;;  %v5465_v45 = vld [vmem:[%s7724_s27 + $0xf8] sm:$0xff]  ;;  %v5447_v2 = vld [vmem:[%s7724_s27 + $0x68] sm:$0xff]  ;;  %v5460_v39 = vld [vmem:[%s7724_s27 + $0xd0] sm:$0xff] }
 0x264   :  { %v2133_v4 = vpack.c.b16 %v2129_v37, %v2129_v37  ;;  %v2132_v62 = vpack.c.b16 %v2128_v35, %v2128_v35  ;;  %v5446_v20 = vld [vmem:[%s7724_s27 + $0x60] sm:$0xff]  ;;  %v5459_v54 = vld [vmem:[%s7724_s27 + $0xc8] sm:$0xff]  ;;  %v5444_v42 = vld [vmem:[%s7724_s27 + $0x50] sm:$0xff] }
 0x265   :  { %v5604_v58 = vpop.eup %5603  ;;  %2360 = vmatpush.bf16.msra.mxu1 %v5421_v32  ;;  %v1949_v10 = vpack.c.bf16 %v1777_v27, %v1776_v52  ;;  %v1031_v29 = vadd.f32 %v6185_v47, %v1018_v12  ;;  %v5456_v47 = vld [vmem:[%s7724_s27 + $0xb0] sm:$0xff]  ;;  %v5445_v32 = vld [vmem:[%s7724_s27 + $0x58] sm:$0xff]  ;;  %v5450_v60 = vld [vmem:[%s7724_s27 + $0x80] sm:$0xff] }
 0x266   :  { %v1689_v3 = vmul.f32 %v5604_v58, %v1549_v5  ;;  %2346 = vmatpush.bf16.msra.mxu3 %v5414_v43  ;;  %vm1694_vm6 = vweird.f32 %v5604_v58  ;;  %v5454_v5 = vld [vmem:[%s7724_s27 + $0xa0] sm:$0xff]  ;;  %v5497_v11 = vld [vmem:[%s7724_s27 + $0x1f8] sm:$0xff]  ;;  %v5496_v63 = vld [vmem:[%s7724_s27 + $0x1f0] sm:$0xff] }
 0x267   :  { %2374 = vmatpush.bf16.msra.mxu2 %v5428_v55  ;;  %vm1695_vm8 = vmor %vm1693_vm7, %vm1694_vm6  ;;  %v1765_v59 = vperm.slane %v1031_v29, 0  ;;  %v1767_v30 = vperm.slane %v1031_v29, 1  ;;  %v1769_v38 = vperm.slane %v1031_v29, 2  ;;  %v1771_v8 = vperm.slane %v1031_v29, 3  ;;  %v5442_v52 = vld [vmem:[%s7724_s27 + $0x40] sm:$0xff]  ;;  %v5495_v27 = vld [vmem:[%s7724_s27 + $0x1e8] sm:$0xff] }
 0x268   :  { %v1690_v57 = vsub.f32 1.0, %v1689_v3  ;;  %v2525_v6 = vld.sshfl [vmem:[#allocation1 + $0x18] sm:$0xff pattern:$0x73625140]  ;;  %v5492_v29 = vld [vmem:[%s7724_s27 + $0x1d0] sm:$0xff] }
 0x269   :  { %2361 = vmatpush.bf16.msra.mxu1 %v5420_v15  ;;  %v5489_v15 = vld [vmem:[%s7724_s27 + $0x1b8] sm:$0xff]  ;;  %v2527_v37 = vld.sshfl [vmem:[#allocation1 + $0x28] sm:$0xff pattern:$0x73625140] }
 0x26a   :  { %v1691_v36 = vmul.f32 %v5604_v58, %v1690_v57  ;;  %2347 = vmatpush.bf16.msra.mxu3 %v5413_v56  ;;  %v5451_v56 = vld [vmem:[%s7724_s27 + $0x88] sm:$0xff]  ;;  %v5458_v57 = vld [vmem:[%s7724_s27 + $0xc0] sm:$0xff]  ;;  %v3184_v28 = vld [vmem:[%s7701_s11 + $0x18] sm:$0xff] }
 0x26b   :  { %2375 = vmatpush.bf16.msra.mxu2 %v5427_v40  ;;  %v2933_v34 = vpop.f32.mrf.mxu0  ;;  %v5657_v40 = vld [vmem:[%s7723_s21 + $0x10] sm:$0xff] }
 0x26c   :  { %v1692_v0 = vadd.f32 %v5604_v58, %v1691_v36  ;;  %v5443_v36 = vld [vmem:[%s7724_s27 + $0x48] sm:$0xff]  ;;  %v5493_v34 = vld [vmem:[%s7724_s27 + $0x1d8] sm:$0xff] }
 0x26d   :  { %2362 = vmatpush.bf16.msra.mxu1 %v5419_v23  ;;  %v5487_v23 = vld [vmem:[%s7724_s27 + $0x1a8] sm:$0xff] }
 0x26e   :  { %v1696_v31 = vsel %vm1695_vm8, %v5604_v58, %v1692_v0  ;;  %2348 = vmatpush.bf16.msra.mxu3 %v5412_v41  ;;  %v5452_v58 = vld [vmem:[%s7724_s27 + $0x90] sm:$0xff]  ;;  %v2127_v0 = vunpack.c.h.b16 %v5657_v40 }
 0x26f   :  { %v1701_v26 = vsel %vm1698_vm10, %v1700_v49, %v1696_v31  ;;  %2376 = vmatpush.bf16.msra.mxu2 %v5426_v50  ;;  %v5488_v41 = vld [vmem:[%s7724_s27 + $0x1b0] sm:$0xff]  ;;  %v5481_v31 = vld [vmem:[%s7724_s27 + $0x178] sm:$0xff] }
 0x270   :  { %1753 = vst [vmem:[#allocation2 + $0x5] sm:$0x1] %v1701_v26  ;;  %v2524_v49 = vld.sshfl [vmem:[#allocation1 + $0x10] sm:$0xff pattern:$0x73625140]  ;;  %v2131_v12 = vpack.c.b16 %v2127_v0, %v2127_v0  ;;  %v5494_v26 = vld [vmem:[%s7724_s27 + $0x1e0] sm:$0xff] }
 0x271   :  { %2363 = vmatpush.bf16.msra.mxu1 %v5418_v24  ;;  %v5480_v50 = vld [vmem:[%s7724_s27 + $0x170] sm:$0xff]  ;;  %v5479_v24 = vld [vmem:[%s7724_s27 + $0x168] sm:$0xff] }
 0x272   :  { %2027 = vmatmul.bf16.gmra.mxu2 %v1949_v10  ;;  %2349 = vmatpush.bf16.msra.mxu3 %v5411_v22  ;;  %v5486_v22 = vld [vmem:[%s7724_s27 + $0x1a0] sm:$0xff]  ;;  %v5485_v10 = vld [vmem:[%s7724_s27 + $0x198] sm:$0xff] }
 0x273   :  { %2961 = vmatpush.bf16.msrb.mxu2 %v5465_v45 }
 0x274   :  { %2364 = vmatmul.bf16.vlgmr.msra.gmra.mxu1 %v2132_v62 }
 0x275   :  { %2948 = vmatpush.bf16.msrb.mxu1 %v5457_v16  ;;  %v5484_v16 = vld [vmem:[%s7724_s27 + $0x190] sm:$0xff] }
 0x276   :  { %2350 = vmatpush.bf16.msra.mxu3 %v5410_v19  ;;  %v5478_v19 = vld [vmem:[%s7724_s27 + $0x160] sm:$0xff] }
 0x277   :  { %v1756_v7 = vld [vmem:[#allocation2] sm:$0xff]  ;;  %2962 = vmatpush.bf16.msrb.mxu2 %v5464_v9 }
 0x278   :  { %v1766_v21 = vmul.f32 %v1765_v59, %v1756_v7  ;;  %v1768_v18 = vmul.f32 %v1767_v30, %v1756_v7  ;;  %v1770_v43 = vmul.f32 %v1769_v38, %v1756_v7  ;;  %v1772_v46 = vmul.f32 %v1771_v8, %v1756_v7  ;;  %v5491_v9 = vld [vmem:[%s7724_s27 + $0x1c8] sm:$0xff]  ;;  %v5477_v7 = vld [vmem:[%s7724_s27 + $0x158] sm:$0xff] }
 0x279   :  { %2949 = vmatpush.bf16.msrb.mxu1 %v5456_v47  ;;  %v5483_v59 = vld [vmem:[%s7724_s27 + $0x188] sm:$0xff] }
 0x27a   :  { %v1796_v25 = vpack.c.bf16 %v1768_v18, %v1766_v21  ;;  %v1797_v3 = vpack.c.bf16 %v1772_v46, %v1770_v43  ;;  %v2523_v47 = vld.sshfl [vmem:[#allocation1 + $0x8] sm:$0xff pattern:$0x73625140]  ;;  %v5490_v21 = vld [vmem:[%s7724_s27 + $0x1c0] sm:$0xff] }
 0x27b   :  { %2963 = vmatpush.bf16.msrb.mxu2 %v5463_v13  ;;  %v5482_v18 = vld [vmem:[%s7724_s27 + $0x180] sm:$0xff]  ;;  %v5476_v13 = vld [vmem:[%s7724_s27 + $0x150] sm:$0xff] }
 0x27c   :  { %1870 = vmatmul.bf16.vlgmr.msrb.gmra.mxu3 %v1796_v25  ;;  %v2528_v25 = vld.sshfl [vmem:[#allocation1 + $0x30] sm:$0xff pattern:$0x73625140] }
 0x27d   :  { %2935 = vmatpush.bf16.msrb.mxu3 %v5449_v14  ;;  %2950 = vmatpush.bf16.msrb.mxu1 %v5455_v44  ;;  %v2529_v14 = vld.sshfl [vmem:[#allocation1 + $0x38] sm:$0xff pattern:$0x73625140] }
 0x27f   :  { %2964 = vmatpush.bf16.msrb.mxu2 %v5462_v48  ;;  %v5475_v48 = vld [vmem:[%s7724_s27 + $0x148] sm:$0xff] }
 0x281   :  { %2936 = vmatpush.bf16.msrb.mxu3 %v5448_v17  ;;  %2951 = vmatpush.bf16.msrb.mxu1 %v5454_v5  ;;  %v5474_v17 = vld [vmem:[%s7724_s27 + $0x140] sm:$0xff] }
 0x282   :  { %2377 = vmatmul.bf16.vlgmr.msra.gmra.mxu2 %v2133_v4  ;;  %v3182_v4 = vld [vmem:[%s7701_s11 + $0x8] sm:$0xff] }
 0x283   :  { %v7034_v1 = vpop.f32.mrf.mxu0  ;;  %2965 = vmatpush.bf16.msrb.mxu2 %v5461_v53  ;;  %v3183_v53 = vld [vmem:[%s7701_s11 + $0x10] sm:$0xff] }
 0x285   :  { %2937 = vmatpush.bf16.msrb.mxu3 %v5447_v2  ;;  %2952 = vmatpush.bf16.msrb.mxu1 %v5453_v33  ;;  %v3181_v2 = vld [vmem:[%s7701_s11] sm:$0xff] }
 0x286   :  { %v3159_v33 = vld [vmem:[%s7704_s10] sm:$0x1] }
 0x287   :  { %2966 = vmatpush.bf16.msrb.mxu2 %v5460_v39 }
 0x289   :  { %2938 = vmatpush.bf16.msrb.mxu3 %v5446_v20  ;;  %2953 = vmatpush.bf16.msrb.mxu1 %v5452_v58 }
 0x28b   :  { %v2985_v55 = vpop.f32.mrf.mxu0  ;;  %2967 = vmatpush.bf16.msrb.mxu2 %v5459_v54 }
 0x28c   :  { %1875 = vmatmul.bf16.gmra.mxu3 %v1797_v3  ;;  %v5551_v55 = vld [vmem:[%s7711_s18] ss:$0 sm:$0xff] }
 0x28d   :  { %2939 = vmatpush.bf16.msrb.mxu3 %v5445_v32  ;;  %2954 = vmatpush.bf16.msrb.mxu1 %v5451_v56 }
 0x28f   :  { %2968 = vmatpush.bf16.msrb.mxu2 %v5458_v57 }
 0x291   :  { %2940 = vmatpush.bf16.msrb.mxu3 %v5444_v42  ;;  %2955 = vmatpush.bf16.msrb.mxu1 %v5450_v60 }
 0x292   :  { %2969 = vmatmul.bf16.vlgmr.msrb.gmra.mxu2 %v2525_v6 }
 0x293   :  { %3013 = vmatpush.bf16.msra.mxu2 %v5497_v11 }
 0x294   :  { %2956 = vmatmul.bf16.vlgmr.msrb.gmra.mxu1 %v2524_v49 }
 0x295   :  { %3000 = vmatpush.bf16.msra.mxu1 %v5489_v15  ;;  %2941 = vmatpush.bf16.msrb.mxu3 %v5443_v36 }
 0x297   :  { %3014 = vmatpush.bf16.msra.mxu2 %v5496_v63 }
 0x299   :  { %3001 = vmatpush.bf16.msra.mxu1 %v5488_v41  ;;  %2942 = vmatpush.bf16.msrb.mxu3 %v5442_v52 }
 0x29b   :  { %3015 = vmatpush.bf16.msra.mxu2 %v5495_v27 }
 0x29c   :  { %2351 = vmatmul.bf16.vlgmr.msra.gmra.mxu3 %v2131_v12 }
 0x29d   :  { %3002 = vmatpush.bf16.msra.mxu1 %v5487_v23  ;;  %2987 = vmatpush.bf16.msra.mxu3 %v5481_v31 }
 0x29f   :  { %3016 = vmatpush.bf16.msra.mxu2 %v5494_v26 }
 0x2a1   :  { %3003 = vmatpush.bf16.msra.mxu1 %v5486_v22  ;;  %2988 = vmatpush.bf16.msra.mxu3 %v5480_v50 }
 0x2a3   :  { %v7108_v45 = vpop.f32.mrf.mxu0  ;;  %3017 = vmatpush.bf16.msra.mxu2 %v5493_v34 }
 0x2a5   :  { %3004 = vmatpush.bf16.msra.mxu1 %v5485_v10  ;;  %2989 = vmatpush.bf16.msra.mxu3 %v5479_v24  ;;  %v5548_v10 = vld [vmem:[%s7725_s30] ss:$0 sm:$0xff] }
 0x2a7   :  { %3018 = vmatpush.bf16.msra.mxu2 %v5492_v29 }
 0x2a9   :  { %3005 = vmatpush.bf16.msra.mxu1 %v5484_v16  ;;  %2990 = vmatpush.bf16.msra.mxu3 %v5478_v19  ;;  %v2340_v19 = vadd.f32 %v5548_v10, %v6788_v61 }
 0x2ab   :  { %v7128_v30 = vpop.f32.mrf.mxu0  ;;  %3019 = vmatpush.bf16.msra.mxu2 %v5491_v9 }
 0x2ac   :  { %2943 = vmatmul.bf16.vlgmr.msrb.gmra.mxu3 %v2523_v47 }
 0x2ad   :  { %3006 = vmatpush.bf16.msra.mxu1 %v5483_v59  ;;  %2991 = vmatpush.bf16.msra.mxu3 %v5477_v7 }
 0x2af   :  { %3020 = vmatpush.bf16.msra.mxu2 %v5490_v21 }
 0x2b1   :  { %3007 = vmatpush.bf16.msra.mxu1 %v5482_v18  ;;  %2992 = vmatpush.bf16.msra.mxu3 %v5476_v13  ;;  %v5083_v13 = vld [vmem:[%s7703_s13] sm:$0xf] }
 0x2b2   :  { %3021 = vmatmul.bf16.vlgmr.msra.gmra.mxu2 %v2529_v14  ;;  %v5514_v14 = vld [vmem:[%s7703_s13 + $0x30] sm:$0xf0] }
 0x2b3   :  { %v7142_v44 = vpop.f32.mrf.mxu0 }
 0x2b4   :  { %3008 = vmatmul.bf16.vlgmr.msra.gmra.mxu1 %v2528_v25  ;;  %v5084_v25 = vor.u32 %v5514_v14, %v5083_v13  ;;  %v5519_v13 = vld [vmem:[%s7703_s13 + $0x58] sm:$0xf0] }
 0x2b5   :  { %2993 = vmatpush.bf16.msra.mxu3 %v5475_v48  ;;  %v5549_v48 = vld [vmem:[%s7698_s6] ss:$0 sm:$0xff] }
 0x2b6   :  { %3330 = vmatpush.bf16.msrb.mxu2 %v5084_v25 }
 0x2b9   :  { %2994 = vmatpush.bf16.msra.mxu3 %v5474_v17  ;;  %v2932_v17 = vadd.f32 %v5549_v48, %v6957_v51  ;;  %v5093_v51 = vld [vmem:[%s7703_s13 + $0x3c] sm:$0xf0] }
 0x2bb   :  { %v7153_v5 = vpop.f32.mrf.mxu0 }
 0x2bc   :  { %2995 = vmatmul.bf16.vlgmr.msra.gmra.mxu3 %v2527_v37 }
 0x2bd   :  { %3201 = vmatpush.msrb.mxu3 %v3184_v28 }
 0x2bf   :  { %3202 = vmatpush.msrb.mxu3 %v3183_v53 }
 0x2c1   :  { %3203 = vmatpush.msrb.mxu3 %v3182_v4 }
 0x2c3   :  { %v3177_v35 = vpop.f32.mrf.mxu0  ;;  %3204 = vmatpush.msrb.mxu3 %v3181_v2  ;;  %v5508_v2 = vld [vmem:[%s7703_s13 + $0x4] sm:$0xf] }
 0x2c4   :  { %v3178_v38 = vadd.f32 %v3177_v35, %v3159_v33  ;;  %v5085_v33 = vld [vmem:[%s7703_s13 + $0x34] sm:$0xf0]  ;;  %v5509_v35 = vld [vmem:[%s7703_s13 + $0xc] sm:$0xf] }
 0x2c6   :  { %v3180_v8 = vmax.f32 %v3178_v38, 0.0 }
 0x2c9   :  { %v1938_v39 = vpop.f32.mrf.mxu1 }
 0x2cc   :  { %5080 = vmatmul.msk.f32.vlgmr.msrb.gmra.mxu3 %vm1193_vm0, %v3180_v8  ;;  %v5088_v8 = vor.u32 %v5508_v2, %v5085_v33  ;;  %vm7752_vm0 = vcmask 130048  }
 0x2cd   :  { %vm7753_vm12 = vmmov %vm7752_vm0 }
 0x2ce   :  { %3343 = vmatpush.bf16.msrb.mxu1 %v5088_v8  ;;  %vm7754_vm13 = vmmov %vm7752_vm0 }
 0x2cf   :  { %vm7755_vm9 = vmmov %vm7752_vm0 }
 0x2d0   :  { %vm7756_vm11 = vmmov %vm7752_vm0 }
 0x2d1   :  { %v1940_v20 = vpop.f32.mrf.mxu1  ;;  %vm7757_vm14 = vmmov %vm7752_vm0 }
 0x2d2   :  { %vm7758_vm4 = vmmov %vm7752_vm0 }
 0x2d3   :  { %vm7759_vm15 = vmmov %vm7752_vm0 }
 0x2d4   :  { %vm7760_vm2 = vmmov %vm7752_vm0 }
 0x2d5   :  { %vm7761_vm3 = vmmov %vm7752_vm0 }
 0x2d6   :  { %vm7762_vm5 = vmmov %vm7752_vm0 }
 0x2d7   :  { %vm7763_vm1 = vmmov %vm7752_vm0 }
 0x2d8   :  { %vm7764_vm6 = vmmov %vm7752_vm0 }
 0x2dd   :  { %v1943_v46 = vpop.f32.mrf.mxu1 }
 0x2e5   :  { %v2023_v62 = vpop.f32.mrf.mxu2  ;;  %v1945_v54 = vpop.f32.mrf.mxu1 }
 0x2ed   :  { %v2025_v43 = vpop.f32.mrf.mxu2 }
 0x2f1   :  { %v2365_v11 = vpop.f32.mrf.mxu1 }
 0x2f5   :  { %v2028_v58 = vpop.f32.mrf.mxu2 }
 0x2f9   :  { %v2367_v40 = vpop.f32.mrf.mxu1 }
 0x2fd   :  { %v2030_v32 = vpop.f32.mrf.mxu2 }
 0x2ff   :  { %v1871_v3 = vpop.f32.mrf.mxu3 }
 0x300   :  { %v1939_v56 = vadd.f32 %v1938_v39, %v1871_v3  ;;  %v5099_v39 = vld [vmem:[%s7703_s13 + $0x10] sm:$0xf]  ;;  %v5510_v3 = vld [vmem:[%s7703_s13 + $0x14] sm:$0xf] }
 0x302   :  { %v2033_v57 = vadd.f32 %v2023_v62, %v1939_v56  ;;  %v5516_v62 = vld [vmem:[%s7703_s13 + $0x40] sm:$0xf0]  ;;  %v5101_v56 = vld [vmem:[%s7703_s13 + $0x44] sm:$0xf0] }
 0x304   :  { %v2041_v42 = vadd.f32 %v5551_v55, %v2033_v57  ;;  %v5104_v57 = vor.u32 %v5510_v3, %v5101_v56 }
 0x305   :  { %v2378_v60 = vpop.f32.mrf.mxu2 }
 0x306   :  { %v2045_v15 = vmax.f32 %v2041_v42, 0.0  ;;  %v5109_v42 = vld [vmem:[%s7703_s13 + $0x4c] sm:$0xf0]  ;;  %3395 = vmatpush.bf16.msra.mxu1 %v5104_v57  ;;  %v7310_v57 = vld [vmem:[%s7708_s14 + $0x8] sm:$0x1f] }
 0x307   :  { %v1873_v6 = vpop.f32.mrf.mxu3 }
 0x308   :  { %2049 = vst [vmem:[%s7712_s19] sm:$0xff] %v2045_v15  ;;  %v1941_v36 = vadd.f32 %v1940_v20, %v1873_v6 }
 0x30a   :  { %v2034_v63 = vadd.f32 %v2025_v43, %v1941_v36  ;;  %v5096_v43 = vor.u32 %v5509_v35, %v5093_v51 }
 0x30c   :  { %v2042_v41 = vadd.f32 %v5551_v55, %v2034_v63  ;;  %3369 = vmatpush.bf16.msra.mxu3 %v5096_v43 }
 0x30d   :  { %v2380_v0 = vpop.f32.mrf.mxu2 }
 0x30e   :  { %v2046_v52 = vmax.f32 %v2042_v41, 0.0 }
 0x30f   :  { %v1876_v27 = vpop.f32.mrf.mxu3 }
 0x310   :  { %2050 = vst [vmem:[%s7712_s19 + $0x8] sm:$0xff] %v2046_v52  ;;  %v1944_v49 = vadd.f32 %v1943_v46, %v1876_v27  ;;  %v5100_v46 = vor.u32 %v5516_v62, %v5099_v39 }
 0x311   :  { %v2957_v31 = vpop.f32.mrf.mxu1 }
 0x312   :  { %v2035_v23 = vadd.f32 %v2028_v58, %v1944_v49  ;;  %v5091_v58 = vld [vmem:[%s7703_s13 + $0x8] sm:$0xf]  ;;  %3382 = vmatpush.bf16.msra.mxu0 %v5100_v46 }
 0x314   :  { %v2043_v12 = vadd.f32 %v5551_v55, %v2035_v23 }
 0x315   :  { %v2970_v22 = vpop.f32.mrf.mxu2 }
 0x316   :  { %v2047_v26 = vmax.f32 %v2043_v12, 0.0  ;;  %v3185_v12 = vld [vmem:[%s7706_s12] sm:$0x1] }
 0x317   :  { %v1878_v50 = vpop.f32.mrf.mxu3 }
 0x318   :  { %2051 = vst [vmem:[%s7712_s19 + $0x10] sm:$0xff] %v2047_v26  ;;  %v1946_v34 = vadd.f32 %v1945_v54, %v1878_v50  ;;  %v5515_v54 = vld [vmem:[%s7703_s13 + $0x38] sm:$0xf0]  ;;  %v5517_v26 = vld [vmem:[%s7703_s13 + $0x48] sm:$0xf0] }
 0x319   :  { %v2959_v16 = vpop.f32.mrf.mxu1  ;;  %v5117_v50 = vld [vmem:[%s7703_s13 + $0x54] sm:$0xf0] }
 0x31a   :  { %v2036_v24 = vadd.f32 %v2030_v32, %v1946_v34  ;;  %v5092_v32 = vor.u32 %v5515_v54, %v5091_v58  ;;  %v5513_v34 = vld [vmem:[%s7703_s13 + $0x2c] sm:$0xf]  ;;  %v5520_v16 = vld [vmem:[%s7703_s13 + $0x60] sm:$0xf0] }
 0x31c   :  { %v2044_v29 = vadd.f32 %v5551_v55, %v2036_v24  ;;  %v5511_v55 = vld [vmem:[%s7703_s13 + $0x1c] sm:$0xf]  ;;  %3356 = vmatpush.bf16.msra.mxu2 %v5092_v32  ;;  %v5125_v24 = vld [vmem:[%s7703_s13 + $0x5c] sm:$0xf0] }
 0x31d   :  { %v2972_v59 = vpop.f32.mrf.mxu2  ;;  %v5112_v6 = vor.u32 %v5511_v55, %v5109_v42  ;;  %v5527_v42 = vld [vmem:[%s7707_s15 + $0x30] sm:$0xff] }
 0x31e   :  { %v2048_v9 = vmax.f32 %v2044_v29, 0.0  ;;  %v5131_v29 = vld [vmem:[%s7703_s13 + $0x30] sm:$0xf] }
 0x31f   :  { %v2352_v47 = vpop.f32.mrf.mxu3  ;;  %3421 = vmatpush.bf16.msrb.mxu3 %v5112_v6  ;;  %v3302_v6 = vperm.slane %v7310_v57, 0 }
 0x320   :  { %2052 = vst [vmem:[%s7712_s19 + $0x18] sm:$0xff] %v2048_v9  ;;  %v2353_v7 = vadd.f32 %v2352_v47, %v2340_v19  ;;  %v5128_v47 = vor.u32 %v5513_v34, %v5125_v24  ;;  %v5525_v24 = vld [vmem:[%s7707_s15 + $0x20] sm:$0xff] }
 0x322   :  { %v2366_v21 = vadd.f32 %v2365_v11, %v2353_v7  ;;  %v5115_v11 = vld [vmem:[%s7703_s13 + $0x20] sm:$0xf]  ;;  %v5132_v7 = vor.u32 %v5520_v16, %v5131_v29 }
 0x324   :  { %v7187_v18 = vadd.f32 %v2378_v60, %v2366_v21  ;;  %v5518_v60 = vld [vmem:[%s7703_s13 + $0x50] sm:$0xf0]  ;;  %v5123_v21 = vld [vmem:[%s7703_s13 + $0x28] sm:$0xf] }
 0x325   :  { %v5116_v36 = vor.u32 %v5518_v60, %v5115_v11  ;;  %v5124_v14 = vor.u32 %v5519_v13, %v5123_v21 }
 0x327   :  { %v2354_v61 = vpop.f32.mrf.mxu3  ;;  %3434 = vmatpush.bf16.msrb.mxu0 %v5116_v36 }
 0x328   :  { %v7293_v61 = vld [vmem:[%s7708_s14] sm:$0xff] }
 0x329   :  { %v3295_v25 = vperm.slane %v7293_v61, 1  ;;  %v3298_v48 = vperm.slane %v7293_v61, 4  ;;  %v3294_v33 = vperm.slane %v7293_v61, 0  ;;  %v3299_v3 = vperm.slane %v7293_v61, 5 }
 0x32f   :  { %v2944_v28 = vpop.f32.mrf.mxu3 }
 0x330   :  { %v2945_v53 = vadd.f32 %v2944_v28, %v2932_v17 }
 0x331   :  { %v3009_v37 = vpop.f32.mrf.mxu1 }
 0x332   :  { %v2958_v4 = vadd.f32 %v2957_v31, %v2945_v53  ;;  %v5107_v31 = vld [vmem:[%s7703_s13 + $0x18] sm:$0xf] }
 0x333   :  { %v5108_v9 = vor.u32 %v5517_v26, %v5107_v31  ;;  %v5528_v53 = vld [vmem:[%s7707_s15 + $0x38] sm:$0xff]  ;;  %v3301_v26 = vperm.slane %v7293_v61, 7 }
 0x334   :  { %v2971_v20 = vadd.f32 %v2970_v22, %v2958_v4 }
 0x335   :  { %v3022_v38 = vpop.f32.mrf.mxu2 }
 0x336   :  { %v2984_v40 = vadd.f32 %v7034_v1, %v2971_v20  ;;  %v5512_v1 = vld [vmem:[%s7703_s13 + $0x24] sm:$0xf] }
 0x337   :  { %v2946_v15 = vpop.f32.mrf.mxu3  ;;  %v5120_v59 = vor.u32 %v5512_v1, %v5117_v50 }
 0x339   :  { %v3011_v63 = vpop.f32.mrf.mxu1 }
 0x33a   :  { %v5550_v63 = vld [vmem:[%s7705_s8] ss:$0 sm:$0xff] }
 0x33b   :  { %v7332_v1 = vadd.f32 %v5550_v63, %v7108_v45  ;;  %v7335_v50 = vadd.f32 %v5550_v63, %v7128_v30  ;;  %v7343_v29 = vadd.f32 %v5550_v63, %v7142_v44  ;;  %v7346_v16 = vadd.f32 %v5550_v63, %v7153_v5  ;;  %v5524_v44 = vld [vmem:[%s7707_s15 + $0x18] sm:$0xff] }
 0x33c   :  { %v3306_v63 = vperm.slane %v7310_v57, 4 }
 0x33d   :  { %v3024_v41 = vpop.f32.mrf.mxu2 }
 0x33f   :  { %v2996_v0 = vpop.f32.mrf.mxu3 }
 0x340   :  { %v2997_v52 = vadd.f32 %v2996_v0, %v2984_v40  ;;  %v5526_v0 = vld [vmem:[%s7707_s15 + $0x28] sm:$0xff] }
 0x342   :  { %v3010_v27 = vadd.f32 %v3009_v37, %v2997_v52 }
 0x344   :  { %v7242_v49 = vadd.f32 %v3022_v38, %v3010_v27  ;;  %v3297_v38 = vperm.slane %v7293_v61, 3 }
 0x347   :  { %v2998_v23 = vpop.f32.mrf.mxu3 }
 0x34f   :  { %v3206_v22 = vpop.f32.mrf.mxu3 }
 0x350   :  { %v3207_v10 = vadd.f32 %v3206_v22, %v3185_v12  ;;  %v3296_v12 = vperm.slane %v7293_v61, 2 }
 0x352   :  { %v3209_v19 = vpack.c.bf16 %v3207_v10, %v3207_v10 }
 0x354   :  { %5133 = vmatmul.msk.bf16.vlgmr.msrb.gmra.mxu2 %vm7752_vm0, %v3209_v19  ;;  %5134 = vmatmul.msk.bf16.vlgmr.msrb.gmra.mxu1 %vm7753_vm12, %v3209_v19 }
 0x355   :  { %5136 = vmatmul.msk.bf16.vlgmr.msra.gmra.mxu3 %vm7754_vm13, %v3209_v19  ;;  %5137 = vmatmul.msk.bf16.vlgmr.msra.gmra.mxu0 %vm7755_vm9, %v3209_v19 }
 0x356   :  { %3408 = vmatpush.bf16.msrb.mxu2 %v5108_v9  ;;  %3447 = vmatpush.bf16.msrb.mxu1 %v5120_v59 }
 0x357   :  { %3473 = vmatpush.bf16.msra.mxu3 %v5128_v47  ;;  %3486 = vmatpush.bf16.msra.mxu0 %v5132_v7 }
 0x364   :  { %5135 = vmatmul.msk.bf16.vlgmr.msra.gmra.mxu2 %vm7756_vm11, %v3209_v19  ;;  %5138 = vmatmul.msk.bf16.vlgmr.msra.gmra.mxu1 %vm7757_vm14, %v3209_v19 }
 0x365   :  { %5140 = vmatmul.msk.bf16.vlgmr.msrb.gmra.mxu3 %vm7758_vm4, %v3209_v19  ;;  %5141 = vmatmul.msk.bf16.vlgmr.msrb.gmra.mxu0 %vm7759_vm15, %v3209_v19 }
 0x366   :  { %3460 = vmatpush.bf16.msra.mxu2 %v5124_v14 }
 0x374   :  { %5139 = vmatmul.msk.bf16.vlgmr.msrb.gmra.mxu2 %vm7760_vm2, %v3209_v19  ;;  %5142 = vmatmul.msk.bf16.vlgmr.msrb.gmra.mxu1 %vm7761_vm3, %v3209_v19 }
 0x375   :  { %5144 = vmatmul.msk.bf16.vlgmr.msra.gmra.mxu3 %vm7762_vm5, %v3209_v19  ;;  %5145 = vmatmul.msk.bf16.vlgmr.msra.gmra.mxu0 %vm7763_vm1, %v3209_v19 }
 0x376   :  { %3920 = vmatpush.bf16.msrb.mxu2 %v5528_v53 }
 0x37a   :  { %3921 = vmatpush.bf16.msrb.mxu2 %v5527_v42 }
 0x37e   :  { %3922 = vmatpush.bf16.msrb.mxu2 %v5526_v0 }
 0x382   :  { %3923 = vmatpush.bf16.msrb.mxu2 %v5525_v24 }
 0x384   :  { %5143 = vmatmul.msk.bf16.vlgmr.msra.gmra.mxu2 %vm7764_vm6, %v3209_v19 }
 0x386   :  { %3924 = vmatpush.bf16.msrb.mxu2 %v5524_v44  ;;  %v3300_v44 = vperm.slane %v7293_v61, 6  ;;  %v5521_v61 = vld [vmem:[%s7707_s15] sm:$0xff] }
 0x3d1   :  { %v3345_v17 = vpop.f32.mrf.mxu1 }
 0x3d2   :  { %v3346_v28 = vadd.f32 %v3345_v17, %v3295_v25  ;;  %v3384_v37 = vpop.f32.mrf.mxu0 }
 0x3d3   :  { %v3385_v4 = vadd.f32 %v3384_v37, %v3298_v48 }
 0x3d4   :  { %v5147_v2 = vmul.f32 -1.442695, %v3346_v28 }
 0x3d5   :  { %v5150_v35 = vmul.f32 -1.442695, %v3385_v4 }
 0x3d6   :  { %5605 = vpow2.f32 %v5147_v2 }
 0x3d7   :  { %5607 = vpow2.f32 %v5150_v35  ;;  %v3332_v8 = vpop.f32.mrf.mxu2 }
 0x3d8   :  { %v3333_v51 = vadd.f32 %v3332_v8, %v3294_v33  ;;  %v3371_v39 = vpop.f32.mrf.mxu3 }
 0x3d9   :  { %v3347_v62 = vpop.f32.mrf.mxu1  ;;  %v3372_v43 = vadd.f32 %v3371_v39, %v3297_v38 }
 0x3da   :  { %v5146_v20 = vmul.f32 -1.442695, %v3333_v51  ;;  %v3386_v46 = vpop.f32.mrf.mxu0 }
 0x3db   :  { %v5149_v55 = vmul.f32 -1.442695, %v3372_v43 }
 0x3dc   :  { %v5606_v58 = vpop.eup %5605  ;;  %5609 = vpow2.f32 %v5146_v20 }
 0x3dd   :  { %v5608_v54 = vpop.eup %5607  ;;  %v7302_v32 = vadd.f32 1.0, %v5606_v58 }
 0x3de   :  { %v7305_v56 = vadd.f32 1.0, %v5608_v54  ;;  %v5523_v54 = vld [vmem:[%s7707_s15 + $0x10] sm:$0xff] }
 0x3df   :  { %5611 = vrcp.f32 %v7302_v32  ;;  %v3334_v11 = vpop.f32.mrf.mxu2  ;;  %v3568_v45 = vand.u32 2147483647, %v7302_v32  ;;  %vm3564_vm7 = vweird.f32 %v7302_v32  ;;  %v3570_v17 = vand.u32 2147483648, %v7302_v32  ;;  %3925 = vmatpush.bf16.msrb.mxu2 %v5523_v54 }
 0x3e0   :  { %5613 = vrcp.f32 %v7305_v56  ;;  %v3373_v60 = vpop.f32.mrf.mxu3  ;;  %v3613_v47 = vand.u32 2147483647, %v7305_v56  ;;  %v3615_v5 = vand.u32 2147483648, %v7305_v56  ;;  %vm3609_vm10 = vweird.f32 %v7305_v56 }
 0x3e1   :  { %v3397_v15 = vpop.f32.mrf.mxu1  ;;  %5615 = vpow2.f32 %v5149_v55  ;;  %vm7369_vm12 = vcmp.eq.f32.partialorder %v3568_v45, 8.507059e+37  ;;  %v3303_v11 = vperm.slane %v7310_v57, 1 }
 0x3e2   :  { %v5610_v36 = vpop.eup %5609  ;;  %v3398_v41 = vadd.f32 %v3397_v15, %v3299_v3  ;;  %v3436_v40 = vpop.f32.mrf.mxu0  ;;  %vm7363_vm0 = vcmp.eq.f32.partialorder %v3613_v47, 8.507059e+37  ;;  %v3616_v39 = vor.u32 1.1754944e-38, %v3615_v5 }
 0x3e3   :  { %v7324_v52 = vadd.f32 1.0, %v5610_v36  ;;  %v3437_v27 = vadd.f32 %v3436_v40, %v3302_v6  ;;  %v3571_v40 = vor.u32 1.1754944e-38, %v3570_v17 }
 0x3e4   :  { %v5151_v23 = vmul.f32 -1.442695, %v3398_v41 }
 0x3e5   :  { %v7327_v31 = vpop.eup %5611  ;;  %5617 = vrcp.f32 %v7324_v52  ;;  %v5154_v10 = vmul.f32 -1.442695, %v3437_v27  ;;  %v3553_v62 = vand.u32 2147483647, %v7324_v52  ;;  %v3555_v58 = vand.u32 2147483648, %v7324_v52 }
 0x3e6   :  { %v5614_v22 = vpop.eup %5613  ;;  %v3560_v34 = vmul.f32 %v7327_v31, %v7302_v32  ;;  %5619 = vpow2.f32 %v5151_v23  ;;  %vm3565_vm13 = vweird.f32 %v7327_v31  ;;  %vm3549_vm14 = vweird.f32 %v7324_v52 }
 0x3e7   :  { %v3605_v19 = vmul.f32 %v5614_v22, %v7305_v56  ;;  %v3358_v30 = vpop.f32.mrf.mxu2  ;;  %v5616_v9 = vpop.eup %5615  ;;  %5621 = vpow2.f32 %v5154_v10  ;;  %vm3610_vm8 = vweird.f32 %v5614_v22  ;;  %vm7395_vm11 = vmor %vm3564_vm7, %vm3565_vm13  ;;  %vm7400_vm4 = vcmp.eq.f32.partialorder %v3553_v62, 8.507059e+37 }
 0x3e8   :  { %v3561_v59 = vsub.f32 1.0, %v3560_v34  ;;  %v3359_v7 = vadd.f32 %v3358_v30, %v3296_v12  ;;  %v3423_v21 = vpop.f32.mrf.mxu3  ;;  %v7360_v2 = vadd.f32 1.0, %v5616_v9  ;;  %vm3611_vm9 = vmor %vm3609_vm10, %vm3610_vm8  ;;  %v3556_v12 = vor.u32 1.1754944e-38, %v3555_v58 }
 0x3e9   :  { %v3606_v13 = vsub.f32 1.0, %v3605_v19  ;;  %v3424_v14 = vadd.f32 %v3423_v21, %v3301_v26  ;;  %v3399_v25 = vpop.f32.mrf.mxu1  ;;  %v5522_v26 = vld [vmem:[%s7707_s15 + $0x8] sm:$0xff] }
 0x3ea   :  { %v3562_v48 = vmul.f32 %v7327_v31, %v3561_v59  ;;  %v5148_v28 = vmul.f32 -1.442695, %v3359_v7  ;;  %v3438_v37 = vpop.f32.mrf.mxu0  ;;  %3926 = vmatpush.bf16.msrb.mxu2 %v5522_v26 }
 0x3eb   :  { %v7358_v53 = vpop.eup %5617  ;;  %v3607_v4 = vmul.f32 %v5614_v22, %v3606_v13  ;;  %v5153_v33 = vmul.f32 -1.442695, %v3424_v14  ;;  %v3598_v13 = vand.u32 2147483647, %v7360_v2  ;;  %v3305_v14 = vperm.slane %v7310_v57, 3 }
 0x3ec   :  { %v3545_v38 = vmul.f32 %v7358_v53, %v7324_v52  ;;  %5623 = vpow2.f32 %v5148_v28  ;;  %v5620_v20 = vpop.eup %5619  ;;  %v3563_v43 = vadd.f32 %v7327_v31, %v3562_v48  ;;  %vm3550_vm15 = vweird.f32 %v7358_v53 }
 0x3ed   :  { %v3608_v51 = vadd.f32 %v5614_v22, %v3607_v4  ;;  %5625 = vpow2.f32 %v5153_v33  ;;  %v5622_v3 = vpop.eup %5621  ;;  %v7382_v55 = vadd.f32 1.0, %v5620_v20  ;;  %vm7434_vm2 = vmor %vm3549_vm14, %vm3550_vm15 }
 0x3ee   :  { %v3546_v46 = vsub.f32 1.0, %v3545_v38  ;;  %5627 = vrcp.f32 %v7360_v2  ;;  %v7388_v6 = vadd.f32 1.0, %v5622_v3  ;;  %3927 = vmatpush.bf16.msrb.mxu2 %v5521_v61 }
 0x3ef   :  { %v3612_v56 = vsel %vm3611_vm9, %v5614_v22, %v3608_v51  ;;  %v3360_v42 = vpop.f32.mrf.mxu2  ;;  %5629 = vrcp.f32 %v7382_v55  ;;  %v3567_v22 = vsel %vm7395_vm11, %v7327_v31, %v3563_v43  ;;  %v3628_v24 = vand.u32 2147483647, %v7382_v55  ;;  %v5544_v31 = vld [vmem:[%s7709_s17 + $0x38] sm:$0xff] }
 0x3f0   :  { %v3617_v60 = vsel %vm7363_vm0, %v3616_v39, %v3612_v56  ;;  %v3547_v15 = vmul.f32 %v7358_v53, %v3546_v46  ;;  %v3425_v36 = vpop.f32.mrf.mxu3  ;;  %5631 = vrcp.f32 %v7388_v6  ;;  %v3630_v45 = vand.u32 2147483648, %v7382_v55  ;;  %4005 = vmatpush.bf16.msrb.mxu3 %v5544_v31  ;;  %v5543_v39 = vld [vmem:[%s7709_s17 + $0x30] sm:$0xff]  ;;  %v5542_v42 = vld [vmem:[%s7709_s17 + $0x28] sm:$0xff] }
 0x3f1   :  { %3739 = vst [vmem:[#allocation2] sm:$0x1] %v3617_v60  ;;  %v3449_v27 = vpop.f32.mrf.mxu1  ;;  %v3675_v30 = vand.u32 2147483648, %v7388_v6  ;;  %v3673_v21 = vand.u32 2147483647, %v7388_v6  ;;  %vm3624_vm3 = vweird.f32 %v7382_v55  ;;  %v3572_v25 = vsel %vm7369_vm12, %v3571_v40, %v3567_v22 }
 0x3f2   :  { %v5624_v23 = vpop.eup %5623  ;;  %v3488_v32 = vpop.f32.mrf.mxu0  ;;  %v3548_v10 = vadd.f32 %v7358_v53, %v3547_v15  ;;  %v3450_v59 = vadd.f32 %v3449_v27, %v3303_v11  ;;  %vm3669_vm5 = vweird.f32 %v7388_v6  ;;  %vm7456_vm1 = vcmp.eq.f32.partialorder %v3628_v24, 8.507059e+37 }
 0x3f3   :  { %v5626_v34 = vpop.eup %5625  ;;  %v7416_v19 = vadd.f32 1.0, %v5624_v23  ;;  %v3489_v47 = vadd.f32 %v3488_v32, %v3306_v63  ;;  %v3631_v38 = vor.u32 1.1754944e-38, %v3630_v45  ;;  %v3676_v8 = vor.u32 1.1754944e-38, %v3675_v30 }
 0x3f4   :  { %v7419_v9 = vadd.f32 1.0, %v5626_v34  ;;  %v7424_v7 = vpop.eup %5627  ;;  %v5155_v52 = vmul.f32 -1.442695, %v3450_v59  ;;  %v3552_v37 = vsel %vm7434_vm2, %v7358_v53, %v3548_v10  ;;  %vm7465_vm6 = vcmp.eq.f32.partialorder %v3673_v21, 8.507059e+37  ;;  %4006 = vmatpush.bf16.msrb.mxu3 %v5543_v39  ;;  %v5541_v34 = vld [vmem:[%s7709_s17 + $0x20] sm:$0xff] }
 0x3f5   :  { %5633 = vrcp.f32 %v7416_v19  ;;  %v7446_v48 = vpop.eup %5629  ;;  %v5158_v17 = vmul.f32 -1.442695, %v3489_v47  ;;  %v3750_v46 = vperm.slane %v3572_v25, 0  ;;  %v3557_v56 = vsel %vm7400_vm4, %v3556_v12, %v3552_v37 }
 0x3f6   :  { %5635 = vrcp.f32 %v7419_v9  ;;  %v7452_v4 = vpop.eup %5631  ;;  %v3620_v33 = vmul.f32 %v7446_v48, %v7382_v55  ;;  %v3658_v15 = vand.u32 2147483647, %v7419_v9  ;;  %v3748_v63 = vperm.slane %v3557_v56, 0 }
 0x3f7   :  { %v3410_v28 = vpop.f32.mrf.mxu2  ;;  %v3665_v53 = vmul.f32 %v7452_v4, %v7388_v6  ;;  %5637 = vpow2.f32 %v5155_v52  ;;  %vm3625_vm7 = vweird.f32 %v7446_v48  ;;  %vm3670_vm8 = vweird.f32 %v7452_v4 }
 0x3f8   :  { %v3475_v51 = vpop.f32.mrf.mxu3  ;;  %v3411_v20 = vadd.f32 %v3410_v28, %v3300_v44  ;;  %v3621_v58 = vsub.f32 1.0, %v3620_v33  ;;  %5639 = vpow2.f32 %v5158_v17  ;;  %v3749_v26 = vmul.f32 %v3748_v63, %v7187_v18  ;;  %4007 = vmatpush.bf16.msrb.mxu3 %v5542_v42  ;;  %vm3626_vm10 = vmor %vm3624_vm3, %vm3625_vm7 }
 0x3f9   :  { %v3451_v43 = vpop.f32.mrf.mxu1  ;;  %v3476_v54 = vadd.f32 %v3475_v51, %v3305_v14  ;;  %v3666_v60 = vsub.f32 1.0, %v3665_v53  ;;  %v3751_v22 = vmul.f32 %v3750_v46, %v7187_v18  ;;  %v3660_v30 = vand.u32 2147483648, %v7419_v9  ;;  %vm3671_vm12 = vmor %vm3669_vm5, %vm3670_vm8 }
 0x3fa   :  { %v3490_v3 = vpop.f32.mrf.mxu0  ;;  %v5152_v36 = vmul.f32 -1.442695, %v3411_v20  ;;  %v3622_v40 = vmul.f32 %v7446_v48, %v3621_v58  ;;  %v3600_v17 = vand.u32 2147483648, %v7360_v2  ;;  %vm3654_vm13 = vweird.f32 %v7419_v9 }
 0x3fb   :  { %v7474_v11 = vpop.eup %5633  ;;  %v5157_v27 = vmul.f32 -1.442695, %v3476_v54  ;;  %v3667_v23 = vmul.f32 %v7452_v4, %v3666_v60  ;;  %v3769_v55 = vpack.c.bf16 %v3751_v22, %v3749_v26  ;;  %vm3659_vm9 = vcmp.eq.f32.partialorder %v3658_v15, 8.507059e+37  ;;  %v5539_v54 = vld [vmem:[%s7709_s17 + $0x10] sm:$0xff]  ;;  %v5536_v60 = vld [vmem:[%s7710_s16 + $0x38] sm:$0xff] }
 0x3fc   :  { %v5636_v41 = vpop.eup %5635  ;;  %v3575_v0 = vmul.f32 %v7474_v11, %v7416_v19  ;;  %5641 = vpow2.f32 %v5152_v36  ;;  %v3623_v32 = vadd.f32 %v7446_v48, %v3622_v40  ;;  %4008 = vmatpush.bf16.msrb.mxu3 %v5541_v34  ;;  %v3661_v33 = vor.u32 1.1754944e-38, %v3660_v30  ;;  %3853 = vmatpush.bf16.msra.mxu1 %v5536_v60  ;;  %v5535_v34 = vld [vmem:[%s7710_s16 + $0x30] sm:$0xff] }
 0x3fd   :  { %v3650_v12 = vmul.f32 %v5636_v41, %v7419_v9  ;;  %5643 = vpow2.f32 %v5157_v27  ;;  %v5638_v10 = vpop.eup %5637  ;;  %v3668_v24 = vadd.f32 %v7452_v4, %v3667_v23  ;;  %vm3655_vm0 = vweird.f32 %v5636_v41  ;;  %3928 = vmatmul.bf16.vlgmr.msrb.gmra.mxu2 %v3769_v55 }
 0x3fe   :  { %v5640_v47 = vpop.eup %5639  ;;  %v3627_v31 = vsel %vm3626_vm10, %v7446_v48, %v3623_v32  ;;  %v3576_v21 = vsub.f32 1.0, %v3575_v0  ;;  %v7499_v44 = vadd.f32 1.0, %v5638_v10  ;;  %v7508_v48 = vmul.f32 %v7424_v7, %v7360_v2  ;;  %vm3656_vm11 = vmor %vm3654_vm13, %vm3655_vm0 }
 0x3ff   :  { %v3651_v45 = vsub.f32 1.0, %v3650_v12  ;;  %v3412_v59 = vpop.f32.mrf.mxu2  ;;  %v3632_v14 = vsel %vm7456_vm1, %v3631_v38, %v3627_v31  ;;  %v3672_v61 = vsel %vm3671_vm12, %v7452_v4, %v3668_v24  ;;  %v7504_v52 = vadd.f32 1.0, %v5640_v47 }
 0x400   :  { %v3477_v5 = vpop.f32.mrf.mxu3  ;;  %3740 = vst [vmem:[#allocation2 + $0x1] sm:$0x1] %v3632_v14  ;;  %v3677_v6 = vsel %vm7465_vm6, %v3676_v8, %v3672_v61  ;;  %5645 = vrcp.f32 %v7499_v44  ;;  %v3304_v38 = vperm.slane %v7310_v57, 2  ;;  %v5540_v8 = vld [vmem:[%s7709_s17 + $0x18] sm:$0xff]  ;;  %v3577_v51 = vmul.f32 %v7474_v11, %v3576_v21  ;;  %3854 = vmatpush.bf16.msra.mxu1 %v5535_v34 }
 0x401   :  { %v3652_v25 = vmul.f32 %v5636_v41, %v3651_v45  ;;  %3743 = vst [vmem:[#allocation2 + $0x4] sm:$0x1] %v3677_v6  ;;  %5647 = vrcp.f32 %v7504_v52  ;;  %vm3595_vm14 = vweird.f32 %v7424_v7  ;;  %v3688_v39 = vand.u32 2147483647, %v7499_v44  ;;  %4009 = vmatpush.bf16.msrb.mxu3 %v5540_v8  ;;  %v5534_v8 = vld [vmem:[%s7710_s16 + $0x28] sm:$0xff] }
 0x402   :  { %v5642_v28 = vpop.eup %5641  ;;  %v3690_v53 = vand.u32 2147483648, %v7499_v44  ;;  %v3733_v43 = vand.u32 2147483647, %v7504_v52  ;;  %v3735_v57 = vand.u32 2147483648, %v7504_v52  ;;  %vm3594_vm4 = vweird.f32 %v7360_v2 }
 0x403   :  { %v3653_v37 = vadd.f32 %v5636_v41, %v3652_v25  ;;  %v5644_v4 = vpop.eup %5643  ;;  %v7517_v35 = vadd.f32 1.0, %v5642_v28  ;;  %v3591_v46 = vsub.f32 1.0, %v7508_v48  ;;  %vm3579_vm15 = vweird.f32 %v7416_v19  ;;  %v5537_v28 = vld [vmem:[%s7709_s17] sm:$0xff] }
 0x404   :  { %v7527_v62 = vadd.f32 1.0, %v5644_v4  ;;  %v7539_v3 = vor.u32 1.1754944e-38, %v3600_v17  ;;  %vm3684_vm2 = vweird.f32 %v7499_v44  ;;  %vm3729_vm3 = vweird.f32 %v7504_v52  ;;  %3855 = vmatpush.bf16.msra.mxu1 %v5534_v8 }
 0x405   :  { %v3657_v9 = vsel %vm3656_vm11, %v5636_v41, %v3653_v37  ;;  %5649 = vrcp.f32 %v7517_v35  ;;  %vm3580_vm5 = vweird.f32 %v7474_v11  ;;  %vm7553_vm1 = vcmp.eq.f32.partialorder %v3688_v39, 8.507059e+37  ;;  %4010 = vmatpush.bf16.msrb.mxu3 %v5539_v54 }
 0x406   :  { %v3662_v20 = vsel %vm3659_vm9, %v3661_v33, %v3657_v9  ;;  %5651 = vrcp.f32 %v7527_v62  ;;  %v7541_v56 = vpop.eup %5645  ;;  %v3691_v41 = vor.u32 1.1754944e-38, %v3690_v53  ;;  %v3643_v40 = vand.u32 2147483647, %v7517_v35  ;;  %vm7597_vm9 = vmor %vm3579_vm15, %vm3580_vm5 }
 0x407   :  { %3742 = vst [vmem:[#allocation2 + $0x3] sm:$0x1] %v3662_v20  ;;  %v3462_v58 = vpop.f32.mrf.mxu2  ;;  %v7549_v15 = vpop.eup %5647  ;;  %v3680_v36 = vmul.f32 %v7541_v56, %v7499_v44  ;;  %v3578_v0 = vadd.f32 %v7474_v11, %v3577_v51  ;;  %vm7561_vm6 = vcmp.eq.f32.partialorder %v3598_v13, 8.507059e+37  ;;  %vm7567_vm7 = vcmp.eq.f32.partialorder %v3733_v43, 8.507059e+37  ;;  %v5538_v13 = vld [vmem:[%s7709_s17 + $0x8] sm:$0xff]  ;;  %vm7615_vm15 = vmor %vm3594_vm4, %vm3595_vm14 }
 0x408   :  { %v3463_v42 = vadd.f32 %v3462_v58, %v3304_v38  ;;  %v3725_v23 = vmul.f32 %v7549_v15, %v7504_v52  ;;  %v3736_v32 = vor.u32 1.1754944e-38, %v3735_v57  ;;  %v3645_v26 = vand.u32 2147483648, %v7517_v35 }
 0x409   :  { %v3718_v22 = vand.u32 2147483647, %v7527_v62  ;;  %v3681_v10 = vsub.f32 1.0, %v3680_v36  ;;  %vm3685_vm8 = vweird.f32 %v7541_v56  ;;  %vm3639_vm10 = vweird.f32 %v7517_v35  ;;  %4011 = vmatpush.bf16.msrb.mxu3 %v5538_v13 }
 0x40a   :  { %v3720_v24 = vand.u32 2147483648, %v7527_v62  ;;  %v5156_v45 = vmul.f32 -1.442695, %v3463_v42  ;;  %v3726_v59 = vsub.f32 1.0, %v3725_v23  ;;  %v3583_v47 = vand.u32 2147483647, %v7416_v19  ;;  %vm3686_vm5 = vmor %vm3684_vm2, %vm3685_vm8 }
 0x40b   :  { %v5650_v30 = vpop.eup %5649  ;;  %v3585_v31 = vand.u32 2147483648, %v7416_v19  ;;  %v3592_v21 = vmul.f32 %v7424_v7, %v3591_v46  ;;  %v3682_v5 = vmul.f32 %v7541_v56, %v3681_v10  ;;  %vm3730_vm12 = vweird.f32 %v7549_v15  ;;  %v5531_v10 = vld [vmem:[%s7710_s16 + $0x10] sm:$0xff] }
 0x40c   :  { %v5652_v55 = vpop.eup %5651  ;;  %v3635_v14 = vmul.f32 %v5650_v30, %v7517_v35  ;;  %vm7589_vm13 = vcmp.eq.f32.partialorder %v3643_v40, 8.507059e+37  ;;  %5653 = vpow2.f32 %v5156_v45  ;;  %v3727_v48 = vmul.f32 %v7549_v15, %v3726_v59  ;;  %vm3731_vm14 = vmor %vm3729_vm3, %vm3730_vm12 }
 0x40d   :  { %vm3640_vm11 = vweird.f32 %v5650_v30  ;;  %v3710_v6 = vmul.f32 %v5652_v55, %v7527_v62  ;;  %v3582_v17 = vsel %vm7597_vm9, %v7474_v11, %v3578_v0  ;;  %v3683_v19 = vadd.f32 %v7541_v56, %v3682_v5  ;;  %4012 = vmatpush.bf16.msrb.mxu3 %v5537_v28 }
 0x40e   :  { %v3636_v37 = vsub.f32 1.0, %v3635_v14  ;;  %v3586_v4 = vor.u32 1.1754944e-38, %v3585_v31  ;;  %v3593_v33 = vadd.f32 %v7424_v7, %v3592_v21  ;;  %v3728_v51 = vadd.f32 %v7549_v15, %v3727_v48  ;;  %vm3641_vm4 = vmor %vm3639_vm10, %vm3640_vm11 }
 0x40f   :  { %v3464_v11 = vpop.f32.mrf.mxu2  ;;  %v3711_v9 = vsub.f32 1.0, %v3710_v6  ;;  %vm3715_vm9 = vweird.f32 %v5652_v55  ;;  %vm3584_vm0 = vcmp.eq.f32.partialorder %v3583_v47, 8.507059e+37  ;;  %v3687_v2 = vsel %vm3686_vm5, %v7541_v56, %v3683_v19  ;;  %v5529_v47 = vld [vmem:[%s7710_s16] sm:$0xff] }
 0x410   :  { %v3637_v39 = vmul.f32 %v5650_v30, %v3636_v37  ;;  %v3587_v53 = vsel %vm3584_vm0, %v3586_v4, %v3582_v17  ;;  %v3597_v20 = vsel %vm7615_vm15, %v7424_v7, %v3593_v33  ;;  %v3692_v44 = vsel %vm7553_vm1, %v3691_v41, %v3687_v2  ;;  %v5533_v7 = vld [vmem:[%s7710_s16 + $0x20] sm:$0xff] }
 0x411   :  { %v3732_v43 = vsel %vm3731_vm14, %v7549_v15, %v3728_v51  ;;  %v3712_v57 = vmul.f32 %v5652_v55, %v3711_v9  ;;  %v3602_v46 = vsel %vm7561_vm6, %v7539_v3, %v3597_v20  ;;  %3744 = vst [vmem:[#allocation2 + $0x5] sm:$0x1] %v3692_v44  ;;  %v3752_v56 = vperm.slane %v3587_v53, 0  ;;  %3856 = vmatpush.bf16.msra.mxu1 %v5533_v7  ;;  %v5552_v51 = vld [vmem:[%s7711_s18] ss:$0 sm:$0xff] }
 0x412   :  { %v5654_v58 = vpop.eup %5653  ;;  %v3737_v52 = vsel %vm7567_vm7, %v3736_v32, %v3732_v43  ;;  %v3638_v54 = vadd.f32 %v5650_v30, %v3637_v39  ;;  %v3754_v42 = vperm.slane %v3602_v46, 0  ;;  %v3646_v3 = vor.u32 1.1754944e-38, %v3645_v26  ;;  %v5532_v32 = vld [vmem:[%s7710_s16 + $0x18] sm:$0xff] }
 0x413   :  { %v3764_v60 = vperm.slane %v3737_v52, 0  ;;  %v3713_v15 = vadd.f32 %v5652_v55, %v3712_v57  ;;  %v3541_v36 = vadd.f32 1.0, %v5654_v58  ;;  %vm7791_vm2 = vweird.f32 %v7527_v62 }
 0x414   :  { %v3642_v63 = vsel %vm3641_vm4, %v5650_v30, %v3638_v54  ;;  %vm3716_vm3 = vmor %vm7791_vm2, %vm3715_vm9  ;;  %v3721_v41 = vor.u32 1.1754944e-38, %v3720_v24  ;;  %v3753_v40 = vmul.f32 %v3752_v56, %v7187_v18  ;;  %v3755_v0 = vmul.f32 %v3754_v42, %v7187_v18 }
 0x415   :  { %v3647_v27 = vsel %vm7589_vm13, %v3646_v3, %v3642_v63  ;;  %v3717_v23 = vsel %vm3716_vm3, %v5652_v55, %v3713_v15  ;;  %vm3719_vm1 = vcmp.eq.f32.partialorder %v3718_v22, 8.507059e+37  ;;  %5655 = vrcp.f32 %v3541_v36  ;;  %3857 = vmatpush.bf16.msra.mxu1 %v5532_v32 }
 0x416   :  { %3741 = vst [vmem:[#allocation2 + $0x2] sm:$0x1] %v3647_v27  ;;  %v3722_v35 = vsel %vm3719_vm1, %v3721_v41, %v3717_v23  ;;  %v3770_v12 = vpack.c.bf16 %v3755_v0, %v3753_v40  ;;  %v3765_v26 = vmul.f32 %v3764_v60, %v7332_v1  ;;  %v3766_v18 = vmul.f32 %v3764_v60, %v7335_v50  ;;  %v5530_v1 = vld [vmem:[%s7710_s16 + $0x8] sm:$0xff] }
 0x417   :  { %3746 = vst [vmem:[#allocation2 + $0x7] sm:$0x1] %v3722_v35  ;;  %v3767_v13 = vmul.f32 %v3764_v60, %v7343_v29  ;;  %v3768_v34 = vmul.f32 %v3764_v60, %v7346_v16  ;;  %v3705_v50 = vand.u32 2147483648, %v3541_v36  ;;  %v3703_v16 = vand.u32 2147483647, %v3541_v36 }
 0x418   :  { %3933 = vmatmul.bf16.gmra.mxu2 %v3770_v12  ;;  %v3939_v62 = vpack.c.bf16 %v3766_v18, %v3765_v26  ;;  %vm3699_vm7 = vweird.f32 %v3541_v36  ;;  %v3756_v5 = vperm.slane %v7242_v49, 0  ;;  %v3758_v14 = vperm.slane %v7242_v49, 1 }
 0x419   :  { %v3940_v22 = vpack.c.bf16 %v3768_v34, %v3767_v13  ;;  %3858 = vmatpush.bf16.msra.mxu1 %v5531_v10  ;;  %v3706_v31 = vor.u32 1.1754944e-38, %v3705_v50  ;;  %vm3704_vm10 = vcmp.eq.f32.partialorder %v3703_v16, 8.507059e+37  ;;  %v3760_v17 = vperm.slane %v7242_v49, 2 }
 0x41a   :  { %4013 = vmatmul.bf16.vlgmr.msrb.gmra.mxu3 %v3939_v62  ;;  %v3762_v28 = vperm.slane %v7242_v49, 3 }
 0x41b   :  { %v5656_v24 = vpop.eup %5655 }
 0x41c   :  { %v3695_v45 = vmul.f32 %v5656_v24, %v3541_v36  ;;  %vm3700_vm6 = vweird.f32 %v5656_v24 }
 0x41d   :  { %3859 = vmatpush.bf16.msra.mxu1 %v5530_v1  ;;  %vm3701_vm8 = vmor %vm3699_vm7, %vm3700_vm6 }
 0x41e   :  { %v3696_v30 = vsub.f32 1.0, %v3695_v45 }
 0x420   :  { %v3697_v29 = vmul.f32 %v5656_v24, %v3696_v30 }
 0x421   :  { %3860 = vmatpush.bf16.msra.mxu1 %v5529_v47 }
 0x422   :  { %v3698_v59 = vadd.f32 %v5656_v24, %v3697_v29 }
 0x424   :  { %v3702_v21 = vsel %vm3701_vm8, %v5656_v24, %v3698_v59 }
 0x425   :  { %v3707_v55 = vsel %vm3704_vm10, %v3706_v31, %v3702_v21 }
 0x426   :  { %3745 = vst [vmem:[#allocation2 + $0x6] sm:$0x1] %v3707_v55 }
 0x42a   :  { %4018 = vmatmul.bf16.gmra.mxu3 %v3940_v22 }
 0x42d   :  { %v3747_v61 = vld [vmem:[#allocation2] sm:$0xff] }
 0x42e   :  { %v3757_v25 = vmul.f32 %v3756_v5, %v3747_v61  ;;  %v3759_v48 = vmul.f32 %v3758_v14, %v3747_v61  ;;  %v3761_v19 = vmul.f32 %v3760_v17, %v3747_v61  ;;  %v3763_v37 = vmul.f32 %v3762_v28, %v3747_v61 }
 0x430   :  { %v3787_v6 = vpack.c.bf16 %v3759_v48, %v3757_v25  ;;  %v3788_v4 = vpack.c.bf16 %v3763_v37, %v3761_v19 }
 0x432   :  { %3861 = vmatmul.bf16.vlgmr.msra.gmra.mxu1 %v3787_v6 }
 0x442   :  { %3866 = vmatmul.bf16.gmra.mxu1 %v3788_v4 }
 0x480   :  { %v3929_v33 = vpop.f32.mrf.mxu2 }
 0x488   :  { %v3931_v2 = vpop.f32.mrf.mxu2 }
 0x49b   :  { %v3934_v46 = vpop.f32.mrf.mxu2 }
 0x49d   :  { %v4014_v38 = vpop.f32.mrf.mxu3 }
 0x4a3   :  { %v3936_v3 = vpop.f32.mrf.mxu2 }
 0x4a5   :  { %v4016_v53 = vpop.f32.mrf.mxu3 }
 0x4ad   :  { %v4019_v52 = vpop.f32.mrf.mxu3 }
 0x4af   :  { %v3862_v11 = vpop.f32.mrf.mxu1 }
 0x4b0   :  { %v3930_v8 = vadd.f32 %v3929_v33, %v3862_v11 }
 0x4b2   :  { %v4024_v9 = vadd.f32 %v4014_v38, %v3930_v8 }
 0x4b4   :  { %v4032_v39 = vadd.f32 %v5552_v51, %v4024_v9 }
 0x4b5   :  { %v4021_v63 = vpop.f32.mrf.mxu3 }
 0x4b6   :  { %v4036_v20 = vmax.f32 %v4032_v39, 0.0 }
 0x4b7   :  { %v3864_v44 = vpop.f32.mrf.mxu1 }
 0x4b8   :  { %5255 = vst [vmem:[%s7712_s19 + $0x20] sm:$0xff] %v4036_v20  ;;  %v3932_v49 = vadd.f32 %v3931_v2, %v3864_v44 }
 0x4ba   :  { %v4025_v43 = vadd.f32 %v4016_v53, %v3932_v49 }
 0x4bc   :  { %v4033_v57 = vadd.f32 %v5552_v51, %v4025_v43 }
 0x4be   :  { %v4037_v58 = vmax.f32 %v4033_v57, 0.0 }
 0x4bf   :  { %v3867_v54 = vpop.f32.mrf.mxu1 }
 0x4c0   :  { %5256 = vst [vmem:[%s7712_s19 + $0x28] sm:$0xff] %v4037_v58  ;;  %v3935_v56 = vadd.f32 %v3934_v46, %v3867_v54 }
 0x4c2   :  { %v4026_v42 = vadd.f32 %v4019_v52, %v3935_v56 }
 0x4c4   :  { %v4034_v7 = vadd.f32 %v5552_v51, %v4026_v42 }
 0x4c6   :  { %v4038_v60 = vmax.f32 %v4034_v7, 0.0 }
 0x4c7   :  { %v3869_v15 = vpop.f32.mrf.mxu1 }
 0x4c8   :  { %5257 = vst [vmem:[%s7712_s19 + $0x30] sm:$0xff] %v4038_v60  ;;  %v3937_v36 = vadd.f32 %v3936_v3, %v3869_v15 }
 0x4ca   :  { %v4027_v41 = vadd.f32 %v4021_v63, %v3937_v36 }
 0x4cc   :  { %v4035_v40 = vadd.f32 %v5552_v51, %v4027_v41 }
 0x4ce   :  { %v4039_v0 = vmax.f32 %v4035_v40, 0.0 }
 0x4d0   :  { %5258 = vst [vmem:[%s7712_s19 + $0x38] sm:$0xff] %v4039_v0 }

</bundles_post_ra>
